<compile_context>
chip_gen: v7x
topology: tpu7x:2x2x1
jax: 0.10.0
libtpu: 0.0.40
codegen_flags: <defaults>
</compile_context>

<pallas_src>
import functools

import jax
import jax.numpy as jnp
from jax.experimental import pallas as pl
from jax.experimental.pallas import tpu as pltpu

_VMEM_LIMIT = 48 * 1024 * 1024  # headroom on v7x (64 MiB physical per TC)


def _round_up(x, m):
    return (x + m - 1) // m * m


def _softmax_exp_dtype():
    """bf16 exp ~doubles EUP throughput on v6e/v7x; older chips lack bf16 EUP."""
    try:
        kind = jax.devices()[0].device_kind.lower()
    except Exception:
        return jnp.float32
    if any(tag in kind for tag in ("v6", "v7", "7x")):
        return jnp.bfloat16
    return jnp.float32


# ----------------------------------------------------------------------------
# Pallas kernel 1: fused 3x3 conv (+bias / folded BN) -- no im2col in HBM.
#
# The padded image is flattened row-major to (rows, C) with row stride
# R = W + 2*pad.  For output flat position m, tap (kh, kw) contributes
# x_flat[m + kh*R + kw, :] @ W[kh, kw]; all 9 taps are plain matmuls over
# contiguous, statically shifted row windows of the same VMEM block and are
# accumulated in f32 inside the kernel.  Columns j in [Wo, R) of each output
# row are garbage and sliced off after the call (<= ~2/W wasted compute).
# ----------------------------------------------------------------------------
def _conv3x3_kernel(x_ref, w_ref, b_ref, o_ref, *, row_stride, m_rows):
    # x_ref: (1, Min, C) bf16   w_ref: (9, C, tn) bf16
    # b_ref: (1, tn) f32        o_ref: (1, m_rows, tn)
    acc = None
    for kh in range(3):
        for kw in range(3):
            off = kh * row_stride + kw                       # static shift
            a = x_ref[0, off:off + m_rows, :]                # (m_rows, C)
            d = jnp.dot(a, w_ref[kh * 3 + kw],
                        preferred_element_type=jnp.float32)  # MXU, f32 acc
            acc = d if acc is None else acc + d
    o_ref[0] = (acc + b_ref[...]).astype(o_ref.dtype)


def conv3x3_bias(x_nhwc, w_taps, bias, padding, out_dtype=jnp.bfloat16):
    """3x3 conv, stride 1.  x: (B,H,W,C); w_taps: (9, C, N) tap-major (kh,kw);
    bias: (N,).  Returns (B, Ho, Wo, N)."""
    B, H, W, C = x_nhwc.shape
    assert w_taps.shape[:2] == (9, C)
    N = w_taps.shape[-1]
    Hp, R = H + 2 * padding, W + 2 * padding
    Ho, Wo = Hp - 2, R - 2

    if padding:
        x_nhwc = jnp.pad(
            x_nhwc, ((0, 0), (padding, padding), (padding, padding), (0, 0)))
    xf = x_nhwc.reshape(B, Hp * R, C)

    m_rows = _round_up(Ho * R, 8)                   # output rows computed per image
    min_rows = _round_up(m_rows + 2 * R + 2, 8)     # covers the largest tap shift
    xf = jnp.pad(xf, ((0, 0), (0, min_rows - Hp * R), (0, 0))).astype(jnp.bfloat16)
    w_taps = w_taps.astype(jnp.bfloat16)
    bias = bias.astype(jnp.float32).reshape(1, N)

    # Tile N only when large and 128-aligned; otherwise keep the full width
    # resident (block == full dim is always legal).  Weight block index is
    # constant across the batch axis so it is not re-fetched.
    tn = N
    if N > 512:
        for cand in (512, 256, 128):
            if N % cand == 0:
                tn = cand
                break

    kern = functools.partial(_conv3x3_kernel, row_stride=R, m_rows=m_rows)
    out = pl.pallas_call(
        kern,
        out_shape=jax.ShapeDtypeStruct((B, m_rows, N), out_dtype),
        grid_spec=pltpu.PrefetchScalarGridSpec(
            num_scalar_prefetch=0,
            grid=(B, N // tn),
            in_specs=[
                pl.BlockSpec((1, min_rows, C), lambda b, j: (b, 0, 0)),
                pl.BlockSpec((9, C, tn), lambda b, j: (0, 0, j)),
                pl.BlockSpec((1, tn), lambda b, j: (0, j)),
            ],
            out_specs=pl.BlockSpec((1, m_rows, tn), lambda b, j: (b, 0, j)),
        ),
        compiler_params=pltpu.CompilerParams(
            dimension_semantics=("parallel", "parallel"),
            vmem_limit_bytes=_VMEM_LIMIT),
    )(xf, w_taps, bias)
    # Strip rounding rows and the row-stride garbage columns.
    out = out[:, :Ho * R, :].reshape(B, Ho, R, N)[:, :, :Wo, :]
    return out


# ----------------------------------------------------------------------------
# Pallas kernel 2: online-softmax flash attention, all heads lane-dense in C.
# ----------------------------------------------------------------------------
def _flash_attn_kernel(q_ref, k_ref, v_ref, o_ref, m_ref, l_ref, acc_ref, *,
                       num_head, dim_head, seq_len, tile_kv, padded_kv,
                       exp_dtype):
    ki = pl.program_id(2)

    @pl.when(ki == 0)
    def _init():
        m_ref[...] = jnp.full(m_ref.shape, -jnp.inf, dtype=m_ref.dtype)
        l_ref[...] = jnp.zeros(l_ref.shape, dtype=l_ref.dtype)
        acc_ref[...] = jnp.zeros(acc_ref.shape, dtype=acc_ref.dtype)

    q_all = q_ref[0]   # (tq, C) bf16; softmax scale already folded into q conv
    k_all = k_ref[0]   # (tkv, C)
    v_all = v_ref[0]   # (tkv, C)

    # Hoisted additive padding mask, shared by every head this kv step.
    mask_bias = None
    if padded_kv:
        kv_pos = ki * tile_kv + jax.lax.broadcasted_iota(jnp.int32, (1, tile_kv), 1)
        # -1e30 is safe: s stays f32 and it is representable in bf16 for the exp arg.
        mask_bias = jnp.where(kv_pos < seq_len, 0.0, -1e30).astype(jnp.float32)

    for h in range(num_head):
        sl = slice(h * dim_head, (h + 1) * dim_head)
        qh, kh, vh = q_all[:, sl], k_all[:, sl], v_all[:, sl]

        s = jax.lax.dot_general(qh, kh, (((1,), (1,)), ((), ())),
                                preferred_element_type=jnp.float32)  # (tq, tkv)
        if mask_bias is not None:
            s = s + mask_bias

        m_prev = m_ref[h]                                            # (tq, 1) f32
        m_new = jnp.maximum(m_prev, jnp.max(s, axis=-1, keepdims=True))
        alpha = jnp.exp(m_prev - m_new)                              # f32
        p = jnp.exp((s - m_new).astype(exp_dtype))                   # bf16 on v6e/v7x
        l_inc = jnp.sum(p.astype(jnp.float32), axis=-1, keepdims=True)
        pv = jax.lax.dot_general(p.astype(jnp.bfloat16), vh,
                                 (((1,), (0,)), ((), ())),
                                 preferred_element_type=jnp.float32)  # (tq, D)
        # Lane-dense running stats: head h owns lanes [h*D, (h+1)*D).
        l_ref[:, sl] = alpha * l_ref[:, sl] + l_inc
        acc_ref[:, sl] = alpha * acc_ref[:, sl] + pv
        m_ref[h] = m_new

    @pl.when(ki == pl.num_programs(2) - 1)
    def _finalize():
        # Clamp so fully-padded query rows can never hit 1/0; then a single
        # lane-dense multiply + cast + unmasked (tq, C) store.
        inv = pl.reciprocal(jnp.maximum(l_ref[...], 1e-30), approx=True)
        o_ref[0] = (acc_ref[...] * inv).astype(o_ref.dtype)


def flash_attention(q, k, v, num_head, tile_q=256, tile_kv=128,
                    exp_dtype=jnp.float32):
    """q, k, v: (B, S, C) with heads laid out as contiguous C/num_head slabs."""
    B, S, C = q.shape
    assert C % num_head == 0
    D = C // num_head

    tq = min(tile_q, _round_up(S, 8))
    tkv = min(tile_kv, _round_up(S, 8))
    Sq, Skv = _round_up(S, tq), _round_up(S, tkv)
    if Sq != S:
        q = jnp.pad(q, ((0, 0), (0, Sq - S), (0, 0)))
    if Skv != S:
        k = jnp.pad(k, ((0, 0), (0, Skv - S), (0, 0)))
        v = jnp.pad(v, ((0, 0), (0, Skv - S), (0, 0)))

    kern = functools.partial(
        _flash_attn_kernel, num_head=num_head, dim_head=D, seq_len=S,
        tile_kv=tkv, padded_kv=(Skv != S), exp_dtype=exp_dtype)

    out = pl.pallas_call(
        kern,
        out_shape=jax.ShapeDtypeStruct((B, Sq, C), q.dtype),
        grid_spec=pltpu.PrefetchScalarGridSpec(
            num_scalar_prefetch=0,
            grid=(B, Sq // tq, Skv // tkv),
            in_specs=[pl.BlockSpec((1, tq, C), lambda b, qi, ki: (b, qi, 0)),
                      pl.BlockSpec((1, tkv, C), lambda b, qi, ki: (b, ki, 0)),
                      pl.BlockSpec((1, tkv, C), lambda b, qi, ki: (b, ki, 0))],
            out_specs=pl.BlockSpec((1, tq, C), lambda b, qi, ki: (b, qi, 0)),
            scratch_shapes=[
                pltpu.VMEM((num_head, tq, 1), jnp.float32),  # running max per head
                pltpu.VMEM((tq, C), jnp.float32),            # running sum (lane-replicated)
                pltpu.VMEM((tq, C), jnp.float32),            # running output, lane-dense
            ]),
        compiler_params=pltpu.CompilerParams(
            dimension_semantics=("parallel", "parallel", "arbitrary"),
            vmem_limit_bytes=_VMEM_LIMIT),
    )(q, k, v)
    if Sq != S:
        out = out[:, :S, :]
    return out


# ----------------------------------------------------------------------------
# Glue: weight packing, full forward
# ----------------------------------------------------------------------------
def _pack_weight_taps(w_oihw):
    # (O, C, kh, kw) -> (kh*kw, C, O): tap-major to match the kernel's tap loop.
    O, C, KH, KW = w_oihw.shape
    return jnp.transpose(w_oihw, (2, 3, 1, 0)).reshape(KH * KW, C, O)


def conv_mha_forward(x_nchw, params, num_head):
    B, C, H, W = x_nchw.shape
    dim_head = C // num_head
    assert C % num_head == 0 and dim_head % 2 == 0
    scale = dim_head ** (-0.5)

    x = jnp.transpose(x_nchw, (0, 2, 3, 1))  # NHWC

    # --- qkv = Conv2d(C, 3C, k=3, pad=1, bias=True); softmax scale folded into
    #     the q output channels so the attention kernel never multiplies by it.
    w_qkv = _pack_weight_taps(params["qkv_w"])                        # (9, C, 3C)
    ch_scale = jnp.concatenate(
        [jnp.full((C,), scale, jnp.float32), jnp.ones((2 * C,), jnp.float32)])
    w_qkv = w_qkv * ch_scale[None, None, :]
    b_qkv = params["qkv_b"] * ch_scale

    qkv = conv3x3_bias(x, w_qkv, b_qkv, padding=1,
                       out_dtype=jnp.bfloat16)                        # (B, H, W, 3C)
    qkv = qkv.reshape(B, H * W, 3 * C)

    # q/k/v are contiguous channel slabs; head h lives in channels [h*D,(h+1)*D),
    # which equals the head-concat layout of the attention output, so no head
    # transposes are needed around the attention kernel.
    q, k, v = jnp.split(qkv, [C, 2 * C], axis=-1)                     # (B, S, C)

    o = flash_attention(q, k, v, num_head, exp_dtype=_softmax_exp_dtype())
    o = o.reshape(B, H, W, C)

    # --- conv1: Conv2d(C, C, k=3, pad=0, bias=False) + BatchNorm (folded, eval).
    gamma_eff = params["bn_gamma"] * jax.lax.rsqrt(params["bn_var"] + 1e-5)
    beta_eff = params["bn_beta"] - params["bn_mean"] * gamma_eff
    w1 = _pack_weight_taps(params["conv1_w"]) * gamma_eff[None, None, :]
    y = conv3x3_bias(o, w1, beta_eff, padding=0, out_dtype=jnp.float32)
    return jnp.transpose(y, (0, 3, 1, 2))                             # back to NCHW


def init_params(key, ch):
    k1, k2, k3, k4, k5, k6, k7 = jax.random.split(key, 7)
    chout = 3 * ch
    return {
        "qkv_w": 0.1 * jax.random.normal(k1, (chout, ch, 3, 3), jnp.float32),
        "qkv_b": 0.1 * jax.random.normal(k2, (chout,), jnp.float32),
        "conv1_w": 0.1 * jax.random.normal(k3, (ch, ch, 3, 3), jnp.float32),
        "bn_gamma": 1.0 + 0.1 * jax.random.normal(k4, (ch,), jnp.float32),
        "bn_beta": 0.1 * jax.random.normal(k5, (ch,), jnp.float32),
        "bn_mean": 0.1 * jax.random.normal(k6, (ch,), jnp.float32),
        "bn_var": jnp.abs(jax.random.normal(k7, (ch,), jnp.float32)) + 0.5,
    }


if __name__ == "__main__":
    B, CH, H, W = 2, 16, 8, 8
    NUM_HEAD = 4  # dim_head = 4 (even)

    key = jax.random.PRNGKey(0)
    kx, kp = jax.random.split(key)
    x = jax.random.normal(kx, (B, CH, H, W), jnp.float32)
    params = init_params(kp, CH)

    fwd = jax.jit(functools.partial(conv_mha_forward, num_head=NUM_HEAD))
    out = fwd(x, params)
    jax.block_until_ready(out)
    assert out.shape == (B, CH, H - 2, W - 2), out.shape
    assert bool(jnp.all(jnp.isfinite(out)))
    print("KERNEL_OK")
</pallas_src>

<mosaic_0001>
module attributes {stable_mosaic.version = 11 : i64} {
  func.func @_conv3x3_kernel(%arg0: i32, %arg1: i32, %arg2: memref<1x104x16xbf16, #tpu.memory_space<vmem>>, %arg3: memref<9x16x48xbf16, #tpu.memory_space<vmem>>, %arg4: memref<1x48xf32, #tpu.memory_space<vmem>>, %arg5: memref<1x80x48xbf16, #tpu.memory_space<vmem>>) attributes {dimension_semantics = [#tpu.dimension_semantics<parallel>, #tpu.dimension_semantics<parallel>], iteration_bounds = array<i64: 2, 1>, scalar_prefetch = 0 : i64, scratch_operands = 0 : i64, tpu.core_type = #tpu.core_type<tc>, window_params = [{transform_indices = @transform_0, window_bounds = array<i64: 1, 104, 16>}, {transform_indices = @transform_1, window_bounds = array<i64: 9, 16, 48>}, {transform_indices = @transform_2, window_bounds = array<i64: 1, 48>}, {transform_indices = @transform_3, window_bounds = array<i64: 1, 80, 48>}]} {
    %c0 = arith.constant 0 : index
    %c0_0 = arith.constant 0 : index
    %c0_1 = arith.constant 0 : index
    %0 = vector.load %arg2[%c0, %c0_0, %c0_1] : memref<1x104x16xbf16, #tpu.memory_space<vmem>>, vector<1x80x16xbf16>
    %1 = vector.shape_cast %0 : vector<1x80x16xbf16> to vector<80x16xbf16>
    %c0_2 = arith.constant 0 : index
    %c0_3 = arith.constant 0 : index
    %c0_4 = arith.constant 0 : index
    %2 = vector.load %arg3[%c0_2, %c0_3, %c0_4] : memref<9x16x48xbf16, #tpu.memory_space<vmem>>, vector<1x16x48xbf16>
    %3 = vector.shape_cast %2 : vector<1x16x48xbf16> to vector<16x48xbf16>
    %cst = arith.constant dense<0.000000e+00> : vector<80x48xf32>
    %4 = tpu.matmul %1, %3, %cst {dimension_numbers = #tpu.dot_dimension_numbers<[1], [0], [0], [1], [0, 0, 1, 1], [], []>} : vector<80x16xbf16>, vector<16x48xbf16>, vector<80x48xf32> -> vector<80x48xf32>
    %c0_5 = arith.constant 0 : index
    %c1 = arith.constant 1 : index
    %c0_6 = arith.constant 0 : index
    %5 = vector.load %arg2[%c0_5, %c1, %c0_6] : memref<1x104x16xbf16, #tpu.memory_space<vmem>>, vector<1x80x16xbf16>
    %6 = vector.shape_cast %5 : vector<1x80x16xbf16> to vector<80x16xbf16>
    %c1_7 = arith.constant 1 : index
    %c0_8 = arith.constant 0 : index
    %c0_9 = arith.constant 0 : index
    %7 = vector.load %arg3[%c1_7, %c0_8, %c0_9] : memref<9x16x48xbf16, #tpu.memory_space<vmem>>, vector<1x16x48xbf16>
    %8 = vector.shape_cast %7 : vector<1x16x48xbf16> to vector<16x48xbf16>
    %cst_10 = arith.constant dense<0.000000e+00> : vector<80x48xf32>
    %9 = tpu.matmul %6, %8, %cst_10 {dimension_numbers = #tpu.dot_dimension_numbers<[1], [0], [0], [1], [0, 0, 1, 1], [], []>} : vector<80x16xbf16>, vector<16x48xbf16>, vector<80x48xf32> -> vector<80x48xf32>
    %10 = arith.addf %4, %9 : vector<80x48xf32>
    %c0_11 = arith.constant 0 : index
    %c2 = arith.constant 2 : index
    %c0_12 = arith.constant 0 : index
    %11 = vector.load %arg2[%c0_11, %c2, %c0_12] : memref<1x104x16xbf16, #tpu.memory_space<vmem>>, vector<1x80x16xbf16>
    %12 = vector.shape_cast %11 : vector<1x80x16xbf16> to vector<80x16xbf16>
    %c2_13 = arith.constant 2 : index
    %c0_14 = arith.constant 0 : index
    %c0_15 = arith.constant 0 : index
    %13 = vector.load %arg3[%c2_13, %c0_14, %c0_15] : memref<9x16x48xbf16, #tpu.memory_space<vmem>>, vector<1x16x48xbf16>
    %14 = vector.shape_cast %13 : vector<1x16x48xbf16> to vector<16x48xbf16>
    %cst_16 = arith.constant dense<0.000000e+00> : vector<80x48xf32>
    %15 = tpu.matmul %12, %14, %cst_16 {dimension_numbers = #tpu.dot_dimension_numbers<[1], [0], [0], [1], [0, 0, 1, 1], [], []>} : vector<80x16xbf16>, vector<16x48xbf16>, vector<80x48xf32> -> vector<80x48xf32>
    %16 = arith.addf %10, %15 : vector<80x48xf32>
    %c0_17 = arith.constant 0 : index
    %c10 = arith.constant 10 : index
    %c0_18 = arith.constant 0 : index
    %17 = vector.load %arg2[%c0_17, %c10, %c0_18] : memref<1x104x16xbf16, #tpu.memory_space<vmem>>, vector<1x80x16xbf16>
    %18 = vector.shape_cast %17 : vector<1x80x16xbf16> to vector<80x16xbf16>
    %c3 = arith.constant 3 : index
    %c0_19 = arith.constant 0 : index
    %c0_20 = arith.constant 0 : index
    %19 = vector.load %arg3[%c3, %c0_19, %c0_20] : memref<9x16x48xbf16, #tpu.memory_space<vmem>>, vector<1x16x48xbf16>
    %20 = vector.shape_cast %19 : vector<1x16x48xbf16> to vector<16x48xbf16>
    %cst_21 = arith.constant dense<0.000000e+00> : vector<80x48xf32>
    %21 = tpu.matmul %18, %20, %cst_21 {dimension_numbers = #tpu.dot_dimension_numbers<[1], [0], [0], [1], [0, 0, 1, 1], [], []>} : vector<80x16xbf16>, vector<16x48xbf16>, vector<80x48xf32> -> vector<80x48xf32>
    %22 = arith.addf %16, %21 : vector<80x48xf32>
    %c0_22 = arith.constant 0 : index
    %c11 = arith.constant 11 : index
    %c0_23 = arith.constant 0 : index
    %23 = vector.load %arg2[%c0_22, %c11, %c0_23] : memref<1x104x16xbf16, #tpu.memory_space<vmem>>, vector<1x80x16xbf16>
    %24 = vector.shape_cast %23 : vector<1x80x16xbf16> to vector<80x16xbf16>
    %c4 = arith.constant 4 : index
    %c0_24 = arith.constant 0 : index
    %c0_25 = arith.constant 0 : index
    %25 = vector.load %arg3[%c4, %c0_24, %c0_25] : memref<9x16x48xbf16, #tpu.memory_space<vmem>>, vector<1x16x48xbf16>
    %26 = vector.shape_cast %25 : vector<1x16x48xbf16> to vector<16x48xbf16>
    %cst_26 = arith.constant dense<0.000000e+00> : vector<80x48xf32>
    %27 = tpu.matmul %24, %26, %cst_26 {dimension_numbers = #tpu.dot_dimension_numbers<[1], [0], [0], [1], [0, 0, 1, 1], [], []>} : vector<80x16xbf16>, vector<16x48xbf16>, vector<80x48xf32> -> vector<80x48xf32>
    %28 = arith.addf %22, %27 : vector<80x48xf32>
    %c0_27 = arith.constant 0 : index
    %c12 = arith.constant 12 : index
    %c0_28 = arith.constant 0 : index
    %29 = vector.load %arg2[%c0_27, %c12, %c0_28] : memref<1x104x16xbf16, #tpu.memory_space<vmem>>, vector<1x80x16xbf16>
    %30 = vector.shape_cast %29 : vector<1x80x16xbf16> to vector<80x16xbf16>
    %c5 = arith.constant 5 : index
    %c0_29 = arith.constant 0 : index
    %c0_30 = arith.constant 0 : index
    %31 = vector.load %arg3[%c5, %c0_29, %c0_30] : memref<9x16x48xbf16, #tpu.memory_space<vmem>>, vector<1x16x48xbf16>
    %32 = vector.shape_cast %31 : vector<1x16x48xbf16> to vector<16x48xbf16>
    %cst_31 = arith.constant dense<0.000000e+00> : vector<80x48xf32>
    %33 = tpu.matmul %30, %32, %cst_31 {dimension_numbers = #tpu.dot_dimension_numbers<[1], [0], [0], [1], [0, 0, 1, 1], [], []>} : vector<80x16xbf16>, vector<16x48xbf16>, vector<80x48xf32> -> vector<80x48xf32>
    %34 = arith.addf %28, %33 : vector<80x48xf32>
    %c0_32 = arith.constant 0 : index
    %c20 = arith.constant 20 : index
    %c0_33 = arith.constant 0 : index
    %35 = vector.load %arg2[%c0_32, %c20, %c0_33] : memref<1x104x16xbf16, #tpu.memory_space<vmem>>, vector<1x80x16xbf16>
    %36 = vector.shape_cast %35 : vector<1x80x16xbf16> to vector<80x16xbf16>
    %c6 = arith.constant 6 : index
    %c0_34 = arith.constant 0 : index
    %c0_35 = arith.constant 0 : index
    %37 = vector.load %arg3[%c6, %c0_34, %c0_35] : memref<9x16x48xbf16, #tpu.memory_space<vmem>>, vector<1x16x48xbf16>
    %38 = vector.shape_cast %37 : vector<1x16x48xbf16> to vector<16x48xbf16>
    %cst_36 = arith.constant dense<0.000000e+00> : vector<80x48xf32>
    %39 = tpu.matmul %36, %38, %cst_36 {dimension_numbers = #tpu.dot_dimension_numbers<[1], [0], [0], [1], [0, 0, 1, 1], [], []>} : vector<80x16xbf16>, vector<16x48xbf16>, vector<80x48xf32> -> vector<80x48xf32>
    %40 = arith.addf %34, %39 : vector<80x48xf32>
    %c0_37 = arith.constant 0 : index
    %c21 = arith.constant 21 : index
    %c0_38 = arith.constant 0 : index
    %41 = vector.load %arg2[%c0_37, %c21, %c0_38] : memref<1x104x16xbf16, #tpu.memory_space<vmem>>, vector<1x80x16xbf16>
    %42 = vector.shape_cast %41 : vector<1x80x16xbf16> to vector<80x16xbf16>
    %c7 = arith.constant 7 : index
    %c0_39 = arith.constant 0 : index
    %c0_40 = arith.constant 0 : index
    %43 = vector.load %arg3[%c7, %c0_39, %c0_40] : memref<9x16x48xbf16, #tpu.memory_space<vmem>>, vector<1x16x48xbf16>
    %44 = vector.shape_cast %43 : vector<1x16x48xbf16> to vector<16x48xbf16>
    %cst_41 = arith.constant dense<0.000000e+00> : vector<80x48xf32>
    %45 = tpu.matmul %42, %44, %cst_41 {dimension_numbers = #tpu.dot_dimension_numbers<[1], [0], [0], [1], [0, 0, 1, 1], [], []>} : vector<80x16xbf16>, vector<16x48xbf16>, vector<80x48xf32> -> vector<80x48xf32>
    %46 = arith.addf %40, %45 : vector<80x48xf32>
    %c0_42 = arith.constant 0 : index
    %c22 = arith.constant 22 : index
    %c0_43 = arith.constant 0 : index
    %47 = vector.load %arg2[%c0_42, %c22, %c0_43] : memref<1x104x16xbf16, #tpu.memory_space<vmem>>, vector<1x80x16xbf16>
    %48 = vector.shape_cast %47 : vector<1x80x16xbf16> to vector<80x16xbf16>
    %c8 = arith.constant 8 : index
    %c0_44 = arith.constant 0 : index
    %c0_45 = arith.constant 0 : index
    %49 = vector.load %arg3[%c8, %c0_44, %c0_45] : memref<9x16x48xbf16, #tpu.memory_space<vmem>>, vector<1x16x48xbf16>
    %50 = vector.shape_cast %49 : vector<1x16x48xbf16> to vector<16x48xbf16>
    %cst_46 = arith.constant dense<0.000000e+00> : vector<80x48xf32>
    %51 = tpu.matmul %48, %50, %cst_46 {dimension_numbers = #tpu.dot_dimension_numbers<[1], [0], [0], [1], [0, 0, 1, 1], [], []>} : vector<80x16xbf16>, vector<16x48xbf16>, vector<80x48xf32> -> vector<80x48xf32>
    %52 = arith.addf %46, %51 : vector<80x48xf32>
    %c0_47 = arith.constant 0 : index
    %c0_48 = arith.constant 0 : index
    %53 = vector.load %arg4[%c0_47, %c0_48] : memref<1x48xf32, #tpu.memory_space<vmem>>, vector<1x48xf32>
    %54 = vector.broadcast %53 : vector<1x48xf32> to vector<80x48xf32>
    %55 = arith.addf %52, %54 : vector<80x48xf32>
    %56 = arith.truncf %55 : vector<80x48xf32> to vector<80x48xbf16>
    %c0_49 = arith.constant 0 : index
    %c0_50 = arith.constant 0 : index
    %c0_51 = arith.constant 0 : index
    %57 = vector.load %arg5[%c0_49, %c0_50, %c0_51] : memref<1x80x48xbf16, #tpu.memory_space<vmem>>, vector<1x80x48xbf16>
    %58 = vector.shape_cast %57 : vector<1x80x48xbf16> to vector<80x48xbf16>
    %59 = vector.shape_cast %56 : vector<80x48xbf16> to vector<1x80x48xbf16>
    tpu.vector_store %arg5[%c0_49, %c0_50, %c0_51], %59 {strides = array<i32>} : memref<1x80x48xbf16, #tpu.memory_space<vmem>>, vector<1x80x48xbf16>,
    return
  }
  func.func @transform_0(%arg0: i32, %arg1: i32) -> (i32, i32, i32) {
    %c0_i32 = arith.constant 0 : i32
    %c0_i32_0 = arith.constant 0 : i32
    %c0_i32_1 = arith.constant 0 : i32
    return %arg0, %c0_i32, %c0_i32_0 : i32, i32, i32
  }
  func.func @transform_1(%arg0: i32, %arg1: i32) -> (i32, i32, i32) {
    %c0_i32 = arith.constant 0 : i32
    %c0_i32_0 = arith.constant 0 : i32
    %c0_i32_1 = arith.constant 0 : i32
    return %c0_i32, %c0_i32_0, %arg1 : i32, i32, i32
  }
  func.func @transform_2(%arg0: i32, %arg1: i32) -> (i32, i32) {
    %c0_i32 = arith.constant 0 : i32
    %c0_i32_0 = arith.constant 0 : i32
    return %c0_i32, %arg1 : i32, i32
  }
  func.func @transform_3(%arg0: i32, %arg1: i32) -> (i32, i32, i32) {
    %c0_i32 = arith.constant 0 : i32
    %c0_i32_0 = arith.constant 0 : i32
    return %arg0, %c0_i32, %arg1 : i32, i32, i32
  }
}

module attributes {stable_mosaic.version = 11 : i64} {
  func.func @_flash_attn_kernel(%arg0: i32, %arg1: i32, %arg2: i32, %arg3: memref<1x64x16xbf16, #tpu.memory_space<vmem>>, %arg4: memref<1x64x16xbf16, #tpu.memory_space<vmem>>, %arg5: memref<1x64x16xbf16, #tpu.memory_space<vmem>>, %arg6: memref<1x64x16xbf16, #tpu.memory_space<vmem>>, %arg7: memref<4x64x1xf32, #tpu.memory_space<vmem>>, %arg8: memref<64x16xf32, #tpu.memory_space<vmem>>, %arg9: memref<64x16xf32, #tpu.memory_space<vmem>>) attributes {dimension_semantics = [#tpu.dimension_semantics<parallel>, #tpu.dimension_semantics<parallel>, #tpu.dimension_semantics<arbitrary>], iteration_bounds = array<i64: 2, 1, 1>, scalar_prefetch = 0 : i64, scratch_operands = 3 : i64, tpu.core_type = #tpu.core_type<tc>, window_params = [{transform_indices = @transform_0, window_bounds = array<i64: 1, 64, 16>}, {transform_indices = @transform_1, window_bounds = array<i64: 1, 64, 16>}, {transform_indices = @transform_2, window_bounds = array<i64: 1, 64, 16>}, {transform_indices = @transform_3, window_bounds = array<i64: 1, 64, 16>}]} {
    %c0_i32 = arith.constant 0 : i32
    %0 = arith.cmpi eq, %arg2, %c0_i32 : i32
    %1 = arith.extui %0 : i1 to i32
    %c0_i32_0 = arith.constant 0 : i32
    %2 = arith.cmpi ne, %1, %c0_i32_0 : i32
    scf.if %2 {
      %cst_76 = arith.constant 0xFF800000 : f32
      %140 = vector.broadcast %cst_76 : f32 to vector<4x64x1xf32>
      %c0_77 = arith.constant 0 : index
      %c0_78 = arith.constant 0 : index
      %c0_79 = arith.constant 0 : index
      %141 = vector.load %arg7[%c0_77, %c0_78, %c0_79] : memref<4x64x1xf32, #tpu.memory_space<vmem>>, vector<4x64x1xf32>
      tpu.vector_store %arg7[%c0_77, %c0_78, %c0_79], %140 {strides = array<i32>} : memref<4x64x1xf32, #tpu.memory_space<vmem>>, vector<4x64x1xf32>,
      %cst_80 = arith.constant 0.000000e+00 : f32
      %142 = vector.broadcast %cst_80 : f32 to vector<64x16xf32>
      %c0_81 = arith.constant 0 : index
      %c0_82 = arith.constant 0 : index
      %143 = vector.load %arg8[%c0_81, %c0_82] : memref<64x16xf32, #tpu.memory_space<vmem>>, vector<64x16xf32>
      tpu.vector_store %arg8[%c0_81, %c0_82], %142 {strides = array<i32>} : memref<64x16xf32, #tpu.memory_space<vmem>>, vector<64x16xf32>,
      %cst_83 = arith.constant 0.000000e+00 : f32
      %144 = vector.broadcast %cst_83 : f32 to vector<64x16xf32>
      %c0_84 = arith.constant 0 : index
      %c0_85 = arith.constant 0 : index
      %145 = vector.load %arg9[%c0_84, %c0_85] : memref<64x16xf32, #tpu.memory_space<vmem>>, vector<64x16xf32>
      tpu.vector_store %arg9[%c0_84, %c0_85], %144 {strides = array<i32>} : memref<64x16xf32, #tpu.memory_space<vmem>>, vector<64x16xf32>,
    } else {
    }
    %c0 = arith.constant 0 : index
    %c0_1 = arith.constant 0 : index
    %c0_2 = arith.constant 0 : index
    %3 = vector.load %arg3[%c0, %c0_1, %c0_2] : memref<1x64x16xbf16, #tpu.memory_space<vmem>>, vector<1x64x16xbf16>
    %4 = vector.shape_cast %3 : vector<1x64x16xbf16> to vector<64x16xbf16>
    %c0_3 = arith.constant 0 : index
    %c0_4 = arith.constant 0 : index
    %c0_5 = arith.constant 0 : index
    %5 = vector.load %arg4[%c0_3, %c0_4, %c0_5] : memref<1x64x16xbf16, #tpu.memory_space<vmem>>, vector<1x64x16xbf16>
    %6 = vector.shape_cast %5 : vector<1x64x16xbf16> to vector<64x16xbf16>
    %c0_6 = arith.constant 0 : index
    %c0_7 = arith.constant 0 : index
    %c0_8 = arith.constant 0 : index
    %7 = vector.load %arg5[%c0_6, %c0_7, %c0_8] : memref<1x64x16xbf16, #tpu.memory_space<vmem>>, vector<1x64x16xbf16>
    %8 = vector.shape_cast %7 : vector<1x64x16xbf16> to vector<64x16xbf16>
    %9 = vector.extract_strided_slice %4 {offsets = [0, 0], sizes = [64, 4], strides = [1, 1]} : vector<64x16xbf16> to vector<64x4xbf16>
    %10 = vector.extract_strided_slice %6 {offsets = [0, 0], sizes = [64, 4], strides = [1, 1]} : vector<64x16xbf16> to vector<64x4xbf16>
    %11 = vector.extract_strided_slice %8 {offsets = [0, 0], sizes = [64, 4], strides = [1, 1]} : vector<64x16xbf16> to vector<64x4xbf16>
    %cst = arith.constant dense<0.000000e+00> : vector<64x64xf32>
    %12 = tpu.matmul %9, %10, %cst {dimension_numbers = #tpu.dot_dimension_numbers<[1], [1], [0], [0], [0, 0, 1, 0], [], []>} : vector<64x4xbf16>, vector<64x4xbf16>, vector<64x64xf32> -> vector<64x64xf32>
    %c0_9 = arith.constant 0 : index
    %c0_10 = arith.constant 0 : index
    %c0_11 = arith.constant 0 : index
    %13 = vector.load %arg7[%c0_9, %c0_10, %c0_11] : memref<4x64x1xf32, #tpu.memory_space<vmem>>, vector<1x64x1xf32>
    %14 = vector.shape_cast %13 : vector<1x64x1xf32> to vector<64x1xf32>
    %cst_12 = arith.constant dense<0xFF800000> : vector<64xf32>
    %15 = vector.multi_reduction <maximumf>, %12, %cst_12 [1] : vector<64x64xf32> to vector<64xf32>
    %16 = vector.shape_cast %15 : vector<64xf32> to vector<64x1xf32>
    %17 = arith.maximumf %14, %16 : vector<64x1xf32>
    %18 = arith.subf %14, %17 : vector<64x1xf32>
    %19 = math.exp %18 : vector<64x1xf32>
    %20 = vector.broadcast %17 : vector<64x1xf32> to vector<64x64xf32>
    %21 = arith.subf %12, %20 : vector<64x64xf32>
    %22 = math.exp %21 : vector<64x64xf32>
    %cst_13 = arith.constant dense<0.000000e+00> : vector<64xf32>
    %23 = vector.multi_reduction <add>, %22, %cst_13 [1] : vector<64x64xf32> to vector<64xf32>
    %24 = vector.shape_cast %23 : vector<64xf32> to vector<64x1xf32>
    %25 = arith.truncf %22 : vector<64x64xf32> to vector<64x64xbf16>
    %cst_14 = arith.constant dense<0.000000e+00> : vector<64x4xf32>
    %26 = tpu.matmul %25, %11, %cst_14 {dimension_numbers = #tpu.dot_dimension_numbers<[1], [0], [0], [1], [0, 0, 1, 1], [], []>} : vector<64x64xbf16>, vector<64x4xbf16>, vector<64x4xf32> -> vector<64x4xf32>
    %c0_15 = arith.constant 0 : index
    %c0_16 = arith.constant 0 : index
    %27 = vector.load %arg8[%c0_15, %c0_16] : memref<64x16xf32, #tpu.memory_space<vmem>>, vector<64x4xf32>
    %28 = vector.broadcast %19 : vector<64x1xf32> to vector<64x4xf32>
    %29 = arith.mulf %28, %27 : vector<64x4xf32>
    %30 = vector.broadcast %24 : vector<64x1xf32> to vector<64x4xf32>
    %31 = arith.addf %29, %30 : vector<64x4xf32>
    %c0_17 = arith.constant 0 : index
    %c0_18 = arith.constant 0 : index
    %32 = vector.load %arg8[%c0_17, %c0_18] : memref<64x16xf32, #tpu.memory_space<vmem>>, vector<64x4xf32>
    tpu.vector_store %arg8[%c0_17, %c0_18], %31 {strides = array<i32>} : memref<64x16xf32, #tpu.memory_space<vmem>>, vector<64x4xf32>,
    %c0_19 = arith.constant 0 : index
    %c0_20 = arith.constant 0 : index
    %33 = vector.load %arg9[%c0_19, %c0_20] : memref<64x16xf32, #tpu.memory_space<vmem>>, vector<64x4xf32>
    %34 = vector.broadcast %19 : vector<64x1xf32> to vector<64x4xf32>
    %35 = arith.mulf %34, %33 : vector<64x4xf32>
    %36 = arith.addf %35, %26 : vector<64x4xf32>
    %c0_21 = arith.constant 0 : index
    %c0_22 = arith.constant 0 : index
    %37 = vector.load %arg9[%c0_21, %c0_22] : memref<64x16xf32, #tpu.memory_space<vmem>>, vector<64x4xf32>
    tpu.vector_store %arg9[%c0_21, %c0_22], %36 {strides = array<i32>} : memref<64x16xf32, #tpu.memory_space<vmem>>, vector<64x4xf32>,
    %c0_23 = arith.constant 0 : index
    %c0_24 = arith.constant 0 : index
    %c0_25 = arith.constant 0 : index
    %38 = vector.load %arg7[%c0_23, %c0_24, %c0_25] : memref<4x64x1xf32, #tpu.memory_space<vmem>>, vector<1x64x1xf32>
    %39 = vector.shape_cast %38 : vector<1x64x1xf32> to vector<64x1xf32>
    %40 = vector.shape_cast %17 : vector<64x1xf32> to vector<1x64x1xf32>
    tpu.vector_store %arg7[%c0_23, %c0_24, %c0_25], %40 {strides = array<i32>} : memref<4x64x1xf32, #tpu.memory_space<vmem>>, vector<1x64x1xf32>,
    %41 = vector.extract_strided_slice %4 {offsets = [0, 4], sizes = [64, 4], strides = [1, 1]} : vector<64x16xbf16> to vector<64x4xbf16>
    %42 = vector.extract_strided_slice %6 {offsets = [0, 4], sizes = [64, 4], strides = [1, 1]} : vector<64x16xbf16> to vector<64x4xbf16>
    %43 = vector.extract_strided_slice %8 {offsets = [0, 4], sizes = [64, 4], strides = [1, 1]} : vector<64x16xbf16> to vector<64x4xbf16>
    %cst_26 = arith.constant dense<0.000000e+00> : vector<64x64xf32>
    %44 = tpu.matmul %41, %42, %cst_26 {dimension_numbers = #tpu.dot_dimension_numbers<[1], [1], [0], [0], [0, 0, 1, 0], [], []>} : vector<64x4xbf16>, vector<64x4xbf16>, vector<64x64xf32> -> vector<64x64xf32>
    %c1 = arith.constant 1 : index
    %c0_27 = arith.constant 0 : index
    %c0_28 = arith.constant 0 : index
    %45 = vector.load %arg7[%c1, %c0_27, %c0_28] : memref<4x64x1xf32, #tpu.memory_space<vmem>>, vector<1x64x1xf32>
    %46 = vector.shape_cast %45 : vector<1x64x1xf32> to vector<64x1xf32>
    %cst_29 = arith.constant dense<0xFF800000> : vector<64xf32>
    %47 = vector.multi_reduction <maximumf>, %44, %cst_29 [1] : vector<64x64xf32> to vector<64xf32>
    %48 = vector.shape_cast %47 : vector<64xf32> to vector<64x1xf32>
    %49 = arith.maximumf %46, %48 : vector<64x1xf32>
    %50 = arith.subf %46, %49 : vector<64x1xf32>
    %51 = math.exp %50 : vector<64x1xf32>
    %52 = vector.broadcast %49 : vector<64x1xf32> to vector<64x64xf32>
    %53 = arith.subf %44, %52 : vector<64x64xf32>
    %54 = math.exp %53 : vector<64x64xf32>
    %cst_30 = arith.constant dense<0.000000e+00> : vector<64xf32>
    %55 = vector.multi_reduction <add>, %54, %cst_30 [1] : vector<64x64xf32> to vector<64xf32>
    %56 = vector.shape_cast %55 : vector<64xf32> to vector<64x1xf32>
    %57 = arith.truncf %54 : vector<64x64xf32> to vector<64x64xbf16>
    %cst_31 = arith.constant dense<0.000000e+00> : vector<64x4xf32>
    %58 = tpu.matmul %57, %43, %cst_31 {dimension_numbers = #tpu.dot_dimension_numbers<[1], [0], [0], [1], [0, 0, 1, 1], [], []>} : vector<64x64xbf16>, vector<64x4xbf16>, vector<64x4xf32> -> vector<64x4xf32>
    %c0_32 = arith.constant 0 : index
    %c4 = arith.constant 4 : index
    %59 = vector.load %arg8[%c0_32, %c4] : memref<64x16xf32, #tpu.memory_space<vmem>>, vector<64x4xf32>
    %60 = vector.broadcast %51 : vector<64x1xf32> to vector<64x4xf32>
    %61 = arith.mulf %60, %59 : vector<64x4xf32>
    %62 = vector.broadcast %56 : vector<64x1xf32> to vector<64x4xf32>
    %63 = arith.addf %61, %62 : vector<64x4xf32>
    %c0_33 = arith.constant 0 : index
    %c4_34 = arith.constant 4 : index
    %64 = vector.load %arg8[%c0_33, %c4_34] : memref<64x16xf32, #tpu.memory_space<vmem>>, vector<64x4xf32>
    tpu.vector_store %arg8[%c0_33, %c4_34], %63 {strides = array<i32>} : memref<64x16xf32, #tpu.memory_space<vmem>>, vector<64x4xf32>,
    %c0_35 = arith.constant 0 : index
    %c4_36 = arith.constant 4 : index
    %65 = vector.load %arg9[%c0_35, %c4_36] : memref<64x16xf32, #tpu.memory_space<vmem>>, vector<64x4xf32>
    %66 = vector.broadcast %51 : vector<64x1xf32> to vector<64x4xf32>
    %67 = arith.mulf %66, %65 : vector<64x4xf32>
    %68 = arith.addf %67, %58 : vector<64x4xf32>
    %c0_37 = arith.constant 0 : index
    %c4_38 = arith.constant 4 : index
    %69 = vector.load %arg9[%c0_37, %c4_38] : memref<64x16xf32, #tpu.memory_space<vmem>>, vector<64x4xf32>
    tpu.vector_store %arg9[%c0_37, %c4_38], %68 {strides = array<i32>} : memref<64x16xf32, #tpu.memory_space<vmem>>, vector<64x4xf32>,
    %c1_39 = arith.constant 1 : index
    %c0_40 = arith.constant 0 : index
    %c0_41 = arith.constant 0 : index
    %70 = vector.load %arg7[%c1_39, %c0_40, %c0_41] : memref<4x64x1xf32, #tpu.memory_space<vmem>>, vector<1x64x1xf32>
    %71 = vector.shape_cast %70 : vector<1x64x1xf32> to vector<64x1xf32>
    %72 = vector.shape_cast %49 : vector<64x1xf32> to vector<1x64x1xf32>
    tpu.vector_store %arg7[%c1_39, %c0_40, %c0_41], %72 {strides = array<i32>} : memref<4x64x1xf32, #tpu.memory_space<vmem>>, vector<1x64x1xf32>,
    %73 = vector.extract_strided_slice %4 {offsets = [0, 8], sizes = [64, 4], strides = [1, 1]} : vector<64x16xbf16> to vector<64x4xbf16>
    %74 = vector.extract_strided_slice %6 {offsets = [0, 8], sizes = [64, 4], strides = [1, 1]} : vector<64x16xbf16> to vector<64x4xbf16>
    %75 = vector.extract_strided_slice %8 {offsets = [0, 8], sizes = [64, 4], strides = [1, 1]} : vector<64x16xbf16> to vector<64x4xbf16>
    %cst_42 = arith.constant dense<0.000000e+00> : vector<64x64xf32>
    %76 = tpu.matmul %73, %74, %cst_42 {dimension_numbers = #tpu.dot_dimension_numbers<[1], [1], [0], [0], [0, 0, 1, 0], [], []>} : vector<64x4xbf16>, vector<64x4xbf16>, vector<64x64xf32> -> vector<64x64xf32>
    %c2 = arith.constant 2 : index
    %c0_43 = arith.constant 0 : index
    %c0_44 = arith.constant 0 : index
    %77 = vector.load %arg7[%c2, %c0_43, %c0_44] : memref<4x64x1xf32, #tpu.memory_space<vmem>>, vector<1x64x1xf32>
    %78 = vector.shape_cast %77 : vector<1x64x1xf32> to vector<64x1xf32>
    %cst_45 = arith.constant dense<0xFF800000> : vector<64xf32>
    %79 = vector.multi_reduction <maximumf>, %76, %cst_45 [1] : vector<64x64xf32> to vector<64xf32>
    %80 = vector.shape_cast %79 : vector<64xf32> to vector<64x1xf32>
    %81 = arith.maximumf %78, %80 : vector<64x1xf32>
    %82 = arith.subf %78, %81 : vector<64x1xf32>
    %83 = math.exp %82 : vector<64x1xf32>
    %84 = vector.broadcast %81 : vector<64x1xf32> to vector<64x64xf32>
    %85 = arith.subf %76, %84 : vector<64x64xf32>
    %86 = math.exp %85 : vector<64x64xf32>
    %cst_46 = arith.constant dense<0.000000e+00> : vector<64xf32>
    %87 = vector.multi_reduction <add>, %86, %cst_46 [1] : vector<64x64xf32> to vector<64xf32>
    %88 = vector.shape_cast %87 : vector<64xf32> to vector<64x1xf32>
    %89 = arith.truncf %86 : vector<64x64xf32> to vector<64x64xbf16>
    %cst_47 = arith.constant dense<0.000000e+00> : vector<64x4xf32>
    %90 = tpu.matmul %89, %75, %cst_47 {dimension_numbers = #tpu.dot_dimension_numbers<[1], [0], [0], [1], [0, 0, 1, 1], [], []>} : vector<64x64xbf16>, vector<64x4xbf16>, vector<64x4xf32> -> vector<64x4xf32>
    %c0_48 = arith.constant 0 : index
    %c8 = arith.constant 8 : index
    %91 = vector.load %arg8[%c0_48, %c8] : memref<64x16xf32, #tpu.memory_space<vmem>>, vector<64x4xf32>
    %92 = vector.broadcast %83 : vector<64x1xf32> to vector<64x4xf32>
    %93 = arith.mulf %92, %91 : vector<64x4xf32>
    %94 = vector.broadcast %88 : vector<64x1xf32> to vector<64x4xf32>
    %95 = arith.addf %93, %94 : vector<64x4xf32>
    %c0_49 = arith.constant 0 : index
    %c8_50 = arith.constant 8 : index
    %96 = vector.load %arg8[%c0_49, %c8_50] : memref<64x16xf32, #tpu.memory_space<vmem>>, vector<64x4xf32>
    tpu.vector_store %arg8[%c0_49, %c8_50], %95 {strides = array<i32>} : memref<64x16xf32, #tpu.memory_space<vmem>>, vector<64x4xf32>,
    %c0_51 = arith.constant 0 : index
    %c8_52 = arith.constant 8 : index
    %97 = vector.load %arg9[%c0_51, %c8_52] : memref<64x16xf32, #tpu.memory_space<vmem>>, vector<64x4xf32>
    %98 = vector.broadcast %83 : vector<64x1xf32> to vector<64x4xf32>
    %99 = arith.mulf %98, %97 : vector<64x4xf32>
    %100 = arith.addf %99, %90 : vector<64x4xf32>
    %c0_53 = arith.constant 0 : index
    %c8_54 = arith.constant 8 : index
    %101 = vector.load %arg9[%c0_53, %c8_54] : memref<64x16xf32, #tpu.memory_space<vmem>>, vector<64x4xf32>
    tpu.vector_store %arg9[%c0_53, %c8_54], %100 {strides = array<i32>} : memref<64x16xf32, #tpu.memory_space<vmem>>, vector<64x4xf32>,
    %c2_55 = arith.constant 2 : index
    %c0_56 = arith.constant 0 : index
    %c0_57 = arith.constant 0 : index
    %102 = vector.load %arg7[%c2_55, %c0_56, %c0_57] : memref<4x64x1xf32, #tpu.memory_space<vmem>>, vector<1x64x1xf32>
    %103 = vector.shape_cast %102 : vector<1x64x1xf32> to vector<64x1xf32>
    %104 = vector.shape_cast %81 : vector<64x1xf32> to vector<1x64x1xf32>
    tpu.vector_store %arg7[%c2_55, %c0_56, %c0_57], %104 {strides = array<i32>} : memref<4x64x1xf32, #tpu.memory_space<vmem>>, vector<1x64x1xf32>,
    %105 = vector.extract_strided_slice %4 {offsets = [0, 12], sizes = [64, 4], strides = [1, 1]} : vector<64x16xbf16> to vector<64x4xbf16>
    %106 = vector.extract_strided_slice %6 {offsets = [0, 12], sizes = [64, 4], strides = [1, 1]} : vector<64x16xbf16> to vector<64x4xbf16>
    %107 = vector.extract_strided_slice %8 {offsets = [0, 12], sizes = [64, 4], strides = [1, 1]} : vector<64x16xbf16> to vector<64x4xbf16>
    %cst_58 = arith.constant dense<0.000000e+00> : vector<64x64xf32>
    %108 = tpu.matmul %105, %106, %cst_58 {dimension_numbers = #tpu.dot_dimension_numbers<[1], [1], [0], [0], [0, 0, 1, 0], [], []>} : vector<64x4xbf16>, vector<64x4xbf16>, vector<64x64xf32> -> vector<64x64xf32>
    %c3 = arith.constant 3 : index
    %c0_59 = arith.constant 0 : index
    %c0_60 = arith.constant 0 : index
    %109 = vector.load %arg7[%c3, %c0_59, %c0_60] : memref<4x64x1xf32, #tpu.memory_space<vmem>>, vector<1x64x1xf32>
    %110 = vector.shape_cast %109 : vector<1x64x1xf32> to vector<64x1xf32>
    %cst_61 = arith.constant dense<0xFF800000> : vector<64xf32>
    %111 = vector.multi_reduction <maximumf>, %108, %cst_61 [1] : vector<64x64xf32> to vector<64xf32>
    %112 = vector.shape_cast %111 : vector<64xf32> to vector<64x1xf32>
    %113 = arith.maximumf %110, %112 : vector<64x1xf32>
    %114 = arith.subf %110, %113 : vector<64x1xf32>
    %115 = math.exp %114 : vector<64x1xf32>
    %116 = vector.broadcast %113 : vector<64x1xf32> to vector<64x64xf32>
    %117 = arith.subf %108, %116 : vector<64x64xf32>
    %118 = math.exp %117 : vector<64x64xf32>
    %cst_62 = arith.constant dense<0.000000e+00> : vector<64xf32>
    %119 = vector.multi_reduction <add>, %118, %cst_62 [1] : vector<64x64xf32> to vector<64xf32>
    %120 = vector.shape_cast %119 : vector<64xf32> to vector<64x1xf32>
    %121 = arith.truncf %118 : vector<64x64xf32> to vector<64x64xbf16>
    %cst_63 = arith.constant dense<0.000000e+00> : vector<64x4xf32>
    %122 = tpu.matmul %121, %107, %cst_63 {dimension_numbers = #tpu.dot_dimension_numbers<[1], [0], [0], [1], [0, 0, 1, 1], [], []>} : vector<64x64xbf16>, vector<64x4xbf16>, vector<64x4xf32> -> vector<64x4xf32>
    %c0_64 = arith.constant 0 : index
    %c12 = arith.constant 12 : index
    %123 = vector.load %arg8[%c0_64, %c12] : memref<64x16xf32, #tpu.memory_space<vmem>>, vector<64x4xf32>
    %124 = vector.broadcast %115 : vector<64x1xf32> to vector<64x4xf32>
    %125 = arith.mulf %124, %123 : vector<64x4xf32>
    %126 = vector.broadcast %120 : vector<64x1xf32> to vector<64x4xf32>
    %127 = arith.addf %125, %126 : vector<64x4xf32>
    %c0_65 = arith.constant 0 : index
    %c12_66 = arith.constant 12 : index
    %128 = vector.load %arg8[%c0_65, %c12_66] : memref<64x16xf32, #tpu.memory_space<vmem>>, vector<64x4xf32>
    tpu.vector_store %arg8[%c0_65, %c12_66], %127 {strides = array<i32>} : memref<64x16xf32, #tpu.memory_space<vmem>>, vector<64x4xf32>,
    %c0_67 = arith.constant 0 : index
    %c12_68 = arith.constant 12 : index
    %129 = vector.load %arg9[%c0_67, %c12_68] : memref<64x16xf32, #tpu.memory_space<vmem>>, vector<64x4xf32>
    %130 = vector.broadcast %115 : vector<64x1xf32> to vector<64x4xf32>
    %131 = arith.mulf %130, %129 : vector<64x4xf32>
    %132 = arith.addf %131, %122 : vector<64x4xf32>
    %c0_69 = arith.constant 0 : index
    %c12_70 = arith.constant 12 : index
    %133 = vector.load %arg9[%c0_69, %c12_70] : memref<64x16xf32, #tpu.memory_space<vmem>>, vector<64x4xf32>
    tpu.vector_store %arg9[%c0_69, %c12_70], %132 {strides = array<i32>} : memref<64x16xf32, #tpu.memory_space<vmem>>, vector<64x4xf32>,
    %c3_71 = arith.constant 3 : index
    %c0_72 = arith.constant 0 : index
    %c0_73 = arith.constant 0 : index
    %134 = vector.load %arg7[%c3_71, %c0_72, %c0_73] : memref<4x64x1xf32, #tpu.memory_space<vmem>>, vector<1x64x1xf32>
    %135 = vector.shape_cast %134 : vector<1x64x1xf32> to vector<64x1xf32>
    %136 = vector.shape_cast %113 : vector<64x1xf32> to vector<1x64x1xf32>
    tpu.vector_store %arg7[%c3_71, %c0_72, %c0_73], %136 {strides = array<i32>} : memref<4x64x1xf32, #tpu.memory_space<vmem>>, vector<1x64x1xf32>,
    %c0_i32_74 = arith.constant 0 : i32
    %137 = arith.cmpi eq, %arg2, %c0_i32_74 : i32
    %138 = arith.extui %137 : i1 to i32
    %c0_i32_75 = arith.constant 0 : i32
    %139 = arith.cmpi ne, %138, %c0_i32_75 : i32
    scf.if %139 {
      %c0_76 = arith.constant 0 : index
      %c0_77 = arith.constant 0 : index
      %140 = vector.load %arg8[%c0_76, %c0_77] : memref<64x16xf32, #tpu.memory_space<vmem>>, vector<64x16xf32>
      %cst_78 = arith.constant 1.000000e-30 : f32
      %141 = vector.broadcast %cst_78 : f32 to vector<64x16xf32>
      %142 = arith.maximumf %140, %141 : vector<64x16xf32>
      %143 = tpu.reciprocal %142 {approx = true} : vector<64x16xf32> -> vector<64x16xf32>
      %c0_79 = arith.constant 0 : index
      %c0_80 = arith.constant 0 : index
      %144 = vector.load %arg9[%c0_79, %c0_80] : memref<64x16xf32, #tpu.memory_space<vmem>>, vector<64x16xf32>
      %145 = arith.mulf %144, %143 : vector<64x16xf32>
      %146 = arith.truncf %145 : vector<64x16xf32> to vector<64x16xbf16>
      %c0_81 = arith.constant 0 : index
      %c0_82 = arith.constant 0 : index
      %c0_83 = arith.constant 0 : index
      %147 = vector.load %arg6[%c0_81, %c0_82, %c0_83] : memref<1x64x16xbf16, #tpu.memory_space<vmem>>, vector<1x64x16xbf16>
      %148 = vector.shape_cast %147 : vector<1x64x16xbf16> to vector<64x16xbf16>
      %149 = vector.shape_cast %146 : vector<64x16xbf16> to vector<1x64x16xbf16>
      tpu.vector_store %arg6[%c0_81, %c0_82, %c0_83], %149 {strides = array<i32>} : memref<1x64x16xbf16, #tpu.memory_space<vmem>>, vector<1x64x16xbf16>,
    } else {
    }
    return
  }
  func.func @transform_0(%arg0: i32, %arg1: i32, %arg2: i32) -> (i32, i32, i32) {
    %c0_i32 = arith.constant 0 : i32
    %c0_i32_0 = arith.constant 0 : i32
    return %arg0, %arg1, %c0_i32 : i32, i32, i32
  }
  func.func @transform_1(%arg0: i32, %arg1: i32, %arg2: i32) -> (i32, i32, i32) {
    %c0_i32 = arith.constant 0 : i32
    %c0_i32_0 = arith.constant 0 : i32
    return %arg0, %arg2, %c0_i32 : i32, i32, i32
  }
  func.func @transform_2(%arg0: i32, %arg1: i32, %arg2: i32) -> (i32, i32, i32) {
    %c0_i32 = arith.constant 0 : i32
    %c0_i32_0 = arith.constant 0 : i32
    return %arg0, %arg2, %c0_i32 : i32, i32, i32
  }
  func.func @transform_3(%arg0: i32, %arg1: i32, %arg2: i32) -> (i32, i32, i32) {
    %c0_i32 = arith.constant 0 : i32
    %c0_i32_0 = arith.constant 0 : i32
    return %arg0, %arg1, %c0_i32 : i32, i32, i32
  }
}

module attributes {stable_mosaic.version = 11 : i64} {
  func.func @_conv3x3_kernel(%arg0: i32, %arg1: i32, %arg2: memref<1x72x16xbf16, #tpu.memory_space<vmem>>, %arg3: memref<9x16x16xbf16, #tpu.memory_space<vmem>>, %arg4: memref<1x16xf32, #tpu.memory_space<vmem>>, %arg5: memref<1x48x16xf32, #tpu.memory_space<vmem>>) attributes {dimension_semantics = [#tpu.dimension_semantics<parallel>, #tpu.dimension_semantics<parallel>], iteration_bounds = array<i64: 2, 1>, scalar_prefetch = 0 : i64, scratch_operands = 0 : i64, tpu.core_type = #tpu.core_type<tc>, window_params = [{transform_indices = @transform_0, window_bounds = array<i64: 1, 72, 16>}, {transform_indices = @transform_1, window_bounds = array<i64: 9, 16, 16>}, {transform_indices = @transform_2, window_bounds = array<i64: 1, 16>}, {transform_indices = @transform_3, window_bounds = array<i64: 1, 48, 16>}]} {
    %c0 = arith.constant 0 : index
    %c0_0 = arith.constant 0 : index
    %c0_1 = arith.constant 0 : index
    %0 = vector.load %arg2[%c0, %c0_0, %c0_1] : memref<1x72x16xbf16, #tpu.memory_space<vmem>>, vector<1x48x16xbf16>
    %1 = vector.shape_cast %0 : vector<1x48x16xbf16> to vector<48x16xbf16>
    %c0_2 = arith.constant 0 : index
    %c0_3 = arith.constant 0 : index
    %c0_4 = arith.constant 0 : index
    %2 = vector.load %arg3[%c0_2, %c0_3, %c0_4] : memref<9x16x16xbf16, #tpu.memory_space<vmem>>, vector<1x16x16xbf16>
    %3 = vector.shape_cast %2 : vector<1x16x16xbf16> to vector<16x16xbf16>
    %cst = arith.constant dense<0.000000e+00> : vector<48x16xf32>
    %4 = tpu.matmul %1, %3, %cst {dimension_numbers = #tpu.dot_dimension_numbers<[1], [0], [0], [1], [0, 0, 1, 1], [], []>} : vector<48x16xbf16>, vector<16x16xbf16>, vector<48x16xf32> -> vector<48x16xf32>
    %c0_5 = arith.constant 0 : index
    %c1 = arith.constant 1 : index
    %c0_6 = arith.constant 0 : index
    %5 = vector.load %arg2[%c0_5, %c1, %c0_6] : memref<1x72x16xbf16, #tpu.memory_space<vmem>>, vector<1x48x16xbf16>
    %6 = vector.shape_cast %5 : vector<1x48x16xbf16> to vector<48x16xbf16>
    %c1_7 = arith.constant 1 : index
    %c0_8 = arith.constant 0 : index
    %c0_9 = arith.constant 0 : index
    %7 = vector.load %arg3[%c1_7, %c0_8, %c0_9] : memref<9x16x16xbf16, #tpu.memory_space<vmem>>, vector<1x16x16xbf16>
    %8 = vector.shape_cast %7 : vector<1x16x16xbf16> to vector<16x16xbf16>
    %cst_10 = arith.constant dense<0.000000e+00> : vector<48x16xf32>
    %9 = tpu.matmul %6, %8, %cst_10 {dimension_numbers = #tpu.dot_dimension_numbers<[1], [0], [0], [1], [0, 0, 1, 1], [], []>} : vector<48x16xbf16>, vector<16x16xbf16>, vector<48x16xf32> -> vector<48x16xf32>
    %10 = arith.addf %4, %9 : vector<48x16xf32>
    %c0_11 = arith.constant 0 : index
    %c2 = arith.constant 2 : index
    %c0_12 = arith.constant 0 : index
    %11 = vector.load %arg2[%c0_11, %c2, %c0_12] : memref<1x72x16xbf16, #tpu.memory_space<vmem>>, vector<1x48x16xbf16>
    %12 = vector.shape_cast %11 : vector<1x48x16xbf16> to vector<48x16xbf16>
    %c2_13 = arith.constant 2 : index
    %c0_14 = arith.constant 0 : index
    %c0_15 = arith.constant 0 : index
    %13 = vector.load %arg3[%c2_13, %c0_14, %c0_15] : memref<9x16x16xbf16, #tpu.memory_space<vmem>>, vector<1x16x16xbf16>
    %14 = vector.shape_cast %13 : vector<1x16x16xbf16> to vector<16x16xbf16>
    %cst_16 = arith.constant dense<0.000000e+00> : vector<48x16xf32>
    %15 = tpu.matmul %12, %14, %cst_16 {dimension_numbers = #tpu.dot_dimension_numbers<[1], [0], [0], [1], [0, 0, 1, 1], [], []>} : vector<48x16xbf16>, vector<16x16xbf16>, vector<48x16xf32> -> vector<48x16xf32>
    %16 = arith.addf %10, %15 : vector<48x16xf32>
    %c0_17 = arith.constant 0 : index
    %c8 = arith.constant 8 : index
    %c0_18 = arith.constant 0 : index
    %17 = vector.load %arg2[%c0_17, %c8, %c0_18] : memref<1x72x16xbf16, #tpu.memory_space<vmem>>, vector<1x48x16xbf16>
    %18 = vector.shape_cast %17 : vector<1x48x16xbf16> to vector<48x16xbf16>
    %c3 = arith.constant 3 : index
    %c0_19 = arith.constant 0 : index
    %c0_20 = arith.constant 0 : index
    %19 = vector.load %arg3[%c3, %c0_19, %c0_20] : memref<9x16x16xbf16, #tpu.memory_space<vmem>>, vector<1x16x16xbf16>
    %20 = vector.shape_cast %19 : vector<1x16x16xbf16> to vector<16x16xbf16>
    %cst_21 = arith.constant dense<0.000000e+00> : vector<48x16xf32>
    %21 = tpu.matmul %18, %20, %cst_21 {dimension_numbers = #tpu.dot_dimension_numbers<[1], [0], [0], [1], [0, 0, 1, 1], [], []>} : vector<48x16xbf16>, vector<16x16xbf16>, vector<48x16xf32> -> vector<48x16xf32>
    %22 = arith.addf %16, %21 : vector<48x16xf32>
    %c0_22 = arith.constant 0 : index
    %c9 = arith.constant 9 : index
    %c0_23 = arith.constant 0 : index
    %23 = vector.load %arg2[%c0_22, %c9, %c0_23] : memref<1x72x16xbf16, #tpu.memory_space<vmem>>, vector<1x48x16xbf16>
    %24 = vector.shape_cast %23 : vector<1x48x16xbf16> to vector<48x16xbf16>
    %c4 = arith.constant 4 : index
    %c0_24 = arith.constant 0 : index
    %c0_25 = arith.constant 0 : index
    %25 = vector.load %arg3[%c4, %c0_24, %c0_25] : memref<9x16x16xbf16, #tpu.memory_space<vmem>>, vector<1x16x16xbf16>
    %26 = vector.shape_cast %25 : vector<1x16x16xbf16> to vector<16x16xbf16>
    %cst_26 = arith.constant dense<0.000000e+00> : vector<48x16xf32>
    %27 = tpu.matmul %24, %26, %cst_26 {dimension_numbers = #tpu.dot_dimension_numbers<[1], [0], [0], [1], [0, 0, 1, 1], [], []>} : vector<48x16xbf16>, vector<16x16xbf16>, vector<48x16xf32> -> vector<48x16xf32>
    %28 = arith.addf %22, %27 : vector<48x16xf32>
    %c0_27 = arith.constant 0 : index
    %c10 = arith.constant 10 : index
    %c0_28 = arith.constant 0 : index
    %29 = vector.load %arg2[%c0_27, %c10, %c0_28] : memref<1x72x16xbf16, #tpu.memory_space<vmem>>, vector<1x48x16xbf16>
    %30 = vector.shape_cast %29 : vector<1x48x16xbf16> to vector<48x16xbf16>
    %c5 = arith.constant 5 : index
    %c0_29 = arith.constant 0 : index
    %c0_30 = arith.constant 0 : index
    %31 = vector.load %arg3[%c5, %c0_29, %c0_30] : memref<9x16x16xbf16, #tpu.memory_space<vmem>>, vector<1x16x16xbf16>
    %32 = vector.shape_cast %31 : vector<1x16x16xbf16> to vector<16x16xbf16>
    %cst_31 = arith.constant dense<0.000000e+00> : vector<48x16xf32>
    %33 = tpu.matmul %30, %32, %cst_31 {dimension_numbers = #tpu.dot_dimension_numbers<[1], [0], [0], [1], [0, 0, 1, 1], [], []>} : vector<48x16xbf16>, vector<16x16xbf16>, vector<48x16xf32> -> vector<48x16xf32>
    %34 = arith.addf %28, %33 : vector<48x16xf32>
    %c0_32 = arith.constant 0 : index
    %c16 = arith.constant 16 : index
    %c0_33 = arith.constant 0 : index
    %35 = vector.load %arg2[%c0_32, %c16, %c0_33] : memref<1x72x16xbf16, #tpu.memory_space<vmem>>, vector<1x48x16xbf16>
    %36 = vector.shape_cast %35 : vector<1x48x16xbf16> to vector<48x16xbf16>
    %c6 = arith.constant 6 : index
    %c0_34 = arith.constant 0 : index
    %c0_35 = arith.constant 0 : index
    %37 = vector.load %arg3[%c6, %c0_34, %c0_35] : memref<9x16x16xbf16, #tpu.memory_space<vmem>>, vector<1x16x16xbf16>
    %38 = vector.shape_cast %37 : vector<1x16x16xbf16> to vector<16x16xbf16>
    %cst_36 = arith.constant dense<0.000000e+00> : vector<48x16xf32>
    %39 = tpu.matmul %36, %38, %cst_36 {dimension_numbers = #tpu.dot_dimension_numbers<[1], [0], [0], [1], [0, 0, 1, 1], [], []>} : vector<48x16xbf16>, vector<16x16xbf16>, vector<48x16xf32> -> vector<48x16xf32>
    %40 = arith.addf %34, %39 : vector<48x16xf32>
    %c0_37 = arith.constant 0 : index
    %c17 = arith.constant 17 : index
    %c0_38 = arith.constant 0 : index
    %41 = vector.load %arg2[%c0_37, %c17, %c0_38] : memref<1x72x16xbf16, #tpu.memory_space<vmem>>, vector<1x48x16xbf16>
    %42 = vector.shape_cast %41 : vector<1x48x16xbf16> to vector<48x16xbf16>
    %c7 = arith.constant 7 : index
    %c0_39 = arith.constant 0 : index
    %c0_40 = arith.constant 0 : index
    %43 = vector.load %arg3[%c7, %c0_39, %c0_40] : memref<9x16x16xbf16, #tpu.memory_space<vmem>>, vector<1x16x16xbf16>
    %44 = vector.shape_cast %43 : vector<1x16x16xbf16> to vector<16x16xbf16>
    %cst_41 = arith.constant dense<0.000000e+00> : vector<48x16xf32>
    %45 = tpu.matmul %42, %44, %cst_41 {dimension_numbers = #tpu.dot_dimension_numbers<[1], [0], [0], [1], [0, 0, 1, 1], [], []>} : vector<48x16xbf16>, vector<16x16xbf16>, vector<48x16xf32> -> vector<48x16xf32>
    %46 = arith.addf %40, %45 : vector<48x16xf32>
    %c0_42 = arith.constant 0 : index
    %c18 = arith.constant 18 : index
    %c0_43 = arith.constant 0 : index
    %47 = vector.load %arg2[%c0_42, %c18, %c0_43] : memref<1x72x16xbf16, #tpu.memory_space<vmem>>, vector<1x48x16xbf16>
    %48 = vector.shape_cast %47 : vector<1x48x16xbf16> to vector<48x16xbf16>
    %c8_44 = arith.constant 8 : index
    %c0_45 = arith.constant 0 : index
    %c0_46 = arith.constant 0 : index
    %49 = vector.load %arg3[%c8_44, %c0_45, %c0_46] : memref<9x16x16xbf16, #tpu.memory_space<vmem>>, vector<1x16x16xbf16>
    %50 = vector.shape_cast %49 : vector<1x16x16xbf16> to vector<16x16xbf16>
    %cst_47 = arith.constant dense<0.000000e+00> : vector<48x16xf32>
    %51 = tpu.matmul %48, %50, %cst_47 {dimension_numbers = #tpu.dot_dimension_numbers<[1], [0], [0], [1], [0, 0, 1, 1], [], []>} : vector<48x16xbf16>, vector<16x16xbf16>, vector<48x16xf32> -> vector<48x16xf32>
    %52 = arith.addf %46, %51 : vector<48x16xf32>
    %c0_48 = arith.constant 0 : index
    %c0_49 = arith.constant 0 : index
    %53 = vector.load %arg4[%c0_48, %c0_49] : memref<1x16xf32, #tpu.memory_space<vmem>>, vector<1x16xf32>
    %54 = vector.broadcast %53 : vector<1x16xf32> to vector<48x16xf32>
    %55 = arith.addf %52, %54 : vector<48x16xf32>
    %c0_50 = arith.constant 0 : index
    %c0_51 = arith.constant 0 : index
    %c0_52 = arith.constant 0 : index
    %56 = vector.load %arg5[%c0_50, %c0_51, %c0_52] : memref<1x48x16xf32, #tpu.memory_space<vmem>>, vector<1x48x16xf32>
    %57 = vector.shape_cast %56 : vector<1x48x16xf32> to vector<48x16xf32>
    %58 = vector.shape_cast %55 : vector<48x16xf32> to vector<1x48x16xf32>
    tpu.vector_store %arg5[%c0_50, %c0_51, %c0_52], %58 {strides = array<i32>} : memref<1x48x16xf32, #tpu.memory_space<vmem>>, vector<1x48x16xf32>,
    return
  }
  func.func @transform_0(%arg0: i32, %arg1: i32) -> (i32, i32, i32) {
    %c0_i32 = arith.constant 0 : i32
    %c0_i32_0 = arith.constant 0 : i32
    %c0_i32_1 = arith.constant 0 : i32
    return %arg0, %c0_i32, %c0_i32_0 : i32, i32, i32
  }
  func.func @transform_1(%arg0: i32, %arg1: i32) -> (i32, i32, i32) {
    %c0_i32 = arith.constant 0 : i32
    %c0_i32_0 = arith.constant 0 : i32
    %c0_i32_1 = arith.constant 0 : i32
    return %c0_i32, %c0_i32_0, %arg1 : i32, i32, i32
  }
  func.func @transform_2(%arg0: i32, %arg1: i32) -> (i32, i32) {
    %c0_i32 = arith.constant 0 : i32
    %c0_i32_0 = arith.constant 0 : i32
    return %c0_i32, %arg1 : i32, i32
  }
  func.func @transform_3(%arg0: i32, %arg1: i32) -> (i32, i32, i32) {
    %c0_i32 = arith.constant 0 : i32
    %c0_i32_0 = arith.constant 0 : i32
    return %arg0, %c0_i32, %arg1 : i32, i32, i32
  }
}

</mosaic_0001>

<bundles_post_ra>
// kernel: conv_mha_forward.3
= control target key start
LH: loop header
LB: loop body
LE: loop exit
PB: predicated region body
PF: predicated region fallthrough
CT: control target
= control target key end

     0   :  { %s2167_s12 = smov 0   ;;  %s2169_s13 = smov 0   ;;  %s2592_s0 = inlined_call_operand.vmem [shape: bf16[2,104,16], index: 0, kind: input, shape index: {}]   ;;  %s2593_s1 = inlined_call_operand.vmem [shape: bf16[9,16,48], index: 1, kind: input, shape index: {}]   ;;  %s2594_s2 = inlined_call_operand.vmem [shape: f32[1,48], index: 2, kind: input, shape index: {}]   ;;  %s2595_s3 = inlined_call_operand.vmem [shape: bf16[2,80,48], index: 3, kind: output, shape index: {}]  }
   0x1   :  { %s2171_s14 = smov 0  }
   0x2 LB: > { %s25_s15 = sadd.s32 1, %s2139_s13  ;;  %p1688_p0 = scmp.ge.s32.totalorder %s2143_s14, 1  ;;  %s2143_s14 = sphi %s2171_s14, %s13_s14   ;;  %s2139_s13 = sphi %s2169_s13, %s2597_s13   ;;  %s2135_s12 = sphi %s2167_s12, %s2596_s12  }
   0x3   : > { %p27_p1 = scmp.ge.s32.totalorder %s25_s15, 2  ;;  %p168_p2 = scmp.lt.s32.totalorder %s2143_s14, 3 }
   0x5   : > { %s2599_s15 = smov (%p27_p1, %s25_s15), 0  ;;  %p169_p3 = pnand %p1688_p0, %p168_p2 }
   0x6   : > { %v2089_v0 = vld [vmem:[%s2593_s1 + $0x8] sm:$0xff] (!%p169_p3)   ;;  %v2145_v1 = vmov (!%p169_p3), 0.0   ;;  %p202_p4 = scmp.lt.s32.totalorder (!%p169_p3), %s2135_s12, 1  ;;  %vm2146_vm0 = vmmov (!%p169_p3), 0   ;;  %vm267_vm1 = vsmask.f32 (!%p169_p3), 7424 }
   0x7   : > { %172 = sbr.rel (%p169_p3) target bundleno = 425 (0x1a9), region = 32  ;;  %1861 = vmatprep.subr.bf16.mxu0 (!%p169_p3), %v2145_v1  ;;  %2059 = vmatprep.subr.bf16.mxu1 (!%p169_p3), %v2145_v1  ;;  %vm318_vm2 = vcmask (!%p169_p3), 130048   ;;  %v2094_v20 = vld [vmem:[%s2593_s1 + $0x10] sm:$0xff] (!%p169_p3)   ;;  %v2095_v24 = vld [vmem:[%s2593_s1] sm:$0xff] (!%p169_p3)   ;;  %vm503_vm3 = vcmask (!%p169_p3), 1046528   ;;  %v2098_v46 = vld [vmem:[%s2593_s1 + $0x18] sm:$0xff] (!%p169_p3)  }
   0x8   : > { %1862 = vmatpush3.bf16.msra.mxu0 (!%p169_p3), %v2089_v0  ;;  %2060 = vmatpush3.bf16.msra.mxu1 (!%p169_p3), %v2089_v0  ;;  %v2100_v50 = vld [vmem:[%s2593_s1 + $0x20] sm:$0xff] (!%p169_p3)   ;;  %vm783_vm4 = vsmask.f32 (!%p169_p3), 6400  ;;  %vm948_vm5 = vcmask (!%p169_p3), 1045504   ;;  %vm1228_vm6 = vsmask.f32 (!%p169_p3), 5376 }
   0x9   : > { %1863 = vmatprep.mubr.msk.bf16.mxu0 (!%p169_p3), %vm2146_vm0, %v2145_v1  ;;  %1875 = vmatprep.mubr.msk.bf16.mxu1 (!%p169_p3), %vm2146_vm0, %v2145_v1  ;;  %vm1393_vm7 = vcmask (!%p169_p3), 1044480   ;;  %vm1566_vm8 = vcmask (!%p169_p3), 388096  }
   0xa   : > { %1905 = vmatprep.subr.bf16.mxu0 (!%p169_p3), %v2145_v1  ;;  %1883 = vmatprep.subr.bf16.mxu1 (!%p169_p3), %v2145_v1 }
   0xe   : > { %s2601_s12 = smov (!%p202_p4, %s2135_s12), 1 }
   0xf   : > { %s2061_s18 = smul.u32 52, %s2601_s12 }
  0x10   : > { %s2062_s11 = smul.u32 40, %s2601_s12 }
  0x11   : > { %s2202_s21 = scalar_lea.vmem %s2592_s0, %s2061_s18 }
  0x12   : > { %v223_v2 = vld [vmem:[%s2202_s21] sm:$0xf]  ;;  %v224_v3 = vld [vmem:[%s2202_s21 + $0x4] sm:$0xf]  ;;  %v2207_v5 = vld [vmem:[%s2202_s21 + $0x8] sm:$0xff]   ;;  %s2547_s12 = scalar_lea.vmem %s2595_s3, %s2062_s11 }
  0x13   : > { %v1693_v4 = vcombine.low %v223_v2, %v224_v3  ;;  %v276_v8 = vshll.u32 %v2207_v5, 16  ;;  %v2211_v9 = vld [vmem:[%s2202_s21 + $0x18] sm:$0xff]   ;;  %v2214_v10 = vld [vmem:[%s2202_s21 + $0x20] sm:$0xff]   ;;  %v2217_v11 = vld [vmem:[%s2202_s21 + $0x10] sm:$0xff]   ;;  %v280_v21 = vshrl.u32 %v2207_v5, 16  ;;  %v505_v48 = vrot.slane %v2207_v5, 1 }
  0x14   : > { %v292_v14 = vshll.u32 %v2211_v9, 16  ;;  %v296_v15 = vshrl.u32 %v2211_v9, 16  ;;  %v300_v16 = vshll.u32 %v2214_v10, 16  ;;  %v2223_v17 = vld [vmem:[%s2202_s21 + $0x28] ss:$0 sps:$4 sm:$0x11]  }
  0x15   : > { %v269_v6 = vshrl.u32 %v1693_v4, 16  ;;  %v271_v7 = vshll.u32 %v1693_v4, 16  ;;  %v278_v13 = vrot.slane %v276_v8, 1  ;;  %v284_v22 = vshll.u32 %v2217_v11, 16  ;;  %v2248_v36 = vld [vmem:[%s2202_s21 + $0x24] sm:$0xff]   ;;  %v2315_v60 = vld [vmem:[%s2202_s21 + $0xc] sm:$0xff]  }
  0x16   : > { %v294_v19 = vrot.slane %v292_v14, 1  ;;  %v302_v23 = vrot.slane %v300_v16, 1  ;;  %v304_v27 = vshrl.u32 %v2214_v10, 16  ;;  %v308_v28 = vshll.u32 %v2223_v17, 16  ;;  %v496_v40 = vld [vmem:[%s2202_s21] sm:$0xe] }
  0x17   : > { %v273_v12 = vrot.slane %v271_v7, 1  ;;  %v282_v30 = vor.u32 %v280_v21, %v278_v13  ;;  %v286_v31 = vrot.slane %v284_v22, 1  ;;  %v288_v35 = vshrl.u32 %v2217_v11, 16  ;;  %v2108_v37 = vld [vmem:[%s2202_s21 + $0x2c] ss:$0 sps:$4 sm:$0x11]  }
  0x18   : > { %v298_v26 = vor.u32 %v296_v15, %v294_v19  ;;  %v306_v32 = vor.u32 %v304_v27, %v302_v23  ;;  %v310_v33 = vrot.slane %v308_v28, 1  ;;  %v668_v41 = vrot.slane %v2248_v36, 1  ;;  %v619_v56 = vld [vmem:[%s2202_s21 + $0x4] sm:$0xe]  ;;  %v2310_v57 = vld [vmem:[%s2202_s21 + $0x8] sm:$0xf] }
  0x19   : > { %v274_v18 = vor.u32 %v273_v12, %v269_v6  ;;  %v287_v34 = vsel %vm267_vm1, %v282_v30, %v286_v31  ;;  %v290_v39 = vor.u32 %v288_v35, %v286_v31  ;;  %v670_v42 = vrot.slane %v2108_v37, 1  ;;  %v2103_v12 = vld [vmem:[%s2593_s1 + $0x28] sm:$0xff]  }
  0x1a   : > { %v303_v29 = vsel %vm267_vm1, %v298_v26, %v302_v23  ;;  %v311_v38 = vsel %vm267_vm1, %v306_v32, %v310_v33  ;;  %v1713_v45 = vcombine.low %v496_v40, %v224_v3  ;;  %v507_v51 = vrot.slane %v2217_v11, 1  ;;  %v2352_v23 = vld [vmem:[%s2202_s21 + $0x1c] sm:$0xff]  }
  0x1b   : > { %v279_v25 = vsel %vm267_vm1, %v274_v18, %v278_v13  ;;  %1876 = vmatmul.mubr.msk.bf16.vlgmr.msra.gmra.mrb[0].mxu1 %vm318_vm2, %v303_v29  ;;  %v2263_v43 = vsel %vm503_vm3, %v668_v41, %v670_v42  ;;  %v295_v44 = vsel %vm267_vm1, %v290_v39, %v294_v19  ;;  %v509_v53 = vrot.slane %v2211_v9, 1  ;;  %v2334_v13 = vld [vmem:[%s2202_s21 + $0x14] sm:$0xff]   ;;  %v2376_v39 = vld [vmem:[%s2202_s21 + $0x2c] ss:$0 sps:$4 sm:$0x33]  }
  0x1c   : > { %1864 = vmatmul.mubr.msk.bf16.vlgmr.msra.gmra.mrb[0].mxu0 %vm318_vm2, %v279_v25  ;;  %1884 = vmatpush3.bf16.msra.mxu1 %v2095_v24  ;;  %v504_v47 = vrot.slane %v1713_v45, 1  ;;  %v508_v52 = vsel %vm503_vm3, %v505_v48, %v507_v51  ;;  %v511_v55 = vrot.slane %v2214_v10, 1  ;;  %v1722_v59 = vcombine.low %v619_v56, %v2310_v57  ;;  %v2105_v19 = vld [vmem:[%s2593_s1 + $0x30] sm:$0xff]  }
  0x1d   : > { %1906 = vmatpush3.bf16.msra.mxu0 %v2094_v20  ;;  %1867 = vmatprep.mubr.msk.bf16.mxu0 %vm2146_vm0, %v2145_v1  ;;  %v510_v54 = vsel %vm503_vm3, %v507_v51, %v509_v53  ;;  %v513_v61 = vrot.slane %v2223_v17, 1  ;;  %v793_v0 = vshrl.u32 %v2315_v60, 16  ;;  %v796_v2 = vshll.u32 %v2315_v60, 16  ;;  %v1064_v51 = vld [vmem:[%s2202_s21 + $0x8] sm:$0xc] }
  0x1e   : > { %1949 = vmatprep.subr.bf16.mxu0 %v2145_v1  ;;  %1879 = vmatprep.mubr.msk.bf16.mxu1 %vm2146_vm0, %v2145_v1  ;;  %v506_v49 = vsel %vm503_vm3, %v504_v47, %v505_v48  ;;  %v512_v58 = vsel %vm503_vm3, %v509_v53, %v511_v55  ;;  %v785_v62 = vshrl.u32 %v1722_v59, 16  ;;  %v788_v63 = vshll.u32 %v1722_v59, 16 }
  0x1f   : > { %1927 = vmatprep.subr.bf16.mxu1 %v2145_v1  ;;  %v661_v3 = vrot.slane %v1722_v59, 1  ;;  %v795_v8 = vrot.slane %v793_v0, 1  ;;  %v802_v15 = vshrl.u32 %v2334_v13, 16  ;;  %v805_v16 = vshll.u32 %v2334_v13, 16  ;;  %v2426_v0 = vld [vmem:[%s2202_s21 + $0x18] sm:$0xff]  }
  0x20   : > { %v787_v6 = vrot.slane %v785_v62, 1  ;;  %v790_v7 = vrot.slane %v788_v63, 2  ;;  %v664_v17 = vrot.slane %v2334_v13, 1  ;;  %v811_v25 = vshrl.u32 %v2352_v23, 16  ;;  %v2114_v63 = vld [vmem:[%s2593_s1 + $0x40] sm:$0xff]  }
  0x21   : > { %v804_v20 = vrot.slane %v802_v15, 1  ;;  %v807_v21 = vrot.slane %v805_v16, 2  ;;  %v814_v26 = vshll.u32 %v2352_v23, 16  ;;  %v666_v27 = vrot.slane %v2352_v23, 1 }
  0x22   : > { %v813_v29 = vrot.slane %v811_v25, 1  ;;  %v820_v33 = vshrl.u32 %v2248_v36, 16  ;;  %v832_v45 = vshll.u32 %v2376_v39, 16 }
  0x23   : > { %1880 = vmatmul.mubr.msk.bf16.gmra.mrb[4].mxu1 %vm318_vm2, %v311_v38  ;;  %v808_v24 = vor.u32 %v807_v21, %v804_v20  ;;  %v816_v30 = vrot.slane %v814_v26, 2  ;;  %v667_v31 = vsel %vm503_vm3, %v664_v17, %v666_v27  ;;  %v669_v40 = vsel %vm503_vm3, %v666_v27, %v668_v41  ;;  %v1386_v26 = vld [vmem:[%s2202_s21 + $0x8] sm:$0x8] }
  0x24   : > { %1868 = vmatmul.mubr.msk.bf16.gmra.mrb[4].mxu0 %vm318_vm2, %v287_v34  ;;  %1885 = vmatprep.mubr.msk.bf16.mxu1 %vm2146_vm0, %v2145_v1  ;;  %v823_v34 = vshll.u32 %v2248_v36, 16  ;;  %v822_v37 = vrot.slane %v820_v33, 1  ;;  %v834_v48 = vrot.slane %v832_v45, 2 }
  0x25   : > { %1871 = vmatprep.mubr.msk.bf16.mxu0 %vm2146_vm0, %v2145_v1  ;;  %v817_v32 = vor.u32 %v816_v30, %v813_v29  ;;  %v1247_v29 = vshrl.u32 %v2426_v0, 16  ;;  %v1250_v30 = vshll.u32 %v2426_v0, 16 }
  0x26   : > { %v825_v38 = vrot.slane %v823_v34, 2 }
  0x27   : > { %v818_v35 = vsel %vm783_vm4, %v808_v24, %v817_v32  ;;  %v1249_v34 = vrot.slane %v1247_v29, 2 }
  0x28   : > { %v826_v42 = vor.u32 %v825_v38, %v822_v37 }
  0x2a   : > { %v827_v41 = vsel %vm783_vm4, %v817_v32, %v826_v42 }
  0x2b   : > { %1886 = vmatmul.mubr.msk.bf16.vlgmr.msra.gmra.mrb[8].mxu1 %vm318_vm2, %v1693_v4  ;;  %v662_v4 = vrot.slane %v2315_v60, 1 }
  0x2c   : > { %1872 = vmatmul.mubr.msk.bf16.gmra.mrb[8].mxu0 %vm318_vm2, %v295_v44  ;;  %1928 = vmatpush3.bf16.msra.mxu1 %v2098_v46  ;;  %v829_v44 = vshrl.u32 %v2376_v39, 16  ;;  %v941_v46 = vld [vmem:[%s2202_s21 + $0x4] sm:$0xc] }
  0x2d   : > { %1907 = vmatprep.mubr.msk.bf16.mxu0 %vm2146_vm0, %v2145_v1  ;;  %1889 = vmatprep.mubr.msk.bf16.mxu1 %vm2146_vm0, %v2145_v1  ;;  %v665_v22 = vsel %vm503_vm3, %v662_v4, %v664_v17 }
  0x2e   : > { %1971 = vmatprep.subr.bf16.mxu1 %v2145_v1  ;;  %v831_v47 = vrot.slane %v829_v44, 1 }
  0x33   : > { %1890 = vmatmul.mubr.msk.bf16.gmra.mrb[12].mxu1 %vm318_vm2, %v2207_v5  ;;  %v514_v5 = vsel %vm503_vm3, %v511_v55, %v513_v61  ;;  %v952_v61 = vrot.slane %v2334_v13, 2 }
  0x34   : > { %1908 = vmatmul.mubr.msk.bf16.vlgmr.msra.gmra.mrb[12].mxu0 %vm318_vm2, %v506_v49  ;;  %1893 = vmatprep.mubr.msk.bf16.mxu1 %vm2146_vm0, %v2145_v1  ;;  %v1745_v49 = vcombine.low %v941_v46, %v2310_v57  ;;  %v2407_v57 = vld [vmem:[%s2202_s21 + $0x10] sm:$0xff]  }
  0x35   : > { %1950 = vmatpush3.bf16.msra.mxu0 %v2100_v50  ;;  %1911 = vmatprep.mubr.msk.bf16.mxu0 %vm2146_vm0, %v2145_v1  ;;  %v835_v50 = vor.u32 %v834_v48, %v831_v47  ;;  %v1238_v16 = vshrl.u32 %v2407_v57, 16  ;;  %v1241_v17 = vshll.u32 %v2407_v57, 16  ;;  %v1395_v38 = vrot.slane %v2407_v57, 3 }
  0x36   : > { %1993 = vmatprep.subr.bf16.mxu0 %v2145_v1  ;;  %v949_v53 = vrot.slane %v1745_v49, 2  ;;  %v1397_v47 = vrot.slane %v2426_v0, 3 }
  0x37   : > { %v836_v55 = vsel %vm783_vm4, %v826_v42, %v835_v50 }
  0x3b   : > { %1894 = vmatmul.mubr.msk.bf16.gmra.mrb[16].mxu1 %vm318_vm2, %v2217_v11  ;;  %v663_v11 = vsel %vm503_vm3, %v661_v3, %v662_v4  ;;  %v1109_v3 = vrot.slane %v2426_v0, 2  ;;  %v954_v4 = vrot.slane %v2352_v23, 2  ;;  %v1240_v23 = vrot.slane %v1238_v16, 2 }
  0x3c   : > { %1912 = vmatmul.mubr.msk.bf16.gmra.mrb[16].mxu0 %vm318_vm2, %v508_v52  ;;  %1897 = vmatprep.mubr.msk.bf16.mxu1 %vm2146_vm0, %v2145_v1  ;;  %v2399_v52 = vld [vmem:[%s2202_s21 + $0xc] sm:$0xf] }
  0x3d   : > { %1915 = vmatprep.mubr.msk.bf16.mxu0 %vm2146_vm0, %v2145_v1  ;;  %v1754_v56 = vcombine.low %v1064_v51, %v2399_v52  ;;  %v1777_v32 = vcombine.low %v1386_v26, %v2399_v52  ;;  %v1398_v51 = vsel %vm1393_vm7, %v1395_v38, %v1397_v47 }
  0x3f   : > { %v1106_v59 = vrot.slane %v1754_v56, 2  ;;  %v1233_v15 = vshll.u32 %v1754_v56, 16  ;;  %v1394_v37 = vrot.slane %v1777_v32, 3 }
  0x41   : > { %v1396_v44 = vsel %vm1393_vm7, %v1394_v37, %v1395_v38 }
  0x43   : > { %1898 = vmatmul.mubr.msk.bf16.gmra.mrb[20].mxu1 %vm318_vm2, %v2211_v9  ;;  %v798_v9 = vrot.slane %v796_v2, 2 }
  0x44   : > { %1916 = vmatmul.mubr.msk.bf16.gmra.mrb[20].mxu0 %vm318_vm2, %v510_v54  ;;  %1901 = vmatprep.mubr.msk.bf16.mxu1 %vm2146_vm0, %v2145_v1  ;;  %v950_v54 = vrot.slane %v2315_v60, 2  ;;  %v1107_v60 = vrot.slane %v2407_v57, 2 }
  0x45   : > { %1919 = vmatprep.mubr.msk.bf16.mxu0 %vm2146_vm0, %v2145_v1  ;;  %v799_v14 = vor.u32 %v798_v9, %v795_v8  ;;  %v956_v9 = vrot.slane %v2248_v36, 2  ;;  %v1230_v36 = vshrl.u32 %v1754_v56, 16 }
  0x46   : > { %v1108_v62 = vsel %vm948_vm5, %v1106_v59, %v1107_v60  ;;  %v953_v2 = vsel %vm948_vm5, %v950_v54, %v952_v61 }
  0x47   : > { %v809_v28 = vsel %vm783_vm4, %v799_v14, %v808_v24  ;;  %v957_v13 = vsel %vm948_vm5, %v954_v4, %v956_v9  ;;  %v1232_v21 = vrot.slane %v1230_v36, 2  ;;  %v1243_v24 = vrot.slane %v1241_v17, 3 }
  0x4b   : > { %1902 = vmatmul.mubr.msk.bf16.gmra.mrb[24].mxu1 %vm318_vm2, %v2214_v10  ;;  %v791_v10 = vor.u32 %v790_v7, %v787_v6  ;;  %v2439_v6 = vld [vmem:[%s2202_s21 + $0x20] sm:$0xff]   ;;  %v955_v7 = vsel %vm948_vm5, %v952_v61, %v954_v4 }
  0x4c   : > { %1920 = vmatmul.mubr.msk.bf16.gmra.mrb[24].mxu0 %vm318_vm2, %v512_v58  ;;  %1929 = vmatprep.mubr.msk.bf16.mxu1 %vm2146_vm0, %v2145_v1  ;;  %v951_v58 = vsel %vm948_vm5, %v949_v53, %v950_v54  ;;  %v1111_v8 = vrot.slane %v2439_v6, 2  ;;  %v1259_v42 = vshll.u32 %v2439_v6, 16  ;;  %v1399_v56 = vrot.slane %v2439_v6, 3 }
  0x4d   : > { %1923 = vmatprep.mubr.msk.bf16.mxu0 %vm2146_vm0, %v2145_v1  ;;  %v800_v18 = vsel %vm783_vm4, %v791_v10, %v799_v14  ;;  %v958_v14 = vrot.slane %v2376_v39, 2 }
  0x4e   : > { %v1400_v59 = vsel %vm1393_vm7, %v1397_v47, %v1399_v56 }
  0x4f   : > { %v959_v20 = vsel %vm948_vm5, %v956_v9, %v958_v14 }
  0x53   : > { %1930 = vmatmul.mubr.msk.bf16.vlgmr.msra.gmra.mrb[28].mxu1 %vm318_vm2, %v663_v11  ;;  %v1112_v11 = vsel %vm948_vm5, %v1109_v3, %v1111_v8 }
  0x54   : > { %1924 = vmatmul.mubr.msk.bf16.gmra.mrb[28].mxu0 %vm318_vm2, %v514_v5  ;;  %1972 = vmatpush3.bf16.msra.mxu1 %v2103_v12  ;;  %v1110_v5 = vsel %vm948_vm5, %v1107_v60, %v1109_v3  ;;  %v2452_v12 = vld [vmem:[%s2202_s21 + $0x28] sm:$0xff]  }
  0x55   : > { %1951 = vmatprep.mubr.msk.bf16.mxu0 %vm2146_vm0, %v2145_v1  ;;  %1933 = vmatprep.mubr.msk.bf16.mxu1 %vm2146_vm0, %v2145_v1  ;;  %v1113_v10 = vrot.slane %v2452_v12, 2  ;;  %v1265_v49 = vshrl.u32 %v2452_v12, 16  ;;  %v1268_v50 = vshll.u32 %v2452_v12, 16 }
  0x56   : > { %2015 = vmatprep.subr.bf16.mxu1 %v2145_v1 }
  0x57   : > { %v1267_v53 = vrot.slane %v1265_v49, 2  ;;  %v1270_v54 = vrot.slane %v1268_v50, 3 }
  0x59   : > { %v1271_v57 = vor.u32 %v1270_v54, %v1267_v53 }
  0x5b   : > { %1934 = vmatmul.mubr.msk.bf16.gmra.mrb[32].mxu1 %vm318_vm2, %v665_v22  ;;  %v1235_v22 = vrot.slane %v1233_v15, 3 }
  0x5c   : > { %1952 = vmatmul.mubr.msk.bf16.vlgmr.msra.gmra.mrb[32].mxu0 %vm318_vm2, %v800_v18  ;;  %1937 = vmatprep.mubr.msk.bf16.mxu1 %vm2146_vm0, %v2145_v1  ;;  %v1114_v18 = vsel %vm948_vm5, %v1111_v8, %v1113_v10 }
  0x5d   : > { %1994 = vmatpush3.bf16.msra.mxu0 %v2105_v19  ;;  %1955 = vmatprep.mubr.msk.bf16.mxu0 %vm2146_vm0, %v2145_v1  ;;  %v2118_v19 = vld [vmem:[%s2202_s21 + $0x30] ss:$0 sps:$4 sm:$0x33]   ;;  %v1236_v27 = vor.u32 %v1235_v22, %v1232_v21 }
  0x5e   : > { %2037 = vmatprep.subr.bf16.mxu0 %v2145_v1  ;;  %v1115_v25 = vrot.slane %v2118_v19, 2 }
  0x63   : > { %1938 = vmatmul.mubr.msk.bf16.gmra.mrb[36].mxu1 %vm318_vm2, %v667_v31  ;;  %v1116_v31 = vsel %vm948_vm5, %v1113_v10, %v1115_v25 }
  0x64   : > { %1956 = vmatmul.mubr.msk.bf16.gmra.mrb[36].mxu0 %vm318_vm2, %v809_v28  ;;  %1941 = vmatprep.mubr.msk.bf16.mxu1 %vm2146_vm0, %v2145_v1  ;;  %v1244_v28 = vor.u32 %v1243_v24, %v1240_v23 }
  0x65   : > { %1959 = vmatprep.mubr.msk.bf16.mxu0 %vm2146_vm0, %v2145_v1 }
  0x66   : > { %v1245_v33 = vsel %vm1228_vm6, %v1236_v27, %v1244_v28 }
  0x6b   : > { %1942 = vmatmul.mubr.msk.bf16.gmra.mrb[40].mxu1 %vm318_vm2, %v669_v40  ;;  %v1256_v40 = vshrl.u32 %v2439_v6, 16 }
  0x6c   : > { %1960 = vmatmul.mubr.msk.bf16.gmra.mrb[40].mxu0 %vm318_vm2, %v818_v35  ;;  %1945 = vmatprep.mubr.msk.bf16.mxu1 %vm2146_vm0, %v2145_v1  ;;  %v1252_v35 = vrot.slane %v1250_v30, 3 }
  0x6d   : > { %1963 = vmatprep.mubr.msk.bf16.mxu0 %vm2146_vm0, %v2145_v1  ;;  %v1258_v46 = vrot.slane %v1256_v40, 2 }
  0x6e   : > { %v1253_v39 = vor.u32 %v1252_v35, %v1249_v34 }
  0x70   : > { %v1254_v45 = vsel %vm1228_vm6, %v1244_v28, %v1253_v39 }
  0x73   : > { %1946 = vmatmul.mubr.msk.bf16.gmra.mrb[44].mxu1 %vm318_vm2, %v2263_v43  ;;  %v2111_v43 = vld [vmem:[%s2593_s1 + $0x38] sm:$0xff]  }
  0x74   : > { %1964 = vmatmul.mubr.msk.bf16.gmra.mrb[44].mxu0 %vm318_vm2, %v827_v41  ;;  %1973 = vmatprep.mubr.msk.bf16.mxu1 %vm2146_vm0, %v2145_v1  ;;  %v1261_v41 = vrot.slane %v1259_v42, 3 }
  0x75   : > { %1967 = vmatprep.mubr.msk.bf16.mxu0 %vm2146_vm0, %v2145_v1 }
  0x76   : > { %v1262_v48 = vor.u32 %v1261_v41, %v1258_v46 }
  0x78   : > { %v1263_v52 = vsel %vm1228_vm6, %v1253_v39, %v1262_v48  ;;  %v1272_v60 = vsel %vm1228_vm6, %v1262_v48, %v1271_v57 }
  0x7b   : > { %1974 = vmatmul.mubr.msk.bf16.vlgmr.msra.gmra.mrb[48].mxu1 %vm318_vm2, %v951_v58 }
  0x7c   : > { %1968 = vmatmul.mubr.msk.bf16.gmra.mrb[48].mxu0 %vm318_vm2, %v836_v55  ;;  %2016 = vmatpush3.bf16.msra.mxu1 %v2111_v43  ;;  %v2120_v55 = vld [vmem:[%s2202_s21 + $0x30] ss:$0 sps:$4 sm:$0x77]  }
  0x7d   : > { %1995 = vmatprep.mubr.msk.bf16.mxu0 %vm2146_vm0, %v2145_v1  ;;  %1977 = vmatprep.mubr.msk.bf16.mxu1 %vm2146_vm0, %v2145_v1  ;;  %v1274_v58 = vshrl.u32 %v2120_v55, 16  ;;  %v1277_v43 = vshll.u32 %v2120_v55, 16  ;;  %v1403_v4 = vrot.slane %v2120_v55, 3 }
  0x7f   : > { %v1276_v61 = vrot.slane %v1274_v58, 2 }
  0x83   : > { %1978 = vmatmul.mubr.msk.bf16.gmra.mrb[52].mxu1 %vm318_vm2, %v953_v2 }
  0x84   : > { %1996 = vmatmul.mubr.msk.bf16.vlgmr.msra.gmra.mrb[52].mxu0 %vm318_vm2, %v1108_v62  ;;  %1981 = vmatprep.mubr.msk.bf16.mxu1 %vm2146_vm0, %v2145_v1  ;;  %v1279_v62 = vrot.slane %v1277_v43, 3 }
  0x85   : > { %2038 = vmatpush3.bf16.msra.mxu0 %v2114_v63  ;;  %1999 = vmatprep.mubr.msk.bf16.mxu0 %vm2146_vm0, %v2145_v1  ;;  %v1401_v63 = vrot.slane %v2452_v12, 3 }
  0x86   : > { %v1280_v0 = vor.u32 %v1279_v62, %v1276_v61 }
  0x87   : > { %v1402_v2 = vsel %vm1393_vm7, %v1399_v56, %v1401_v63 }
  0x88   : > { %v1281_v3 = vsel %vm1228_vm6, %v1271_v57, %v1280_v0 }
  0x8b   : > { %1982 = vmatmul.mubr.msk.bf16.gmra.mrb[56].mxu1 %vm318_vm2, %v955_v7 }
  0x8c   : > { %2000 = vmatmul.mubr.msk.bf16.gmra.mrb[56].mxu0 %vm318_vm2, %v1110_v5  ;;  %1985 = vmatprep.mubr.msk.bf16.mxu1 %vm2146_vm0, %v2145_v1  ;;  %v1404_v5 = vsel %vm1393_vm7, %v1401_v63, %v1403_v4 }
  0x8d   : > { %2003 = vmatprep.mubr.msk.bf16.mxu0 %vm2146_vm0, %v2145_v1 }
  0x93   : > { %1986 = vmatmul.mubr.msk.bf16.gmra.mrb[60].mxu1 %vm318_vm2, %v957_v13 }
  0x94   : > { %2004 = vmatmul.mubr.msk.bf16.gmra.mrb[60].mxu0 %vm318_vm2, %v1112_v11  ;;  %1989 = vmatprep.mubr.msk.bf16.mxu1 %vm2146_vm0, %v2145_v1 }
  0x95   : > { %2007 = vmatprep.mubr.msk.bf16.mxu0 %vm2146_vm0, %v2145_v1 }
  0x9b   : > { %1990 = vmatmul.mubr.msk.bf16.gmra.mrb[64].mxu1 %vm318_vm2, %v959_v20 }
  0x9c   : > { %2008 = vmatmul.mubr.msk.bf16.gmra.mrb[64].mxu0 %vm318_vm2, %v1114_v18  ;;  %2017 = vmatprep.mubr.msk.bf16.mxu1 %vm2146_vm0, %v2145_v1 }
  0x9d   : > { %2011 = vmatprep.mubr.msk.bf16.mxu0 %vm2146_vm0, %v2145_v1 }
  0xa3   : > { %2018 = vmatmul.mubr.msk.bf16.vlgmr.msra.gmra.mrb[68].mxu1 %vm318_vm2, %v1245_v33 }
  0xa4   : > { %2012 = vmatmul.mubr.msk.bf16.gmra.mrb[68].mxu0 %vm318_vm2, %v1116_v31  ;;  %2021 = vmatprep.mubr.msk.bf16.mxu1 %vm2146_vm0, %v2145_v1 }
  0xa5   : > { %2039 = vmatprep.mubr.msk.bf16.mxu0 %vm2146_vm0, %v2145_v1 }
  0xab   : > { %2022 = vmatmul.mubr.msk.bf16.gmra.mrb[72].mxu1 %vm318_vm2, %v1254_v45 }
  0xac   : > { %2040 = vmatmul.mubr.msk.bf16.vlgmr.msra.gmra.mrb[72].mxu0 %vm318_vm2, %v1396_v44  ;;  %2025 = vmatprep.mubr.msk.bf16.mxu1 %vm2146_vm0, %v2145_v1 }
  0xad   : > { %2043 = vmatprep.mubr.msk.bf16.mxu0 %vm2146_vm0, %v2145_v1 }
  0xb3   : > { %2026 = vmatmul.mubr.msk.bf16.gmra.mrb[76].mxu1 %vm318_vm2, %v1263_v52 }
  0xb4   : > { %2044 = vmatmul.mubr.msk.bf16.gmra.mrb[76].mxu0 %vm318_vm2, %v1398_v51  ;;  %2029 = vmatprep.mubr.msk.bf16.mxu1 %vm2146_vm0, %v2145_v1 }
  0xb5   : > { %2047 = vmatprep.mubr.msk.bf16.mxu0 %vm2146_vm0, %v2145_v1 }
  0xbb   : > { %2030 = vmatmul.mubr.msk.bf16.gmra.mrb[80].mxu1 %vm318_vm2, %v1272_v60 }
  0xbc   : > { %2048 = vmatmul.mubr.msk.bf16.gmra.mrb[80].mxu0 %vm318_vm2, %v1400_v59  ;;  %2033 = vmatprep.mubr.msk.bf16.mxu1 %vm2146_vm0, %v2145_v1 }
  0xbd   : > { %2051 = vmatprep.mubr.msk.bf16.mxu0 %vm2146_vm0, %v2145_v1 }
  0xc3   : > { %2034 = vmatmul.mubr.msk.bf16.gmra.mrb[84].mxu1 %vm318_vm2, %v1281_v3 }
  0xc4   : > { %2052 = vmatmul.mubr.msk.bf16.gmra.mrb[84].mxu0 %vm318_vm2, %v1402_v2 }
  0xc5   : > { %2055 = vmatprep.mubr.msk.bf16.mxu0 %vm2146_vm0, %v2145_v1 }
  0xcc   : > { %2056 = vmatmul.mubr.msk.bf16.gmra.mrb[88].mxu0 %vm318_vm2, %v1404_v5 }
  0xee   : > { %v392_v9 = vpop.f32.mrb[0].mxu1 }
  0xef   : > { %v368_v6 = vpop.f32.mrb[0].mxu0  ;;  %v1877_v12 = vpop.f32.mrb[1].mxu1 }
  0xf0   : > { %v1865_v7 = vpop.f32.mrb[1].mxu0  ;;  %v395_v13 = vpop.f32.mrb[2].mxu1 }
  0xf1   : > { %v371_v8 = vpop.f32.mrb[2].mxu0  ;;  %v1878_v10 = vpop.f32.mrb[3].mxu1 }
  0xf2   : > { %v1866_v11 = vpop.f32.mrb[3].mxu0 }
  0xf6   : > { %v400_v16 = vpop.f32.mrb[4].mxu1 }
  0xf7   : > { %v376_v14 = vpop.f32.mrb[4].mxu0  ;;  %v1881_v17 = vpop.f32.mrb[5].mxu1 }
  0xf8   : > { %v1869_v36 = vpop.f32.mrb[5].mxu0  ;;  %v403_v18 = vpop.f32.mrb[6].mxu1 }
  0xf9   : > { %v379_v15 = vpop.f32.mrb[6].mxu0  ;;  %v1882_v19 = vpop.f32.mrb[7].mxu1 }
  0xfa   : > { %v1870_v1 = vpop.f32.mrb[7].mxu0 }
  0xfe   : > { %v457_v22 = vpop.f32.mrb[8].mxu1 }
  0xff   : > { %v384_v20 = vpop.f32.mrb[8].mxu0  ;;  %v458_v24 = vadd.f32 %v457_v22, %v368_v6  ;;  %v1887_v25 = vpop.f32.mrb[9].mxu1 }
 0x100   : > { %v1873_v21 = vpop.f32.mrb[9].mxu0  ;;  %v460_v27 = vpop.f32.mrb[10].mxu1 }
 0x101   : > { %v387_v23 = vpop.f32.mrb[10].mxu0  ;;  %v461_v28 = vadd.f32 %v460_v27, %v371_v8  ;;  %v1888_v29 = vpop.f32.mrb[11].mxu1 }
 0x102   : > { %v1874_v26 = vpop.f32.mrb[11].mxu0 }
 0x106   : > { %v465_v33 = vpop.f32.mrb[12].mxu1 }
 0x107   : > { %v570_v30 = vpop.f32.mrb[12].mxu0  ;;  %v466_v35 = vadd.f32 %v465_v33, %v376_v14  ;;  %v1891_v37 = vpop.f32.mrb[13].mxu1 }
 0x108   : > { %v609_v31 = vadd.f32 %v570_v30, %v458_v24  ;;  %v1909_v32 = vpop.f32.mrb[13].mxu0  ;;  %v468_v40 = vpop.f32.mrb[14].mxu1 }
 0x109   : > { %v573_v34 = vpop.f32.mrb[14].mxu0  ;;  %v469_v42 = vadd.f32 %v468_v40, %v379_v15  ;;  %v1892_v44 = vpop.f32.mrb[15].mxu1 }
 0x10a   : > { %v610_v38 = vadd.f32 %v573_v34, %v461_v28  ;;  %v1910_v39 = vpop.f32.mrb[15].mxu0 }
 0x10e   : > { %v473_v47 = vpop.f32.mrb[16].mxu1 }
 0x10f   : > { %v578_v45 = vpop.f32.mrb[16].mxu0  ;;  %v474_v49 = vadd.f32 %v473_v47, %v384_v20  ;;  %v1895_v50 = vpop.f32.mrb[17].mxu1 }
 0x110   : > { %v611_v46 = vadd.f32 %v578_v45, %v466_v35  ;;  %v1913_v41 = vpop.f32.mrb[17].mxu0  ;;  %v476_v53 = vpop.f32.mrb[18].mxu1 }
 0x111   : > { %v581_v48 = vpop.f32.mrb[18].mxu0  ;;  %v477_v54 = vadd.f32 %v476_v53, %v387_v23  ;;  %v1896_v55 = vpop.f32.mrb[19].mxu1 }
 0x112   : > { %v612_v51 = vadd.f32 %v581_v48, %v469_v42  ;;  %v1914_v52 = vpop.f32.mrb[19].mxu0 }
 0x116   : > { %v481_v43 = vpop.f32.mrb[20].mxu1 }
 0x117   : > { %v586_v56 = vpop.f32.mrb[20].mxu0  ;;  %v482_v60 = vadd.f32 %v481_v43, %v392_v9  ;;  %v1899_v61 = vpop.f32.mrb[21].mxu1 }
 0x118   : > { %v613_v57 = vadd.f32 %v586_v56, %v474_v49  ;;  %v1917_v58 = vpop.f32.mrb[21].mxu0  ;;  %v484_v0 = vpop.f32.mrb[22].mxu1 }
 0x119   : > { %v589_v59 = vpop.f32.mrb[22].mxu0  ;;  %v485_v2 = vadd.f32 %v484_v0, %v395_v13  ;;  %v1900_v3 = vpop.f32.mrb[23].mxu1 }
 0x11a   : > { %v614_v62 = vadd.f32 %v589_v59, %v477_v54  ;;  %v1918_v63 = vpop.f32.mrb[23].mxu0 }
 0x11e   : > { %v489_v7 = vpop.f32.mrb[24].mxu1 }
 0x11f   : > { %v594_v4 = vpop.f32.mrb[24].mxu0  ;;  %v490_v11 = vadd.f32 %v489_v7, %v400_v16  ;;  %v1903_v12 = vpop.f32.mrb[25].mxu1 }
 0x120   : > { %v615_v5 = vadd.f32 %v594_v4, %v482_v60  ;;  %v1921_v6 = vpop.f32.mrb[25].mxu0  ;;  %v492_v36 = vpop.f32.mrb[26].mxu1 }
 0x121   : > { %v597_v8 = vpop.f32.mrb[26].mxu0  ;;  %v493_v15 = vadd.f32 %v492_v36, %v403_v18  ;;  %v1904_v1 = vpop.f32.mrb[27].mxu1 }
 0x122   : > { %v616_v10 = vadd.f32 %v597_v8, %v485_v2  ;;  %v1922_v14 = vpop.f32.mrb[27].mxu0 }
 0x126   : > { %v727_v20 = vpop.f32.mrb[28].mxu1 }
 0x127   : > { %v602_v17 = vpop.f32.mrb[28].mxu0  ;;  %v766_v22 = vadd.f32 %v727_v20, %v609_v31  ;;  %v1931_v13 = vpop.f32.mrb[29].mxu1 }
 0x128   : > { %v617_v9 = vadd.f32 %v602_v17, %v490_v11  ;;  %v1925_v19 = vpop.f32.mrb[29].mxu0  ;;  %v730_v25 = vpop.f32.mrb[30].mxu1 }
 0x129   : > { %v605_v21 = vpop.f32.mrb[30].mxu0  ;;  %v767_v26 = vadd.f32 %v730_v25, %v610_v38  ;;  %v1932_v27 = vpop.f32.mrb[31].mxu1 }
 0x12a   : > { %v618_v23 = vadd.f32 %v605_v21, %v493_v15  ;;  %v1926_v24 = vpop.f32.mrb[31].mxu0 }
 0x12e   : > { %v735_v30 = vpop.f32.mrb[32].mxu1 }
 0x12f   : > { %v892_v28 = vpop.f32.mrb[32].mxu0  ;;  %v768_v33 = vadd.f32 %v735_v30, %v611_v46  ;;  %v1935_v18 = vpop.f32.mrb[33].mxu1 }
 0x130   : > { %v931_v16 = vadd.f32 %v892_v28, %v766_v22  ;;  %v1953_v29 = vpop.f32.mrb[33].mxu0  ;;  %v738_v37 = vpop.f32.mrb[34].mxu1 }
 0x131   : > { %v895_v32 = vpop.f32.mrb[34].mxu0  ;;  %v769_v39 = vadd.f32 %v738_v37, %v612_v51  ;;  %v1936_v40 = vpop.f32.mrb[35].mxu1 }
 0x132   : > { %v932_v34 = vadd.f32 %v895_v32, %v767_v26  ;;  %v1954_v35 = vpop.f32.mrb[35].mxu0 }
 0x136   : > { %v743_v45 = vpop.f32.mrb[36].mxu1 }
 0x137   : > { %v900_v42 = vpop.f32.mrb[36].mxu0  ;;  %v770_v47 = vadd.f32 %v743_v45, %v613_v57  ;;  %v1939_v38 = vpop.f32.mrb[37].mxu1 }
 0x138   : > { %v933_v31 = vadd.f32 %v900_v42, %v768_v33  ;;  %v1957_v44 = vpop.f32.mrb[37].mxu0  ;;  %v746_v50 = vpop.f32.mrb[38].mxu1 }
 0x139   : > { %v903_v41 = vpop.f32.mrb[38].mxu0  ;;  %v771_v52 = vadd.f32 %v746_v50, %v614_v62  ;;  %v1940_v53 = vpop.f32.mrb[39].mxu1 }
 0x13a   : > { %v934_v48 = vadd.f32 %v903_v41, %v769_v39  ;;  %v1958_v49 = vpop.f32.mrb[39].mxu0 }
 0x13e   : > { %v751_v56 = vpop.f32.mrb[40].mxu1 }
 0x13f   : > { %v908_v54 = vpop.f32.mrb[40].mxu0  ;;  %v772_v43 = vadd.f32 %v751_v56, %v615_v5  ;;  %v1943_v51 = vpop.f32.mrb[41].mxu1 }
 0x140   : > { %v935_v46 = vadd.f32 %v908_v54, %v770_v47  ;;  %v1961_v55 = vpop.f32.mrb[41].mxu0  ;;  %v754_v61 = vpop.f32.mrb[42].mxu1 }
 0x141   : > { %v911_v58 = vpop.f32.mrb[42].mxu0  ;;  %v773_v63 = vadd.f32 %v754_v61, %v616_v10  ;;  %v1944_v0 = vpop.f32.mrb[43].mxu1 }
 0x142   : > { %v936_v59 = vadd.f32 %v911_v58, %v771_v52  ;;  %v1962_v60 = vpop.f32.mrb[43].mxu0 }
 0x146   : > { %v759_v4 = vpop.f32.mrb[44].mxu1 }
 0x147   : > { %v916_v2 = vpop.f32.mrb[44].mxu0  ;;  %v774_v7 = vadd.f32 %v759_v4, %v617_v9  ;;  %v1947_v62 = vpop.f32.mrb[45].mxu1 }
 0x148   : > { %v937_v57 = vadd.f32 %v916_v2, %v772_v43  ;;  %v1965_v3 = vpop.f32.mrb[45].mxu0  ;;  %v762_v12 = vpop.f32.mrb[46].mxu1 }
 0x149   : > { %v919_v6 = vpop.f32.mrb[46].mxu0  ;;  %v775_v14 = vadd.f32 %v762_v12, %v618_v23  ;;  %v1948_v36 = vpop.f32.mrb[47].mxu1 }
 0x14a   : > { %v938_v8 = vadd.f32 %v919_v6, %v773_v63  ;;  %v1966_v11 = vpop.f32.mrb[47].mxu0 }
 0x14e   : > { %v1015_v17 = vpop.f32.mrb[48].mxu1 }
 0x14f   : > { %v924_v15 = vpop.f32.mrb[48].mxu0  ;;  %v1054_v20 = vadd.f32 %v1015_v17, %v931_v16  ;;  %v1975_v10 = vpop.f32.mrb[49].mxu1 }
 0x150   : > { %v939_v5 = vadd.f32 %v924_v15, %v774_v7  ;;  %v1969_v1 = vpop.f32.mrb[49].mxu0  ;;  %v1018_v13 = vpop.f32.mrb[50].mxu1 }
 0x151   : > { %v927_v19 = vpop.f32.mrb[50].mxu0  ;;  %v1055_v24 = vadd.f32 %v1018_v13, %v932_v34  ;;  %v1976_v25 = vpop.f32.mrb[51].mxu1 }
 0x152   : > { %v940_v21 = vadd.f32 %v927_v19, %v775_v14  ;;  %v1970_v22 = vpop.f32.mrb[51].mxu0 }
 0x156   : > { %v1023_v28 = vpop.f32.mrb[52].mxu1 }
 0x157   : > { %v1172_v26 = vpop.f32.mrb[52].mxu0  ;;  %v1056_v30 = vadd.f32 %v1023_v28, %v933_v31  ;;  %v1979_v23 = vpop.f32.mrb[53].mxu1 }
 0x158   : > { %v1211_v9 = vadd.f32 %v1172_v26, %v1054_v20  ;;  %v1997_v27 = vpop.f32.mrb[53].mxu0  ;;  %v1026_v18 = vpop.f32.mrb[54].mxu1 }
 0x159   : > { %v1175_v29 = vpop.f32.mrb[54].mxu0  ;;  %v1057_v35 = vadd.f32 %v1026_v18, %v934_v48  ;;  %v1980_v37 = vpop.f32.mrb[55].mxu1 }
 0x15a   : > { %v1212_v32 = vadd.f32 %v1175_v29, %v1055_v24  ;;  %v1998_v33 = vpop.f32.mrb[55].mxu0 }
 0x15e   : > { %v1031_v42 = vpop.f32.mrb[56].mxu1 }
 0x15f   : > { %v1180_v39 = vpop.f32.mrb[56].mxu0  ;;  %v1058_v45 = vadd.f32 %v1031_v42, %v935_v46  ;;  %v1983_v34 = vpop.f32.mrb[57].mxu1 }
 0x160   : > { %v1213_v16 = vadd.f32 %v1180_v39, %v1056_v30  ;;  %v2001_v40 = vpop.f32.mrb[57].mxu0  ;;  %v1034_v38 = vpop.f32.mrb[58].mxu1 }
 0x161   : > { %v1183_v44 = vpop.f32.mrb[58].mxu0  ;;  %v1059_v49 = vadd.f32 %v1034_v38, %v936_v59  ;;  %v1984_v50 = vpop.f32.mrb[59].mxu1 }
 0x162   : > { %v1214_v41 = vadd.f32 %v1183_v44, %v1057_v35  ;;  %v2002_v47 = vpop.f32.mrb[59].mxu0 }
 0x166   : > { %v1039_v54 = vpop.f32.mrb[60].mxu1 }
 0x167   : > { %v1188_v52 = vpop.f32.mrb[60].mxu0  ;;  %v1060_v56 = vadd.f32 %v1039_v54, %v937_v57  ;;  %v1987_v48 = vpop.f32.mrb[61].mxu1 }
 0x168   : > { %v1215_v31 = vadd.f32 %v1188_v52, %v1058_v45  ;;  %v2005_v53 = vpop.f32.mrb[61].mxu0  ;;  %v1042_v51 = vpop.f32.mrb[62].mxu1 }
 0x169   : > { %v1191_v55 = vpop.f32.mrb[62].mxu0  ;;  %v1061_v60 = vadd.f32 %v1042_v51, %v938_v8  ;;  %v1988_v61 = vpop.f32.mrb[63].mxu1 }
 0x16a   : > { %v2527_v58 = vadd.f32 %v1191_v55, %v1059_v49  ;;  %v2006_v43 = vpop.f32.mrb[63].mxu0 }
 0x16e   : > { %v1047_v2 = vpop.f32.mrb[64].mxu1 }
 0x16f   : > { %v1196_v46 = vpop.f32.mrb[64].mxu0  ;;  %v1062_v3 = vadd.f32 %v1047_v2, %v939_v5  ;;  %v1991_v4 = vpop.f32.mrb[65].mxu1 }
 0x170   : > { %v2529_v63 = vadd.f32 %v1196_v46, %v1060_v56  ;;  %v2009_v0 = vpop.f32.mrb[65].mxu0  ;;  %v1050_v57 = vpop.f32.mrb[66].mxu1 }
 0x171   : > { %v1199_v59 = vpop.f32.mrb[66].mxu0  ;;  %v1063_v62 = vadd.f32 %v1050_v57, %v940_v21  ;;  %v1992_v11 = vpop.f32.mrb[67].mxu1  ;;  %v2541_v21 = vld [vmem:[%s2594_s2] ss:$0 sm:$0xff] }
 0x172   : > { %v2531_v6 = vadd.f32 %v1199_v59, %v1061_v60  ;;  %v2010_v7 = vpop.f32.mrb[67].mxu0 }
 0x176   : > { %v1337_v36 = vpop.f32.mrb[68].mxu1 }
 0x177   : > { %v1204_v12 = vpop.f32.mrb[68].mxu0  ;;  %v1376_v1 = vadd.f32 %v1337_v36, %v1211_v9  ;;  %v2019_v17 = vpop.f32.mrb[69].mxu1 }
 0x178   : > { %v2533_v14 = vadd.f32 %v1204_v12, %v1062_v3  ;;  %v2013_v8 = vpop.f32.mrb[69].mxu0  ;;  %v1340_v5 = vpop.f32.mrb[70].mxu1 }
 0x179   : > { %v1207_v15 = vpop.f32.mrb[70].mxu0  ;;  %v1377_v10 = vadd.f32 %v1340_v5, %v1212_v32  ;;  %v2020_v22 = vpop.f32.mrb[71].mxu1 }
 0x17a   : > { %v2535_v19 = vadd.f32 %v1207_v15, %v1063_v62  ;;  %v2014_v20 = vpop.f32.mrb[71].mxu0 }
 0x17e   : > { %v1345_v26 = vpop.f32.mrb[72].mxu1 }
 0x17f   : > { %v1460_v13 = vpop.f32.mrb[72].mxu0  ;;  %v1378_v28 = vadd.f32 %v1345_v26, %v1213_v16  ;;  %v2023_v29 = vpop.f32.mrb[73].mxu1 }
 0x180   : > { %v1499_v24 = vadd.f32 %v1460_v13, %v1376_v1  ;;  %v2041_v25 = vpop.f32.mrb[73].mxu0  ;;  %v1348_v32 = vpop.f32.mrb[74].mxu1 }
 0x181   : > { %v1463_v27 = vpop.f32.mrb[74].mxu0  ;;  %v1379_v18 = vadd.f32 %v1348_v32, %v1214_v41  ;;  %v2024_v37 = vpop.f32.mrb[75].mxu1 }
 0x182   : > { %v1516_v9 = vadd.f32 %v2541_v21, %v1499_v24  ;;  %v1500_v30 = vadd.f32 %v1463_v27, %v1377_v10  ;;  %v2042_v23 = vpop.f32.mrb[75].mxu0 }
 0x184   : > { %v1797_v33 = vpack.c.bf16 %v1516_v9, %v1516_v9  ;;  %v1517_v35 = vadd.f32 %v2541_v21, %v1500_v30 }
 0x186   : > { %1567 = vst.msk [vmem:[%s2547_s12] sm:$0xf] %vm1566_vm8, %v1797_v33  ;;  %v1798_v39 = vpack.c.bf16 %v1517_v35, %v1517_v35  ;;  %v1353_v44 = vpop.f32.mrb[76].mxu1 }
 0x187   : > { %v1468_v16 = vpop.f32.mrb[76].mxu0  ;;  %v1380_v34 = vadd.f32 %v1353_v44, %v1215_v31  ;;  %v2027_v38 = vpop.f32.mrb[77].mxu1 }
 0x188   : > { %1568 = vst.msk [vmem:[%s2547_s12 + $0x4] sm:$0xf] %vm1566_vm8, %v1798_v39  ;;  %v1501_v40 = vadd.f32 %v1468_v16, %v1378_v28  ;;  %v2045_v42 = vpop.f32.mrb[77].mxu0  ;;  %v1356_v50 = vpop.f32.mrb[78].mxu1 }
 0x189   : > { %v1471_v45 = vpop.f32.mrb[78].mxu0  ;;  %v1381_v53 = vadd.f32 %v1356_v50, %v2527_v58  ;;  %v2028_v55 = vpop.f32.mrb[79].mxu1 }
 0x18a   : > { %v1518_v47 = vadd.f32 %v2541_v21, %v1501_v40  ;;  %v1502_v41 = vadd.f32 %v1471_v45, %v1379_v18  ;;  %v2046_v49 = vpop.f32.mrb[79].mxu0 }
 0x18c   : > { %v1799_v52 = vpack.c.bf16 %v1518_v47, %v1518_v47  ;;  %v1519_v54 = vadd.f32 %v2541_v21, %v1502_v41 }
 0x18e   : > { %1569 = vst.msk [vmem:[%s2547_s12 + $0x8] sm:$0xf] %vm1566_vm8, %v1799_v52  ;;  %v1800_v56 = vpack.c.bf16 %v1519_v54, %v1519_v54  ;;  %v1361_v51 = vpop.f32.mrb[80].mxu1 }
 0x18f   : > { %v1476_v48 = vpop.f32.mrb[80].mxu0  ;;  %v1382_v61 = vadd.f32 %v1361_v51, %v2529_v63  ;;  %v2031_v58 = vpop.f32.mrb[81].mxu1 }
 0x190   : > { %1570 = vst.msk [vmem:[%s2547_s12 + $0xc] sm:$0xf] %vm1566_vm8, %v1800_v56  ;;  %v1503_v31 = vadd.f32 %v1476_v48, %v1380_v34  ;;  %v2049_v43 = vpop.f32.mrb[81].mxu0  ;;  %v1364_v59 = vpop.f32.mrb[82].mxu1 }
 0x191   : > { %v1479_v60 = vpop.f32.mrb[82].mxu0  ;;  %v1383_v4 = vadd.f32 %v1364_v59, %v2531_v6  ;;  %v2032_v57 = vpop.f32.mrb[83].mxu1 }
 0x192   : > { %v1520_v46 = vadd.f32 %v2541_v21, %v1503_v31  ;;  %v1504_v0 = vadd.f32 %v1479_v60, %v1381_v53  ;;  %v2050_v2 = vpop.f32.mrb[83].mxu0 }
 0x194   : > { %v1801_v3 = vpack.c.bf16 %v1520_v46, %v1520_v46  ;;  %v1521_v7 = vadd.f32 %v2541_v21, %v1504_v0 }
 0x196   : > { %1571 = vst.msk [vmem:[%s2547_s12 + $0x10] sm:$0xf] %vm1566_vm8, %v1801_v3  ;;  %v1802_v62 = vpack.c.bf16 %v1521_v7, %v1521_v7  ;;  %v1369_v8 = vpop.f32.mrb[84].mxu1 }
 0x197   : > { %v1484_v11 = vpop.f32.mrb[84].mxu0  ;;  %v1384_v15 = vadd.f32 %v1369_v8, %v2533_v14  ;;  %v2035_v6 = vpop.f32.mrb[85].mxu1 }
 0x198   : > { %1572 = vst.msk [vmem:[%s2547_s12 + $0x14] sm:$0xf] %vm1566_vm8, %v1802_v62  ;;  %v1505_v63 = vadd.f32 %v1484_v11, %v1382_v61  ;;  %v2053_v12 = vpop.f32.mrb[85].mxu0  ;;  %v1372_v5 = vpop.f32.mrb[86].mxu1 }
 0x199   : > { %v1487_v36 = vpop.f32.mrb[86].mxu0  ;;  %v1385_v22 = vadd.f32 %v1372_v5, %v2535_v19  ;;  %v2036_v24 = vpop.f32.mrb[87].mxu1 }
 0x19a   : > { %v1522_v1 = vadd.f32 %v2541_v21, %v1505_v63  ;;  %v1506_v17 = vadd.f32 %v1487_v36, %v1383_v4  ;;  %v2054_v20 = vpop.f32.mrb[87].mxu0 }
 0x19c   : > { %v1803_v10 = vpack.c.bf16 %v1522_v1, %v1522_v1  ;;  %v1523_v13 = vadd.f32 %v2541_v21, %v1506_v17 }
 0x19e   : > { %1573 = vst.msk [vmem:[%s2547_s12 + $0x18] sm:$0xf] %vm1566_vm8, %v1803_v10  ;;  %v1804_v25 = vpack.c.bf16 %v1523_v13, %v1523_v13 }
 0x19f   : > { %v1492_v26 = vpop.f32.mrb[88].mxu0 }
 0x1a0   : > { %1574 = vst.msk [vmem:[%s2547_s12 + $0x1c] sm:$0xf] %vm1566_vm8, %v1804_v25  ;;  %v1507_v14 = vadd.f32 %v1492_v26, %v1384_v15  ;;  %v2057_v27 = vpop.f32.mrb[89].mxu0 }
 0x1a1   : > { %v1495_v28 = vpop.f32.mrb[90].mxu0 }
 0x1a2   : > { %v1524_v9 = vadd.f32 %v2541_v21, %v1507_v14  ;;  %v1508_v29 = vadd.f32 %v1495_v28, %v1385_v22  ;;  %v2058_v30 = vpop.f32.mrb[91].mxu0 }
 0x1a4   : > { %v1805_v23 = vpack.c.bf16 %v1524_v9, %v1524_v9  ;;  %v1525_v19 = vadd.f32 %v2541_v21, %v1508_v29 }
 0x1a6   : > { %1575 = vst.msk [vmem:[%s2547_s12 + $0x20] sm:$0xf] %vm1566_vm8, %v1805_v23  ;;  %v1806_v32 = vpack.c.bf16 %v1525_v19, %v1525_v19 }
 0x1a8   : > { %1576 = vst.msk [vmem:[%s2547_s12 + $0x24] sm:$0xf] %vm1566_vm8, %v1806_v32 }
 0x1a9 PF: > { %s13_s14 = sadd.s32 1, %s2143_s14   ;;  %s2596_s12 = smov %s2139_s13 }
 0x1aa   : > { %p10_p5 = scmp.ge.s32.totalorder %s13_s14, 4   ;;  %s2597_s13 = smov %s2599_s15 }
 0x1ac   :  { %12 = sbr.rel (!%p10_p5) target bundleno = 2 (0x2), region = 76 }

// kernel: conv_mha_forward.5
= control target key start
LH: loop header
LB: loop body
LE: loop exit
PB: predicated region body
PF: predicated region fallthrough
CT: control target
= control target key end

     0   :  { %s1620_s12 = smov 0   ;;  %s1622_s13 = smov 0   ;;  %s1923_s0 = inlined_call_operand.vmem [shape: bf16[2,72,16], index: 0, kind: input, shape index: {}]   ;;  %s1924_s1 = inlined_call_operand.vmem [shape: bf16[9,16,16], index: 1, kind: input, shape index: {}]   ;;  %s1925_s2 = inlined_call_operand.vmem [shape: f32[1,16], index: 2, kind: input, shape index: {}]   ;;  %s1926_s3 = inlined_call_operand.vmem [shape: f32[2,48,16], index: 3, kind: output, shape index: {}]  }
   0x1   :  { %s1624_s14 = smov 0  }
   0x2 LB: > { %s25_s15 = sadd.s32 1, %s1592_s13  ;;  %p1273_p0 = scmp.ge.s32.totalorder %s1596_s14, 1  ;;  %s1596_s14 = sphi %s1624_s14, %s13_s14   ;;  %s1592_s13 = sphi %s1622_s13, %s1928_s13   ;;  %s1588_s12 = sphi %s1620_s12, %s1927_s12  }
   0x3   : > { %p27_p1 = scmp.ge.s32.totalorder %s25_s15, 2  ;;  %p168_p2 = scmp.lt.s32.totalorder %s1596_s14, 3 }
   0x5   : > { %s1930_s15 = smov (%p27_p1, %s25_s15), 0  ;;  %p169_p3 = pnand %p1273_p0, %p168_p2 }
   0x6   : > { %v1544_v0 = vld [vmem:[%s1924_s1 + $0x8] sm:$0xff] (!%p169_p3)   ;;  %v1598_v1 = vmov (!%p169_p3), 0.0   ;;  %p202_p4 = scmp.lt.s32.totalorder (!%p169_p3), %s1588_s12, 1  ;;  %vm1599_vm0 = vmmov (!%p169_p3), 0   ;;  %vm253_vm1 = vsmask.f32 (!%p169_p3), 7424 }
   0x7   : > { %172 = sbr.rel (%p169_p3) target bundleno = 353 (0x161), region = 32  ;;  %1514 = vmatprep.subr.bf16.mxu1 (!%p169_p3), %v1598_v1  ;;  %1388 = vmatprep.subr.bf16.mxu0 (!%p169_p3), %v1598_v1  ;;  %vm288_vm2 = vcmask (!%p169_p3), 130048   ;;  %v1547_v22 = vld [vmem:[%s1924_s1] sm:$0xff] (!%p169_p3)   ;;  %v1550_v26 = vld [vmem:[%s1924_s1 + $0x10] sm:$0xff] (!%p169_p3)   ;;  %vm431_vm3 = vcmask (!%p169_p3), 1046528  }
   0x8   : > { %1515 = vmatpush3.bf16.msra.mxu1 (!%p169_p3), %v1544_v0  ;;  %1394 = vmatprep.mubr.msk.bf16.mxu1 (!%p169_p3), %vm1599_vm0, %v1598_v1  ;;  %v1553_v36 = vld [vmem:[%s1924_s1 + $0x20] sm:$0xff] (!%p169_p3)  }
   0x9   : > { %1402 = vmatprep.subr.bf16.mxu1 (!%p169_p3), %v1598_v1  ;;  %1389 = vmatpush3.bf16.msra.mxu0 (!%p169_p3), %v1544_v0 }
   0xa   : > { %1390 = vmatprep.mubr.msk.bf16.mxu0 (!%p169_p3), %vm1599_vm0, %v1598_v1  ;;  %1416 = vmatprep.subr.bf16.mxu0 (!%p169_p3), %v1598_v1 }
   0xe   : > { %s1932_s12 = smov (!%p202_p4, %s1588_s12), 1 }
   0xf   : > { %s1516_s18 = smul.u32 36, %s1932_s12 }
  0x10   : > { %s1517_s11 = smul.u32 48, %s1932_s12 }
  0x11   : > { %s1655_s21 = scalar_lea.vmem %s1923_s0, %s1516_s18 }
  0x12   : > { %v1658_v2 = vld [vmem:[%s1655_s21 + $0x8] sm:$0xf]  ;;  %v1661_v3 = vld [vmem:[%s1655_s21 + $0xc] sm:$0xf]  ;;  %v1664_v4 = vld [vmem:[%s1655_s21 + $0x10] sm:$0xf]  ;;  %s1900_s20 = scalar_lea.vmem %s1926_s3, %s1517_s11 }
  0x13   : > { %v1667_v5 = vld [vmem:[%s1655_s21 + $0x14] sm:$0xf]  ;;  %v1671_v6 = vcombine.low %v1658_v2, %v1661_v3  ;;  %v223_v7 = vld [vmem:[%s1655_s21] sm:$0xf]  ;;  %v1675_v8 = vld [vmem:[%s1655_s21 + $0x4] sm:$0xf] }
  0x14   : > { %v1679_v9 = vcombine.low %v1664_v4, %v1667_v5  ;;  %v1682_v10 = vcombine.low %v223_v7, %v1675_v8  ;;  %v1687_v13 = vld [vmem:[%s1655_s21 + $0x18] ss:$0 sps:$4 sm:$0x11]   ;;  %v424_v18 = vld [vmem:[%s1655_s21] sm:$0xe]  ;;  %v1570_v35 = vld [vmem:[%s1655_s21 + $0x10] sm:$0xff]  }
  0x15   : > { %v262_v11 = vshll.u32 %v1671_v6, 16  ;;  %v266_v12 = vshrl.u32 %v1671_v6, 16  ;;  %v278_v24 = vshll.u32 %v1687_v13, 16  ;;  %v1292_v27 = vcombine.low %v424_v18, %v1675_v8  ;;  %v917_v34 = vld [vmem:[%s1655_s21 + $0x8] sm:$0xf]  ;;  %v1572_v40 = vld [vmem:[%s1655_s21 + $0x18] sm:$0xff]  }
  0x16   : > { %v270_v14 = vshll.u32 %v1679_v9, 16  ;;  %v255_v15 = vshrl.u32 %v1682_v10, 16  ;;  %v257_v16 = vshll.u32 %v1682_v10, 16  ;;  %v274_v23 = vshrl.u32 %v1679_v9, 16  ;;  %v918_v37 = vld [vmem:[%s1655_s21 + $0xc] sm:$0xf] }
  0x17   : > { %v264_v17 = vrot.slane %v262_v11, 1  ;;  %v280_v31 = vrot.slane %v278_v24, 1  ;;  %v432_v32 = vrot.slane %v1292_v27, 1  ;;  %v433_v33 = vrot.slane %v1671_v6, 1  ;;  %v1051_v39 = vld [vmem:[%s1655_s21 + $0x8] sm:$0xe] }
  0x18   : > { %v272_v19 = vrot.slane %v270_v14, 1  ;;  %v259_v20 = vrot.slane %v257_v16, 1  ;;  %v1334_v42 = vcombine.low %v917_v34, %v918_v37  ;;  %v1344_v43 = vcombine.low %v1051_v39, %v918_v37  ;;  %v1573_v45 = vld [vmem:[%s1655_s21 + $0x20] ss:$0 sps:$4 sm:$0x11]  }
  0x19   : > { %v268_v21 = vor.u32 %v266_v12, %v264_v17  ;;  %v434_v41 = vsel %vm431_vm3, %v432_v32, %v433_v33  ;;  %v1059_v44 = vrot.slane %v1570_v35, 1  ;;  %v435_v46 = vrot.slane %v1679_v9, 1  ;;  %v604_v62 = vld [vmem:[%s1655_s21 + $0x4] sm:$0xf]  ;;  %v1740_v63 = vld [vmem:[%s1655_s21 + $0x8] sm:$0xf] }
  0x1a   : > { %v260_v25 = vor.u32 %v259_v20, %v255_v15  ;;  %v276_v30 = vor.u32 %v274_v23, %v272_v19  ;;  %v946_v47 = vshrl.u32 %v1334_v42, 16  ;;  %v948_v48 = vshll.u32 %v1334_v42, 16  ;;  %v1552_v12 = vld [vmem:[%s1924_s1 + $0x18] sm:$0xff]  }
  0x1b   : > { %v273_v28 = vsel %vm253_vm1, %v268_v21, %v272_v19  ;;  %v953_v49 = vshll.u32 %v1570_v35, 16  ;;  %v1058_v50 = vrot.slane %v1344_v43, 1  ;;  %v1061_v51 = vrot.slane %v1572_v40, 1  ;;  %v1762_v21 = vld [vmem:[%s1655_s21 + $0xc] sm:$0xf] }
  0x1c   : > { %1395 = vmatmul.mubr.msk.bf16.vlgmr.msra.gmra.mrb[0].mxu1 %vm288_vm2, %v273_v28  ;;  %v265_v29 = vsel %vm253_vm1, %v260_v25, %v264_v17  ;;  %v281_v38 = vsel %vm253_vm1, %v276_v30, %v280_v31  ;;  %v957_v52 = vshrl.u32 %v1570_v35, 16  ;;  %v961_v53 = vshll.u32 %v1572_v40, 16  ;;  %v1784_v30 = vld [vmem:[%s1655_s21 + $0x18] sm:$0xf] }
  0x1d   : > { %1403 = vmatpush3.bf16.msra.mxu1 %v1547_v22  ;;  %1391 = vmatmul.mubr.msk.bf16.vlgmr.msra.gmra.mrb[0].mxu0 %vm288_vm2, %v265_v29  ;;  %v950_v54 = vrot.slane %v948_v48, 1  ;;  %v955_v55 = vrot.slane %v953_v49, 1  ;;  %v1063_v56 = vrot.slane %v1573_v45, 1  ;;  %v965_v57 = vshrl.u32 %v1572_v40, 16  ;;  %v1765_v22 = vld [vmem:[%s1655_s21 + $0x10] sm:$0xf] }
  0x1e   : > { %1398 = vmatprep.mubr.msk.bf16.mxu1 %vm1599_vm0, %v1598_v1  ;;  %1417 = vmatpush3.bf16.msra.mxu0 %v1550_v26  ;;  %v1733_v58 = vsel %vm431_vm3, %v1058_v50, %v1059_v44  ;;  %v1736_v59 = vsel %vm431_vm3, %v1059_v44, %v1061_v51  ;;  %v963_v60 = vrot.slane %v961_v53, 1  ;;  %v969_v61 = vshll.u32 %v1573_v45, 16  ;;  %v608_v29 = vld [vmem:[%s1655_s21 + $0x14] sm:$0xf]  ;;  %v517_v45 = vld [vmem:[%s1655_s21 + $0x18] sm:$0xf] }
  0x1f   : > { %1418 = vmatprep.mubr.msk.bf16.mxu0 %vm1599_vm0, %v1598_v1  ;;  %1430 = vmatprep.subr.bf16.mxu1 %v1598_v1  ;;  %v951_v0 = vor.u32 %v950_v54, %v946_v47  ;;  %v959_v7 = vor.u32 %v957_v52, %v955_v55  ;;  %v1743_v11 = vsel %vm431_vm3, %v1061_v51, %v1063_v56  ;;  %v437_v23 = vrot.slane %v1687_v13, 1  ;;  %v1565_v51 = vld [vmem:[%s1924_s1 + $0x38] sm:$0xff]  }
  0x20   : > { %1444 = vmatprep.subr.bf16.mxu0 %v1598_v1  ;;  %v967_v14 = vor.u32 %v965_v57, %v963_v60  ;;  %v971_v15 = vrot.slane %v969_v61, 1  ;;  %v436_v18 = vsel %vm431_vm3, %v433_v33, %v435_v46  ;;  %v1308_v19 = vcombine.low %v604_v62, %v1740_v63  ;;  %v830_v54 = vld [vmem:[%s1655_s21 + $0x1c] sm:$0xf] }
  0x21   : > { %v1749_v16 = vsel %vm253_vm1, %v951_v0, %v955_v55  ;;  %v1752_v17 = vsel %vm253_vm1, %v959_v7, %v963_v60  ;;  %v438_v25 = vsel %vm431_vm3, %v435_v46, %v437_v23  ;;  %v1792_v32 = vcombine.low %v608_v29, %v1784_v30  ;;  %v738_v46 = vld [vmem:[%s1655_s21 + $0x4] sm:$0xe] }
  0x22   : > { %v1757_v20 = vsel %vm253_vm1, %v967_v14, %v971_v15  ;;  %v635_v24 = vshll.u32 %v1308_v19, 16  ;;  %v633_v26 = vshrl.u32 %v1308_v19, 16  ;;  %v1299_v39 = vcombine.low %v1675_v8, %v1658_v2 }
  0x23   : > { %v648_v35 = vshll.u32 %v1792_v32, 16  ;;  %v1300_v43 = vcombine.low %v1661_v3, %v1664_v4  ;;  %v1301_v47 = vcombine.low %v1667_v5, %v517_v45  ;;  %v1318_v48 = vcombine.low %v738_v46, %v1740_v63  ;;  %v1566_v4 = vld [vmem:[%s1924_s1 + $0x40] sm:$0xff]  }
  0x24   : > { %1399 = vmatmul.mubr.msk.bf16.gmra.mrb[4].mxu1 %vm288_vm2, %v281_v38  ;;  %v637_v27 = vrot.slane %v635_v24, 1  ;;  %v1561_v38 = vld [vmem:[%s1655_s21 + $0x1c] ss:$0 sps:$4 sm:$0x11]   ;;  %v1325_v3 = vcombine.low %v1740_v63, %v1762_v21  ;;  %v1326_v52 = vcombine.low %v1765_v22, %v608_v29  ;;  %v748_v53 = vrot.slane %v1792_v32, 1 }
  0x25   : > { %1404 = vmatprep.mubr.msk.bf16.mxu1 %vm1599_vm0, %v1598_v1  ;;  %1419 = vmatmul.mubr.msk.bf16.vlgmr.msra.gmra.mrb[4].mxu0 %vm288_vm2, %v434_v41  ;;  %v650_v37 = vrot.slane %v648_v35, 1  ;;  %v652_v41 = vshrl.u32 %v1792_v32, 16  ;;  %v656_v42 = vshll.u32 %v1561_v38, 16  ;;  %v745_v49 = vrot.slane %v1318_v48, 1 }
  0x26   : > { %1445 = vmatpush3.bf16.msra.mxu0 %v1553_v36  ;;  %1422 = vmatprep.mubr.msk.bf16.mxu0 %vm1599_vm0, %v1598_v1  ;;  %v638_v13 = vor.u32 %v637_v27, %v633_v26  ;;  %v1327_v56 = vcombine.low %v1784_v30, %v830_v54  ;;  %v750_v57 = vrot.slane %v1561_v38, 1 }
  0x27   : > { %1472 = vmatprep.subr.bf16.mxu0 %v1598_v1  ;;  %v654_v2 = vor.u32 %v652_v41, %v650_v37  ;;  %v658_v8 = vrot.slane %v656_v42, 1 }
  0x28   : > { %v751_v60 = vsel %vm431_vm3, %v748_v53, %v750_v57 }
  0x29   : > { %v659_v44 = vsel %vm253_vm1, %v654_v2, %v658_v8 }
  0x2c   : > { %1405 = vmatmul.mubr.msk.bf16.vlgmr.msra.gmra.mrb[8].mxu1 %vm288_vm2, %v1682_v10  ;;  %v1776_v10 = vcombine.low %v1762_v21, %v1765_v22 }
  0x2d   : > { %1431 = vmatpush3.bf16.msra.mxu1 %v1552_v12  ;;  %1408 = vmatprep.mubr.msk.bf16.mxu1 %vm1599_vm0, %v1598_v1 }
  0x2e   : > { %1423 = vmatmul.mubr.msk.bf16.gmra.mrb[8].mxu0 %vm288_vm2, %v436_v18  ;;  %1458 = vmatprep.subr.bf16.mxu1 %v1598_v1  ;;  %v640_v28 = vshll.u32 %v1776_v10, 16  ;;  %v644_v34 = vshrl.u32 %v1776_v10, 16  ;;  %v746_v50 = vrot.slane %v1776_v10, 1 }
  0x2f   : > { %1426 = vmatprep.mubr.msk.bf16.mxu0 %vm1599_vm0, %v1598_v1 }
  0x30   : > { %v642_v31 = vrot.slane %v640_v28, 1  ;;  %v747_v5 = vsel %vm431_vm3, %v745_v49, %v746_v50  ;;  %v749_v55 = vsel %vm431_vm3, %v746_v50, %v748_v53 }
  0x32   : > { %v643_v33 = vsel %vm253_vm1, %v638_v13, %v642_v31  ;;  %v646_v36 = vor.u32 %v644_v34, %v642_v31 }
  0x34   : > { %1409 = vmatmul.mubr.msk.bf16.gmra.mrb[12].mxu1 %vm288_vm2, %v1671_v6  ;;  %v1558_v6 = vld [vmem:[%s1924_s1 + $0x30] sm:$0xff]   ;;  %v651_v40 = vsel %vm253_vm1, %v646_v36, %v650_v37 }
  0x35   : > { %1412 = vmatprep.mubr.msk.bf16.mxu1 %vm1599_vm0, %v1598_v1 }
  0x36   : > { %1427 = vmatmul.mubr.msk.bf16.gmra.mrb[12].mxu0 %vm288_vm2, %v438_v25 }
  0x37   : > { %1446 = vmatprep.mubr.msk.bf16.mxu0 %vm1599_vm0, %v1598_v1 }
  0x3c   : > { %1413 = vmatmul.mubr.msk.bf16.gmra.mrb[16].mxu1 %vm288_vm2, %v1679_v9  ;;  %v1557_v9 = vld [vmem:[%s1924_s1 + $0x28] sm:$0xff]  }
  0x3d   : > { %1432 = vmatprep.mubr.msk.bf16.mxu1 %vm1599_vm0, %v1598_v1 }
  0x3e   : > { %1447 = vmatmul.mubr.msk.bf16.vlgmr.msra.gmra.mrb[16].mxu0 %vm288_vm2, %v643_v33 }
  0x3f   : > { %1473 = vmatpush3.bf16.msra.mxu0 %v1558_v6  ;;  %1450 = vmatprep.mubr.msk.bf16.mxu0 %vm1599_vm0, %v1598_v1 }
  0x40   : > { %1500 = vmatprep.subr.bf16.mxu0 %v1598_v1 }
  0x44   : > { %1433 = vmatmul.mubr.msk.bf16.vlgmr.msra.gmra.mrb[20].mxu1 %vm288_vm2, %v1299_v39 }
  0x45   : > { %1459 = vmatpush3.bf16.msra.mxu1 %v1557_v9  ;;  %1436 = vmatprep.mubr.msk.bf16.mxu1 %vm1599_vm0, %v1598_v1 }
  0x46   : > { %1451 = vmatmul.mubr.msk.bf16.gmra.mrb[20].mxu0 %vm288_vm2, %v651_v40  ;;  %1486 = vmatprep.subr.bf16.mxu1 %v1598_v1 }
  0x47   : > { %1454 = vmatprep.mubr.msk.bf16.mxu0 %vm1599_vm0, %v1598_v1 }
  0x4c   : > { %1437 = vmatmul.mubr.msk.bf16.gmra.mrb[24].mxu1 %vm288_vm2, %v1300_v43 }
  0x4d   : > { %1440 = vmatprep.mubr.msk.bf16.mxu1 %vm1599_vm0, %v1598_v1 }
  0x4e   : > { %1455 = vmatmul.mubr.msk.bf16.gmra.mrb[24].mxu0 %vm288_vm2, %v659_v44 }
  0x4f   : > { %1474 = vmatprep.mubr.msk.bf16.mxu0 %vm1599_vm0, %v1598_v1 }
  0x54   : > { %1441 = vmatmul.mubr.msk.bf16.gmra.mrb[28].mxu1 %vm288_vm2, %v1301_v47 }
  0x55   : > { %1460 = vmatprep.mubr.msk.bf16.mxu1 %vm1599_vm0, %v1598_v1 }
  0x56   : > { %1475 = vmatmul.mubr.msk.bf16.vlgmr.msra.gmra.mrb[28].mxu0 %vm288_vm2, %v1325_v3 }
  0x57   : > { %1501 = vmatpush3.bf16.msra.mxu0 %v1566_v4  ;;  %1478 = vmatprep.mubr.msk.bf16.mxu0 %vm1599_vm0, %v1598_v1 }
  0x5c   : > { %1461 = vmatmul.mubr.msk.bf16.vlgmr.msra.gmra.mrb[32].mxu1 %vm288_vm2, %v747_v5 }
  0x5d   : > { %1487 = vmatpush3.bf16.msra.mxu1 %v1565_v51  ;;  %1464 = vmatprep.mubr.msk.bf16.mxu1 %vm1599_vm0, %v1598_v1 }
  0x5e   : > { %1479 = vmatmul.mubr.msk.bf16.gmra.mrb[32].mxu0 %vm288_vm2, %v1326_v52 }
  0x5f   : > { %1482 = vmatprep.mubr.msk.bf16.mxu0 %vm1599_vm0, %v1598_v1 }
  0x64   : > { %1465 = vmatmul.mubr.msk.bf16.gmra.mrb[36].mxu1 %vm288_vm2, %v749_v55 }
  0x65   : > { %1468 = vmatprep.mubr.msk.bf16.mxu1 %vm1599_vm0, %v1598_v1 }
  0x66   : > { %1483 = vmatmul.mubr.msk.bf16.gmra.mrb[36].mxu0 %vm288_vm2, %v1327_v56 }
  0x67   : > { %1502 = vmatprep.mubr.msk.bf16.mxu0 %vm1599_vm0, %v1598_v1 }
  0x6c   : > { %1469 = vmatmul.mubr.msk.bf16.gmra.mrb[40].mxu1 %vm288_vm2, %v751_v60 }
  0x6d   : > { %1488 = vmatprep.mubr.msk.bf16.mxu1 %vm1599_vm0, %v1598_v1 }
  0x6e   : > { %1503 = vmatmul.mubr.msk.bf16.vlgmr.msra.gmra.mrb[40].mxu0 %vm288_vm2, %v1733_v58 }
  0x6f   : > { %1506 = vmatprep.mubr.msk.bf16.mxu0 %vm1599_vm0, %v1598_v1 }
  0x74   : > { %1489 = vmatmul.mubr.msk.bf16.vlgmr.msra.gmra.mrb[44].mxu1 %vm288_vm2, %v1749_v16 }
  0x75   : > { %1492 = vmatprep.mubr.msk.bf16.mxu1 %vm1599_vm0, %v1598_v1 }
  0x76   : > { %1507 = vmatmul.mubr.msk.bf16.gmra.mrb[44].mxu0 %vm288_vm2, %v1736_v59 }
  0x77   : > { %1510 = vmatprep.mubr.msk.bf16.mxu0 %vm1599_vm0, %v1598_v1 }
  0x7c   : > { %1493 = vmatmul.mubr.msk.bf16.gmra.mrb[48].mxu1 %vm288_vm2, %v1752_v17 }
  0x7d   : > { %1496 = vmatprep.mubr.msk.bf16.mxu1 %vm1599_vm0, %v1598_v1 }
  0x7e   : > { %1511 = vmatmul.mubr.msk.bf16.gmra.mrb[48].mxu0 %vm288_vm2, %v1743_v11 }
  0x84   : > { %1497 = vmatmul.mubr.msk.bf16.gmra.mrb[52].mxu1 %vm288_vm2, %v1757_v20 }
  0xef   : > { %v340_v58 = vpop.f32.mrb[0].mxu1 }
  0xf0   : > { %v1396_v61 = vpop.f32.mrb[1].mxu1  ;;  %v332_v62 = vpop.f32.mrb[0].mxu0 }
  0xf1   : > { %v343_v63 = vpop.f32.mrb[2].mxu1  ;;  %v1392_v59 = vpop.f32.mrb[1].mxu0 }
  0xf2   : > { %v1397_v0 = vpop.f32.mrb[3].mxu1  ;;  %v335_v7 = vpop.f32.mrb[2].mxu0 }
  0xf3   : > { %v1393_v12 = vpop.f32.mrb[3].mxu0 }
  0xf7   : > { %v348_v14 = vpop.f32.mrb[4].mxu1 }
  0xf8   : > { %v1400_v15 = vpop.f32.mrb[5].mxu1  ;;  %v488_v16 = vpop.f32.mrb[4].mxu0 }
  0xf9   : > { %v351_v17 = vpop.f32.mrb[6].mxu1  ;;  %v1420_v18 = vpop.f32.mrb[5].mxu0 }
  0xfa   : > { %v1401_v1 = vpop.f32.mrb[7].mxu1  ;;  %v491_v19 = vpop.f32.mrb[6].mxu0 }
  0xfb   : > { %v1421_v21 = vpop.f32.mrb[7].mxu0 }
  0xff   : > { %v401_v11 = vpop.f32.mrb[8].mxu1 }
 0x100   : > { %v402_v22 = vadd.f32 %v401_v11, %v332_v62  ;;  %v1406_v23 = vpop.f32.mrb[9].mxu1 }
 0x101   : > { %v404_v20 = vpop.f32.mrb[10].mxu1  ;;  %v496_v10 = vpop.f32.mrb[8].mxu0 }
 0x102   : > { %v405_v24 = vadd.f32 %v404_v20, %v335_v7  ;;  %v1407_v25 = vpop.f32.mrb[11].mxu1  ;;  %v1424_v26 = vpop.f32.mrb[9].mxu0  ;;  %v511_v27 = vadd.f32 %v488_v16, %v402_v22 }
 0x103   : > { %v499_v28 = vpop.f32.mrb[10].mxu0 }
 0x104   : > { %v1425_v29 = vpop.f32.mrb[11].mxu0  ;;  %v512_v30 = vadd.f32 %v491_v19, %v405_v24 }
 0x107   : > { %v409_v13 = vpop.f32.mrb[12].mxu1 }
 0x108   : > { %v410_v31 = vadd.f32 %v409_v13, %v340_v58  ;;  %v1410_v32 = vpop.f32.mrb[13].mxu1 }
 0x109   : > { %v412_v33 = vpop.f32.mrb[14].mxu1  ;;  %v504_v6 = vpop.f32.mrb[12].mxu0 }
 0x10a   : > { %v413_v34 = vadd.f32 %v412_v33, %v343_v63  ;;  %v1411_v35 = vpop.f32.mrb[15].mxu1  ;;  %v1428_v36 = vpop.f32.mrb[13].mxu0  ;;  %v513_v37 = vadd.f32 %v496_v10, %v410_v31 }
 0x10b   : > { %v507_v38 = vpop.f32.mrb[14].mxu0 }
 0x10c   : > { %v1429_v39 = vpop.f32.mrb[15].mxu0  ;;  %v514_v9 = vadd.f32 %v499_v28, %v413_v34 }
 0x10f   : > { %v417_v40 = vpop.f32.mrb[16].mxu1 }
 0x110   : > { %v418_v41 = vadd.f32 %v417_v40, %v348_v14  ;;  %v1414_v42 = vpop.f32.mrb[17].mxu1 }
 0x111   : > { %v420_v2 = vpop.f32.mrb[18].mxu1  ;;  %v709_v8 = vpop.f32.mrb[16].mxu0 }
 0x112   : > { %v421_v43 = vadd.f32 %v420_v2, %v351_v17  ;;  %v1415_v44 = vpop.f32.mrb[19].mxu1  ;;  %v1448_v45 = vpop.f32.mrb[17].mxu0  ;;  %v515_v46 = vadd.f32 %v504_v6, %v418_v41 }
 0x113   : > { %v712_v47 = vpop.f32.mrb[18].mxu0 }
 0x114   : > { %v1449_v48 = vpop.f32.mrb[19].mxu0  ;;  %v516_v3 = vadd.f32 %v507_v38, %v421_v43 }
 0x117   : > { %v575_v4 = vpop.f32.mrb[20].mxu1 }
 0x118   : > { %v598_v49 = vadd.f32 %v575_v4, %v511_v27  ;;  %v1434_v50 = vpop.f32.mrb[21].mxu1 }
 0x119   : > { %v578_v5 = vpop.f32.mrb[22].mxu1  ;;  %v717_v51 = vpop.f32.mrb[20].mxu0 }
 0x11a   : > { %v599_v52 = vadd.f32 %v578_v5, %v512_v30  ;;  %v1435_v53 = vpop.f32.mrb[23].mxu1  ;;  %v1452_v54 = vpop.f32.mrb[21].mxu0  ;;  %v732_v55 = vadd.f32 %v709_v8, %v598_v49 }
 0x11b   : > { %v720_v56 = vpop.f32.mrb[22].mxu0 }
 0x11c   : > { %v1453_v57 = vpop.f32.mrb[23].mxu0  ;;  %v733_v60 = vadd.f32 %v712_v47, %v599_v52 }
 0x11f   : > { %v583_v58 = vpop.f32.mrb[24].mxu1 }
 0x120   : > { %v600_v61 = vadd.f32 %v583_v58, %v513_v37  ;;  %v1438_v62 = vpop.f32.mrb[25].mxu1 }
 0x121   : > { %v586_v63 = vpop.f32.mrb[26].mxu1  ;;  %v725_v59 = vpop.f32.mrb[24].mxu0 }
 0x122   : > { %v601_v0 = vadd.f32 %v586_v63, %v514_v9  ;;  %v1439_v7 = vpop.f32.mrb[27].mxu1  ;;  %v1456_v12 = vpop.f32.mrb[25].mxu0  ;;  %v734_v14 = vadd.f32 %v717_v51, %v600_v61 }
 0x123   : > { %v728_v15 = vpop.f32.mrb[26].mxu0 }
 0x124   : > { %v1457_v16 = vpop.f32.mrb[27].mxu0  ;;  %v735_v17 = vadd.f32 %v720_v56, %v601_v0 }
 0x127   : > { %v591_v18 = vpop.f32.mrb[28].mxu1 }
 0x128   : > { %v602_v1 = vadd.f32 %v591_v18, %v515_v46  ;;  %v1442_v19 = vpop.f32.mrb[29].mxu1 }
 0x129   : > { %v594_v21 = vpop.f32.mrb[30].mxu1  ;;  %v888_v11 = vpop.f32.mrb[28].mxu0 }
 0x12a   : > { %v603_v22 = vadd.f32 %v594_v21, %v516_v3  ;;  %v1443_v23 = vpop.f32.mrb[31].mxu1  ;;  %v1476_v20 = vpop.f32.mrb[29].mxu0  ;;  %v736_v10 = vadd.f32 %v725_v59, %v602_v1 }
 0x12b   : > { %v891_v24 = vpop.f32.mrb[30].mxu0 }
 0x12c   : > { %v1477_v25 = vpop.f32.mrb[31].mxu0  ;;  %v737_v26 = vadd.f32 %v728_v15, %v603_v22 }
 0x12f   : > { %v801_v27 = vpop.f32.mrb[32].mxu1 }
 0x130   : > { %v824_v28 = vadd.f32 %v801_v27, %v732_v55  ;;  %v1462_v29 = vpop.f32.mrb[33].mxu1 }
 0x131   : > { %v804_v30 = vpop.f32.mrb[34].mxu1  ;;  %v896_v13 = vpop.f32.mrb[32].mxu0 }
 0x132   : > { %v825_v31 = vadd.f32 %v804_v30, %v733_v60  ;;  %v1463_v32 = vpop.f32.mrb[35].mxu1  ;;  %v1480_v33 = vpop.f32.mrb[33].mxu0  ;;  %v911_v6 = vadd.f32 %v888_v11, %v824_v28  ;;  %v1349_v60 = vld [vmem:[%s1925_s2] ss:$0 sm:$0xff] }
 0x133   : > { %v899_v34 = vpop.f32.mrb[34].mxu0 }
 0x134   : > { %v1481_v35 = vpop.f32.mrb[35].mxu0  ;;  %v912_v36 = vadd.f32 %v891_v24, %v825_v31 }
 0x137   : > { %v809_v37 = vpop.f32.mrb[36].mxu1 }
 0x138   : > { %v826_v38 = vadd.f32 %v809_v37, %v734_v14  ;;  %v1466_v39 = vpop.f32.mrb[37].mxu1 }
 0x139   : > { %v812_v9 = vpop.f32.mrb[38].mxu1  ;;  %v904_v40 = vpop.f32.mrb[36].mxu0 }
 0x13a   : > { %v827_v41 = vadd.f32 %v812_v9, %v735_v17  ;;  %v1467_v42 = vpop.f32.mrb[39].mxu1  ;;  %v1484_v2 = vpop.f32.mrb[37].mxu0  ;;  %v913_v8 = vadd.f32 %v896_v13, %v826_v38 }
 0x13b   : > { %v907_v43 = vpop.f32.mrb[38].mxu0 }
 0x13c   : > { %v1485_v44 = vpop.f32.mrb[39].mxu0  ;;  %v914_v45 = vadd.f32 %v899_v34, %v827_v41 }
 0x13f   : > { %v817_v46 = vpop.f32.mrb[40].mxu1 }
 0x140   : > { %v828_v47 = vadd.f32 %v817_v46, %v736_v10  ;;  %v1470_v48 = vpop.f32.mrb[41].mxu1 }
 0x141   : > { %v820_v3 = vpop.f32.mrb[42].mxu1  ;;  %v1114_v4 = vpop.f32.mrb[40].mxu0 }
 0x142   : > { %v829_v49 = vadd.f32 %v820_v3, %v737_v26  ;;  %v1471_v50 = vpop.f32.mrb[43].mxu1  ;;  %v1504_v5 = vpop.f32.mrb[41].mxu0  ;;  %v915_v51 = vadd.f32 %v904_v40, %v828_v47 }
 0x143   : > { %v1117_v52 = vpop.f32.mrb[42].mxu0 }
 0x144   : > { %v1505_v53 = vpop.f32.mrb[43].mxu0  ;;  %v916_v54 = vadd.f32 %v907_v43, %v829_v49 }
 0x147   : > { %v1022_v55 = vpop.f32.mrb[44].mxu1 }
 0x148   : > { %v1045_v56 = vadd.f32 %v1022_v55, %v911_v6  ;;  %v1490_v57 = vpop.f32.mrb[45].mxu1 }
 0x149   : > { %v1025_v58 = vpop.f32.mrb[46].mxu1  ;;  %v1122_v61 = vpop.f32.mrb[44].mxu0 }
 0x14a   : > { %v1137_v62 = vadd.f32 %v1114_v4, %v1045_v56  ;;  %v1046_v63 = vadd.f32 %v1025_v58, %v912_v36  ;;  %v1491_v59 = vpop.f32.mrb[47].mxu1  ;;  %v1508_v0 = vpop.f32.mrb[45].mxu0 }
 0x14b   : > { %v1125_v7 = vpop.f32.mrb[46].mxu0 }
 0x14c   : > { %v1150_v12 = vadd.f32 %v1349_v60, %v1137_v62  ;;  %v1138_v14 = vadd.f32 %v1117_v52, %v1046_v63  ;;  %v1509_v15 = vpop.f32.mrb[47].mxu0 }
 0x14e   : > { %1156 = vst.msk [vmem:[%s1900_s20] sm:$0xff] %vm288_vm2, %v1150_v12  ;;  %v1151_v16 = vadd.f32 %v1349_v60, %v1138_v14 }
 0x14f   : > { %v1030_v17 = vpop.f32.mrb[48].mxu1 }
 0x150   : > { %1157 = vst.msk [vmem:[%s1900_s20 + $0x8] sm:$0xff] %vm288_vm2, %v1151_v16  ;;  %v1047_v18 = vadd.f32 %v1030_v17, %v913_v8  ;;  %v1494_v1 = vpop.f32.mrb[49].mxu1 }
 0x151   : > { %v1033_v19 = vpop.f32.mrb[50].mxu1  ;;  %v1130_v21 = vpop.f32.mrb[48].mxu0 }
 0x152   : > { %v1139_v11 = vadd.f32 %v1122_v61, %v1047_v18  ;;  %v1048_v22 = vadd.f32 %v1033_v19, %v914_v45  ;;  %v1495_v23 = vpop.f32.mrb[51].mxu1  ;;  %v1512_v20 = vpop.f32.mrb[49].mxu0 }
 0x153   : > { %v1133_v10 = vpop.f32.mrb[50].mxu0 }
 0x154   : > { %v1152_v24 = vadd.f32 %v1349_v60, %v1139_v11  ;;  %v1140_v25 = vadd.f32 %v1125_v7, %v1048_v22  ;;  %v1513_v26 = vpop.f32.mrb[51].mxu0 }
 0x156   : > { %1158 = vst.msk [vmem:[%s1900_s20 + $0x10] sm:$0xff] %vm288_vm2, %v1152_v24  ;;  %v1153_v27 = vadd.f32 %v1349_v60, %v1140_v25 }
 0x157   : > { %v1038_v28 = vpop.f32.mrb[52].mxu1 }
 0x158   : > { %1159 = vst.msk [vmem:[%s1900_s20 + $0x18] sm:$0xff] %vm288_vm2, %v1153_v27  ;;  %v1049_v29 = vadd.f32 %v1038_v28, %v915_v51  ;;  %v1498_v30 = vpop.f32.mrb[53].mxu1 }
 0x159   : > { %v1041_v13 = vpop.f32.mrb[54].mxu1 }
 0x15a   : > { %v1141_v31 = vadd.f32 %v1130_v21, %v1049_v29  ;;  %v1050_v32 = vadd.f32 %v1041_v13, %v916_v54  ;;  %v1499_v33 = vpop.f32.mrb[55].mxu1 }
 0x15c   : > { %v1154_v6 = vadd.f32 %v1349_v60, %v1141_v31  ;;  %v1142_v34 = vadd.f32 %v1133_v10, %v1050_v32 }
 0x15e   : > { %1160 = vst.msk [vmem:[%s1900_s20 + $0x20] sm:$0xff] %vm288_vm2, %v1154_v6  ;;  %v1155_v35 = vadd.f32 %v1349_v60, %v1142_v34 }
 0x160   : > { %1161 = vst.msk [vmem:[%s1900_s20 + $0x28] sm:$0xff] %vm288_vm2, %v1155_v35 }
 0x161 PF: > { %s13_s14 = sadd.s32 1, %s1596_s14   ;;  %s1927_s12 = smov %s1592_s13 }
 0x162   : > { %p10_p5 = scmp.ge.s32.totalorder %s13_s14, 4   ;;  %s1928_s13 = smov %s1930_s15 }
 0x164   :  { %12 = sbr.rel (!%p10_p5) target bundleno = 2 (0x2), region = 76 }

// kernel: conv_mha_forward.4
= control target key start
LH: loop header
LB: loop body
LE: loop exit
PB: predicated region body
PF: predicated region fallthrough
CT: control target
= control target key end

     0   :  { %s3103_s12 = smov 0   ;;  %s3105_s13 = smov 0   ;;  %s4399_s0 = inlined_call_operand.vmem [shape: bf16[2,64,16], index: 0, kind: input, shape index: {}]   ;;  %s4400_s1 = inlined_call_operand.vmem [shape: bf16[2,64,16], index: 1, kind: input, shape index: {}]   ;;  %s4401_s2 = inlined_call_operand.vmem [shape: bf16[2,64,16], index: 2, kind: input, shape index: {}]   ;;  %s4402_s3 = inlined_call_operand.vmem [shape: bf16[2,64,16], index: 3, kind: output, shape index: {}]  }
   0x1   :  { %s3107_s14 = smov 0  }
   0x2 LB: > { %s32_s15 = sadd.s32 1, %s3068_s13  ;;  %p2571_p0 = scmp.ge.s32.totalorder %s3072_s14, 1  ;;  %s3072_s14 = sphi %s3107_s14, %s13_s14   ;;  %s3068_s13 = sphi %s3105_s13, %s4601_s13   ;;  %s3064_s12 = sphi %s3103_s12, %s4600_s12  }
   0x3   : > { %p34_p1 = scmp.ge.s32.totalorder %s32_s15, 2  ;;  %p199_p2 = scmp.lt.s32.totalorder %s3072_s14, 3 }
   0x5   : > { %s4603_s15 = smov (%p34_p1, %s32_s15), 0  ;;  %p200_p3 = pnand %p2571_p0, %p199_p2 }
   0x7   : > { %203 = sbr.rel (%p200_p3) target bundleno = 2583 (0xa17), region = 32 }
   0xe   : > { %p250_p4 = scmp.lt.s32.totalorder %s3064_s12, 1  ;;  %vm408_vm0 = vcmask 31744   ;;  %vm294_vm1 = vcmask 7168   ;;  %v3074_v12 = vmov -inf   ;;  %vm506_vm2 = vcmask 523264   ;;  %s3076_s23 = smov 124  }
   0xf   : > { %297 = vst.msk [vmem:[#allocation2 + $0x10] sm:$0xff] %vm294_vm1, %v3074_v12  ;;  %295 = vst.msk [vmem:[#allocation2] sm:$0xff] %vm294_vm1, %v3074_v12  ;;  %v3075_v29 = vmov 0   ;;  %s3077_s27 = smov 120   ;;  %s3078_s28 = smov 116   ;;  %vm327_vm3 = vcmask 130048  }
  0x10   : > { %s4605_s12 = smov (!%p250_p4, %s3064_s12), 1  ;;  %296 = vst.msk [vmem:[#allocation2 + $0x8] sm:$0xff] %vm294_vm1, %v3074_v12  ;;  %298 = vst.msk [vmem:[#allocation2 + $0x18] sm:$0xff] %vm294_vm1, %v3074_v12  ;;  %2887 = vset.pattern.permute.xlu0 %v3075_v29  ;;  %2888 = vset.pattern.permute.xlu1 %v3075_v29  ;;  %s3080_s29 = smov 4   ;;  %vm1284_vm4 = vcmask 64544   ;;  %vm1780_vm5 = vcmask 97344  }
  0x11   : > { %s3121_s16 = sshll.u32 %s4605_s12, 5  ;;  %299 = vst.msk [vmem:[#allocation2 + $0x20] sm:$0xff] %vm294_vm1, %v3074_v12  ;;  %300 = vst.msk [vmem:[#allocation2 + $0x28] sm:$0xff] %vm294_vm1, %v3074_v12  ;;  %s3081_s30 = smov 8   ;;  %vm2276_vm6 = vcmask 130144   ;;  %vm2432_vm7 = vcmask 125952  }
  0x12   : > { %s3127_s19 = scalar_lea.vmem %s4400_s1, %s3121_s16  ;;  %s257_s22 = scalar_lea.vmem %s4399_s0, %s3121_s16  ;;  %301 = vst.msk [vmem:[#allocation2 + $0x30] sm:$0xff] %vm294_vm1, %v3074_v12  ;;  %302 = vst.msk [vmem:[#allocation2 + $0x38] sm:$0xff] %vm294_vm1, %v3074_v12 }
  0x13   : > { %v3130_v0 = vld [vmem:[%s3127_s19] sm:$0xff]   ;;  %v3133_v1 = vld [vmem:[%s3127_s19 + $0x8] sm:$0xff]   ;;  %v3152_v5 = vld [vmem:[%s3127_s19 + $0x10] sm:$0xff]   ;;  %303 = vst.msk [vmem:[#allocation2 + $0x40] sm:$0xff] %vm294_vm1, %v3074_v12  ;;  %s3288_s26 = scalar_lea.vmem %s4401_s2, %s3121_s16  ;;  %s3082_s4 = smov 12  }
  0x14   : > { %2838 = vmatprep.subr.msk.bf16.mxu0 %vm408_vm0, %v3130_v0  ;;  %v422_v2 = vsel %vm408_vm0, %v3130_v0, 0  ;;  %v3145_v3 = vld [vmem:[%s257_s22] sm:$0xff]   ;;  %v425_v4 = vsel %vm408_vm0, %v3133_v1, 0  ;;  %v428_v6 = vsel %vm408_vm0, %v3152_v5, 0  ;;  %v3159_v7 = vld [vmem:[%s3127_s19 + $0x18] sm:$0xff]   ;;  %v3165_v9 = vld [vmem:[%s257_s22 + $0x8] sm:$0xff]   ;;  %s4366_s7 = scalar_lea.vmem %s4402_s3, %s3121_s16 }
  0x15   : > { %2711 = vmatpush3.bf16.xpose.msra.mxu0 %v422_v2  ;;  %2718 = vmatprep.mubr.msk.bf16.mxu0 %vm408_vm0, %v3145_v3  ;;  %v431_v8 = vsel %vm408_vm0, %v3159_v7, 0  ;;  %v3167_v10 = vld [vmem:[%s257_s22 + $0x10] sm:$0xff]   ;;  %v3173_v11 = vld [vmem:[%s257_s22 + $0x18] sm:$0xff]   ;;  %304 = vst.msk [vmem:[#allocation2 + $0x48] sm:$0xff] %vm294_vm1, %v3074_v12  ;;  %305 = vst.msk [vmem:[#allocation2 + $0x50] sm:$0xff] %vm294_vm1, %v3074_v12 }
  0x16   : > { %2839 = vmatprep.subr.msk.bf16.mxu0 %vm408_vm0, %v3133_v1  ;;  %306 = vst.msk [vmem:[#allocation2 + $0x58] sm:$0xff] %vm294_vm1, %v3074_v12  ;;  %307 = vst.msk [vmem:[#allocation2 + $0x60] sm:$0xff] %vm294_vm1, %v3074_v12  ;;  %v3241_v30 = vld [vmem:[#allocation2 + $0x10] sm:$0xff]  ;;  %v3243_v31 = vld [vmem:[#allocation2] sm:$0xff] }
  0x17   : > { %308 = vst.msk [vmem:[#allocation2 + $0x68] sm:$0xff] %vm294_vm1, %v3074_v12  ;;  %309 = vst.msk [vmem:[#allocation2 + $0x70] sm:$0xff] %vm294_vm1, %v3074_v12  ;;  %v3251_v36 = vld [vmem:[#allocation2 + $0x18] sm:$0xff]  ;;  %v3258_v38 = vld [vmem:[#allocation2 + $0x8] sm:$0xff] }
  0x18   : > { %310 = vst.msk [vmem:[#allocation2 + $0x78] sm:$0xff] %vm294_vm1, %v3074_v12  ;;  %311 = vst.msk [vmem:[#allocation2 + $0x80] sm:$0xff] %vm294_vm1, %v3074_v12  ;;  %v3275_v45 = vld [vmem:[#allocation2 + $0x20] sm:$0xff]  ;;  %v3290_v48 = vld [vmem:[#allocation2 + $0x28] sm:$0xff] }
  0x19   : > { %312 = vst.msk [vmem:[#allocation2 + $0x88] sm:$0xff] %vm294_vm1, %v3074_v12  ;;  %313 = vst.msk [vmem:[#allocation2 + $0x90] sm:$0xff] %vm294_vm1, %v3074_v12  ;;  %v3295_v50 = vld [vmem:[#allocation2 + $0x30] sm:$0xff]  ;;  %v3298_v51 = vld [vmem:[%s3288_s26] sm:$0xff]  }
  0x1a   : > { %314 = vst.msk [vmem:[#allocation2 + $0x98] sm:$0xff] %vm294_vm1, %v3074_v12  ;;  %315 = vst.msk [vmem:[#allocation2 + $0xa0] sm:$0xff] %vm294_vm1, %v3074_v12  ;;  %v3310_v56 = vld [vmem:[#allocation2 + $0x38] sm:$0xff]  ;;  %2726 = vmatprep.subr.bf16.mxu1 %v3298_v51  ;;  %v3314_v57 = vld [vmem:[%s3288_s26 + $0x8] sm:$0xff]  }
  0x1b   : > { %316 = vst.msk [vmem:[#allocation2 + $0xa8] sm:$0xff] %vm294_vm1, %v3074_v12  ;;  %317 = vst.msk [vmem:[#allocation2 + $0xb0] sm:$0xff] %vm294_vm1, %v3074_v12  ;;  %2727 = vmatpush3.bf16.msra.mxu1 %v3298_v51  ;;  %v3336_v63 = vld [vmem:[%s3288_s26 + $0x10] sm:$0xff]   ;;  %v3459_v61 = vld [vmem:[#allocation2 + $0x40] sm:$0xff] }
  0x1c   : > { %318 = vst.msk [vmem:[#allocation2 + $0xb8] sm:$0xff] %vm294_vm1, %v3074_v12  ;;  %319 = vst.msk [vmem:[#allocation2 + $0xc0] sm:$0xff] %vm294_vm1, %v3074_v12  ;;  %2728 = vmatprep.subr.bf16.mxu1 %v3314_v57  ;;  %v3461_v2 = vld [vmem:[#allocation2 + $0x48] sm:$0xff] }
  0x1d   : > { %2713 = vmatpush3.bf16.xpose.msra.mxu0 %v425_v4  ;;  %320 = vst.msk [vmem:[#allocation2 + $0xc8] sm:$0xff] %vm294_vm1, %v3074_v12  ;;  %321 = vst.msk [vmem:[#allocation2 + $0xd0] sm:$0xff] %vm294_vm1, %v3074_v12  ;;  %v3348_v4 = vld [vmem:[%s3288_s26 + $0x18] sm:$0xff]  }
  0x1e   : > { %2840 = vmatprep.subr.msk.bf16.mxu0 %vm408_vm0, %v3152_v5  ;;  %322 = vst.msk [vmem:[#allocation2 + $0xd8] sm:$0xff] %vm294_vm1, %v3074_v12  ;;  %323 = vst.msk [vmem:[#allocation2 + $0xe0] sm:$0xff] %vm294_vm1, %v3074_v12  ;;  %v3466_v44 = vld [vmem:[#allocation2 + $0x58] sm:$0xff] }
  0x1f   : > { %324 = vst.msk [vmem:[#allocation2 + $0xe8] sm:$0xff] %vm294_vm1, %v3074_v12  ;;  %325 = vst.msk [vmem:[#allocation2 + $0xf0] sm:$0xff] %vm294_vm1, %v3074_v12  ;;  %2729 = vmatpush3.bf16.msra.mxu1 %v3314_v57 }
  0x20   : > { %326 = vst.msk [vmem:[#allocation2 + $0xf8] sm:$0xff] %vm294_vm1, %v3074_v12  ;;  %4448 = vst [vmem:[#allocation5_spill] sm:$0xff] %v3241_v30  ;;  %2730 = vmatprep.subr.bf16.mxu1 %v3336_v63 }
  0x21   : > { %4450 = vst [vmem:[#allocation7_spill] sm:$0xff] %v3275_v45  ;;  %4452 = vst [vmem:[#allocation9_spill] sm:$0xff] %v3295_v50 }
  0x22   : > { %4453 = vst [vmem:[#allocation10_spill] sm:$0xff] %v3310_v56  ;;  %4463 = vst [vmem:[#allocation20_spill] sm:$0xff] %v3459_v61 }
  0x23   : > { %2731 = vmatpush3.bf16.msra.mxu1 %v3336_v63  ;;  %4464 = vst [vmem:[#allocation21_spill] sm:$0xff] %v3461_v2  ;;  %4466 = vst [vmem:[#allocation23_spill] sm:$0xff] %v3466_v44 }
  0x24   : > { %2732 = vmatprep.subr.bf16.mxu1 %v3348_v4 }
  0x25   : > { %2715 = vmatpush3.bf16.xpose.msra.mxu0 %v428_v6 }
  0x26   : > { %2841 = vmatprep.subr.msk.bf16.mxu0 %vm408_vm0, %v3159_v7 }
  0x27   : > { %2733 = vmatpush3.bf16.msra.mxu1 %v3348_v4 }
  0x2d   : > { %2717 = vmatpush3.bf16.xpose.msra.mxu0 %v431_v8 }
  0x34   : > { %2719 = vmatmul.mubr.msk.bf16.vlgmr.msra.gmra.mrb[0].mxu0 %vm408_vm0, %v3165_v9 }
  0x35   : > { %2722 = vmatprep.mubr.msk.bf16.mxu0 %vm408_vm0, %v3167_v10 }
  0x3c   : > { %2723 = vmatmul.mubr.msk.bf16.gmra.mrb[4].mxu0 %vm408_vm0, %v3173_v11 }
 0x107   : > { %v3209_v13 = vpop.f32.mrb[0].mxu0 }
 0x108   : > { %v3211_v14 = vpop.f32.mrb[1].mxu0  ;;  %v513_v15 = vsel %vm506_vm2, %v3209_v13, -inf }
 0x109   : > { %514 = vmax.xlane.f32.xlu1 %v513_v15  ;;  %v3215_v16 = vpop.f32.mrb[2].mxu0  ;;  %v507_v17 = vsel %vm506_vm2, %v3211_v14, -inf }
 0x10a   : > { %508 = vmax.xlane.f32.xlu0 %v507_v17  ;;  %v3219_v18 = vpop.f32.mrb[3].mxu0  ;;  %v516_v19 = vsel %vm506_vm2, %v3215_v16, -inf }
 0x10b   : > { %v510_v20 = vsel %vm506_vm2, %v3219_v18, -inf }
 0x10d   : > { %517 = vmax.xlane.f32.xlu1 %v516_v19 }
 0x10e   : > { %511 = vmax.xlane.f32.xlu0 %v510_v20 }
 0x10f   : > { %v3225_v21 = vpop.f32.mrb[4].mxu0 }
 0x110   : > { %v3227_v22 = vpop.f32.mrb[5].mxu0  ;;  %v525_v27 = vsel %vm506_vm2, %v3225_v21, -inf }
 0x111   : > { %v3229_v23 = vpop.f32.mrb[6].mxu0  ;;  %v519_v24 = vsel %vm506_vm2, %v3227_v22, -inf }
 0x112   : > { %520 = vmax.xlane.f32.xlu0 %v519_v24  ;;  %v3233_v25 = vpop.f32.mrb[7].mxu0  ;;  %v528_v28 = vsel %vm506_vm2, %v3229_v23, -inf }
 0x113   : > { %v522_v26 = vsel %vm506_vm2, %v3233_v25, -inf }
 0x114   : > { %523 = vmax.xlane.f32.xlu1 %v522_v26 }
 0x116   : > { %526 = vmax.xlane.f32.xlu0 %v525_v27 }
 0x118   : > { %529 = vmax.xlane.f32.xlu1 %v528_v28 }
 0x196   : > { %v515_v32 = vpop.xlane.xlu1 %514 }
 0x197   : > { %v3246_v33 = vmax.f32 %v3241_v30, %v515_v32  ;;  %v509_v34 = vpop.xlane.xlu0 %508  ;;  %v3712_v30 = vld [vmem:[#allocation2 + $0xb0] sm:$0xff] }
 0x198   : > { %v3249_v35 = vmax.f32 %v3243_v31, %v509_v34 }
 0x199   : > { %4449 = vst [vmem:[#allocation6_spill] sm:$0xff] %v3246_v33  ;;  %863 = vst.msk [vmem:[#allocation2 + $0x10] sm:$0xff] %vm294_vm1, %v3246_v33  ;;  %575 = vperm.xlu1 %2888, %v3246_v33  }
 0x19a   : > { %861 = vst.msk [vmem:[#allocation2] sm:$0xff] %vm294_vm1, %v3249_v35  ;;  %v518_v40 = vpop.xlane.xlu1 %517  ;;  %565 = vperm.xlu0 %2887, %v3249_v35  }
 0x19b   : > { %v3266_v41 = vmax.f32 %v3251_v36, %v518_v40  ;;  %v512_v42 = vpop.xlane.xlu0 %511 }
 0x19c   : > { %v3269_v43 = vmax.f32 %v3258_v38, %v512_v42 }
 0x19d   : > { %864 = vst.msk [vmem:[#allocation2 + $0x18] sm:$0xff] %vm294_vm1, %v3266_v41 }
 0x19e   : > { %862 = vst.msk [vmem:[#allocation2 + $0x8] sm:$0xff] %vm294_vm1, %v3269_v43  ;;  %570 = vperm.xlu1 %2888, %v3269_v43   ;;  %879 = vrot.lane.b32.xlu0 %v3133_v1, %s3076_s23 }
 0x19f   : > { %v521_v47 = vpop.xlane.xlu0 %520 }
 0x1a0   : > { %v3293_v49 = vmax.f32 %v3275_v45, %v521_v47 }
 0x1a1   : > { %v524_v52 = vpop.xlane.xlu1 %523 }
 0x1a2   : > { %4451 = vst [vmem:[#allocation8_spill] sm:$0xff] %v3293_v49  ;;  %865 = vst.msk [vmem:[#allocation2 + $0x20] sm:$0xff] %vm294_vm1, %v3293_v49  ;;  %v3305_v54 = vmax.f32 %v3290_v48, %v524_v52  ;;  %580 = vperm.xlu1 %2888, %v3266_v41   ;;  %883 = vrot.lane.b32.xlu0 %v3159_v7, %s3076_s23 }
 0x1a3   : > { %v527_v55 = vpop.xlane.xlu0 %526 }
 0x1a4   : > { %866 = vst.msk [vmem:[#allocation2 + $0x28] sm:$0xff] %vm294_vm1, %v3305_v54  ;;  %v3321_v59 = vmax.f32 %v3295_v50, %v527_v55 }
 0x1a5   : > { %v530_v60 = vpop.xlane.xlu1 %529 }
 0x1a6   : > { %4454 = vst [vmem:[#allocation11_spill] sm:$0xff] %v3321_v59  ;;  %867 = vst.msk [vmem:[#allocation2 + $0x30] sm:$0xff] %vm294_vm1, %v3321_v59  ;;  %v3330_v62 = vmax.f32 %v3310_v56, %v530_v60  ;;  %595 = vperm.xlu1 %2888, %v3321_v59   ;;  %871 = vrot.lane.b32.xlu0 %v3165_v9, %s3076_s23  ;;  %v3666_v56 = vld [vmem:[#allocation2 + $0x98] sm:$0xff] }
 0x1a7   : > { %4482 = vst [vmem:[#allocation39_spill] sm:$0xff] %v3666_v56 }
 0x1a8   : > { %4455 = vst [vmem:[#allocation12_spill] sm:$0xff] %v3330_v62  ;;  %868 = vst.msk [vmem:[#allocation2 + $0x38] sm:$0xff] %vm294_vm1, %v3330_v62 }
 0x1aa   : > { %585 = vperm.xlu1 %2888, %v3293_v49   ;;  %875 = vrot.lane.b32.xlu0 %v3173_v11, %s3076_s23  ;;  %v3661_v49 = vld [vmem:[#allocation2 + $0x88] sm:$0xff] }
 0x1ab   : > { %4480 = vst [vmem:[#allocation37_spill] sm:$0xff] %v3661_v49 }
 0x1ae   : > { %600 = vperm.xlu1 %2888, %v3330_v62  }
 0x1b2   : > { %590 = vperm.xlu1 %2888, %v3305_v54  }
 0x1b6   : > { %877 = vrot.lane.b32.xlu1 %v3130_v0, %s3076_s23 }
 0x1ba   : > { %881 = vrot.lane.b32.xlu1 %v3152_v5, %s3076_s23 }
 0x1be   : > { %869 = vrot.lane.b32.xlu1 %v3145_v3, %s3076_s23 }
 0x1c2   : > { %873 = vrot.lane.b32.xlu1 %v3167_v10, %s3076_s23 }
 0x218   : > { %v576_v6 = vpop.permute.xlu1 %575 }
 0x219   : > { %v566_v8 = vpop.permute.xlu0 %565  ;;  %v605_v15 = vsub.f32 %v3209_v13, %v576_v6 }
 0x21a   : > { %v603_v12 = vsub.f32 %v3211_v14, %v566_v8 }
 0x21b   : > { %v615_v26 = vmul.f32 1.442695, %v605_v15 }
 0x21c   : > { %v611_v17 = vmul.f32 1.442695, %v603_v12 }
 0x21d   : > { %v571_v19 = vpop.permute.xlu1 %570 }
 0x21e   : > { %v604_v20 = vsub.f32 %v3219_v18, %v571_v19  ;;  %2901 = vpow2.f32 %v611_v17  ;;  %v880_v17 = vpop.permute.xlu0 %879 }
 0x220   : > { %v613_v24 = vmul.f32 1.442695, %v604_v20 }
 0x221   : > { %v581_v27 = vpop.permute.xlu1 %580 }
 0x222   : > { %2903 = vpow2.f32 %v613_v24  ;;  %v606_v28 = vsub.f32 %v3215_v16, %v581_v27 }
 0x223   : > { %2905 = vpow2.f32 %v615_v26 }
 0x224   : > { %v617_v29 = vmul.f32 1.442695, %v606_v28 }
 0x225   : > { %v596_v32 = vpop.permute.xlu1 %595 }
 0x226   : > { %2907 = vpow2.f32 %v617_v29  ;;  %v609_v34 = vsub.f32 %v3225_v21, %v596_v32 }
 0x228   : > { %v3368_v40 = vpop.eup %2901  ;;  %v623_v42 = vmul.f32 1.442695, %v609_v34 }
 0x229   : > { %v586_v14 = vpop.permute.xlu1 %585 }
 0x22a   : > { %v607_v18 = vsub.f32 %v3227_v22, %v586_v14  ;;  %2909 = vpow2.f32 %v623_v42  ;;  %v884_v42 = vpop.permute.xlu0 %883 }
 0x22c   : > { %v3370_v13 = vpop.eup %2903  ;;  %v619_v6 = vmul.f32 1.442695, %v607_v18  ;;  %v907_v18 = vsel %vm408_vm0, %v884_v42, 0 }
 0x22d   : > { %v601_v47 = vpop.permute.xlu1 %600  ;;  %v651_v52 = vpack.c.bf16 %v3370_v13, %v3368_v40  ;;  %v3376_v55 = vpop.eup %2905 }
 0x22e   : > { %v610_v16 = vsub.f32 %v3229_v23, %v601_v47  ;;  %v872_v47 = vpop.permute.xlu0 %871 }
 0x22f   : > { %2734 = vmatprep.mubr.msk.bf16.mxu1 %vm506_vm2, %v651_v52 }
 0x230   : > { %v3379_v60 = vpop.eup %2907  ;;  %v625_v21 = vmul.f32 1.442695, %v610_v16 }
 0x231   : > { %v591_v8 = vpop.permute.xlu1 %590  ;;  %v652_v12 = vpack.c.bf16 %v3379_v60, %v3376_v55 }
 0x232   : > { %2911 = vpow2.f32 %v625_v21  ;;  %v608_v22 = vsub.f32 %v3233_v25, %v591_v8  ;;  %v901_v25 = vsel %vm408_vm0, %v880_v17, 0  ;;  %v876_v16 = vpop.permute.xlu0 %875 }
 0x233   : > { %2735 = vmatmul.mubr.msk.bf16.vlgmr.msra.gmra.mrb[0].mxu1 %vm506_vm2, %v652_v12  ;;  %2913 = vpow2.f32 %v619_v6 }
 0x234   : > { %v621_v15 = vmul.f32 1.442695, %v608_v22  ;;  %v3388_v20 = vpop.eup %2909 }
 0x235   : > { %v878_v23 = vpop.permute.xlu1 %877 }
 0x236   : > { %2915 = vpow2.f32 %v621_v15  ;;  %2842 = vmatprep.subr.msk.bf16.mxu1 %vm408_vm0, %v878_v23  ;;  %v898_v19 = vsel %vm408_vm0, %v878_v23, 0 }
 0x237   : > { %2743 = vmatpush3.bf16.xpose.msra.mxu1 %v898_v19 }
 0x238   : > { %2843 = vmatprep.subr.msk.bf16.mxu1 %vm408_vm0, %v880_v17 }
 0x239   : > { %v882_v27 = vpop.permute.xlu1 %881 }
 0x23a   : > { %v904_v14 = vsel %vm408_vm0, %v882_v27, 0 }
 0x23c   : > { %v3390_v24 = vpop.eup %2911 }
 0x23d   : > { %v654_v26 = vpack.c.bf16 %v3390_v24, %v3388_v20  ;;  %v3395_v28 = vpop.eup %2913  ;;  %v870_v34 = vpop.permute.xlu1 %869 }
 0x23f   : > { %2745 = vmatpush3.bf16.xpose.msra.mxu1 %v901_v25 }
 0x240   : > { %v3397_v29 = vpop.eup %2915  ;;  %2844 = vmatprep.subr.msk.bf16.mxu1 %vm408_vm0, %v882_v27 }
 0x241   : > { %v653_v32 = vpack.c.bf16 %v3397_v29, %v3395_v28  ;;  %v874_v52 = vpop.permute.xlu1 %873 }
 0x243   : > { %2738 = vmatprep.mubr.msk.bf16.mxu1 %vm506_vm2, %v653_v32 }
 0x244   : > { %2739 = vmatmul.mubr.msk.bf16.gmra.mrb[4].mxu1 %vm506_vm2, %v654_v26 }
 0x245   : > { %2750 = vmatprep.mubr.msk.bf16.mxu1 %vm408_vm0, %v870_v34 }
 0x247   : > { %2747 = vmatpush3.bf16.xpose.msra.mxu1 %v904_v14 }
 0x248   : > { %2845 = vmatprep.subr.msk.bf16.mxu1 %vm408_vm0, %v884_v42 }
 0x24f   : > { %2749 = vmatpush3.bf16.xpose.msra.mxu1 %v907_v18 }
 0x256   : > { %2751 = vmatmul.mubr.msk.bf16.vlgmr.msra.gmra.mrb[8].mxu1 %vm408_vm0, %v872_v47 }
 0x257   : > { %2754 = vmatprep.mubr.msk.bf16.mxu1 %vm408_vm0, %v874_v52 }
 0x25e   : > { %2755 = vmatmul.mubr.msk.bf16.gmra.mrb[12].mxu1 %vm408_vm0, %v876_v16 }
 0x306   : > { %v3411_v21 = vpop.f32.mrb[0].mxu1 }
 0x307   : > { %4456 = vst [vmem:[#allocation13_spill] sm:$0xff] %v3411_v21  ;;  %v3413_v6 = vpop.f32.mrb[1].mxu1 }
 0x308   : > { %v3415_v8 = vpop.f32.mrb[2].mxu1 }
 0x309   : > { %4457 = vst [vmem:[#allocation14_spill] sm:$0xff] %v3415_v8  ;;  %v3417_v12 = vpop.f32.mrb[3].mxu1 }
 0x30a   : > { %4458 = vst [vmem:[#allocation15_spill] sm:$0xff] %v3417_v12 }
 0x317   : > { %v3419_v22 = vpop.f32.mrb[4].mxu1 }
 0x318   : > { %4459 = vst [vmem:[#allocation16_spill] sm:$0xff] %v3419_v22  ;;  %v3421_v15 = vpop.f32.mrb[5].mxu1  ;;  %v3493_v22 = vld [vmem:[#allocation2 + $0x68] sm:$0xff] }
 0x319   : > { %4460 = vst [vmem:[#allocation17_spill] sm:$0xff] %v3421_v15  ;;  %v3423_v23 = vpop.f32.mrb[6].mxu1  ;;  %4471 = vst [vmem:[#allocation28_spill] sm:$0xff] %v3493_v22 }
 0x31a   : > { %4461 = vst [vmem:[#allocation18_spill] sm:$0xff] %v3423_v23  ;;  %v3425_v17 = vpop.f32.mrb[7].mxu1  ;;  %v3510_v23 = vld [vmem:[#allocation2 + $0x78] sm:$0xff] }
 0x31b   : > { %4462 = vst [vmem:[#allocation19_spill] sm:$0xff] %v3425_v17  ;;  %4475 = vst [vmem:[#allocation32_spill] sm:$0xff] %v3510_v23  ;;  %v3512_v17 = vld [vmem:[#allocation2 + $0x70] sm:$0xff] }
 0x31c   : > { %4476 = vst [vmem:[#allocation33_spill] sm:$0xff] %v3512_v17 }
 0x329   : > { %v3427_v19 = vpop.f32.mrb[8].mxu1 }
 0x32a   : > { %v3429_v25 = vpop.f32.mrb[9].mxu1  ;;  %v989_v42 = vsel %vm506_vm2, %v3427_v19, -inf }
 0x32b   : > { %v3431_v26 = vpop.f32.mrb[10].mxu1  ;;  %v983_v27 = vsel %vm506_vm2, %v3429_v25, -inf }
 0x32c   : > { %984 = vmax.xlane.f32.xlu1 %v983_v27  ;;  %v3435_v32 = vpop.f32.mrb[11].mxu1  ;;  %v992_v14 = vsel %vm506_vm2, %v3431_v26, -inf }
 0x32d   : > { %v986_v34 = vsel %vm506_vm2, %v3435_v32, -inf }
 0x32e   : > { %987 = vmax.xlane.f32.xlu0 %v986_v34 }
 0x330   : > { %993 = vmax.xlane.f32.xlu1 %v992_v14 }
 0x331   : > { %v3443_v18 = vpop.f32.mrb[12].mxu1 }
 0x332   : > { %990 = vmax.xlane.f32.xlu0 %v989_v42  ;;  %v3445_v47 = vpop.f32.mrb[13].mxu1  ;;  %v1001_v42 = vsel %vm506_vm2, %v3443_v18, -inf }
 0x333   : > { %v3447_v52 = vpop.f32.mrb[14].mxu1  ;;  %v995_v16 = vsel %vm506_vm2, %v3445_v47, -inf }
 0x334   : > { %v3451_v27 = vpop.f32.mrb[15].mxu1  ;;  %v1004_v14 = vsel %vm506_vm2, %v3447_v52, -inf }
 0x335   : > { %v998_v34 = vsel %vm506_vm2, %v3451_v27, -inf }
 0x336   : > { %999 = vmax.xlane.f32.xlu1 %v998_v34  ;;  %996 = vmax.xlane.f32.xlu0 %v995_v16 }
 0x33a   : > { %1005 = vmax.xlane.f32.xlu1 %v1004_v14  ;;  %1002 = vmax.xlane.f32.xlu0 %v1001_v42  ;;  %v3476_v42 = vld [vmem:[#allocation2 + $0x50] sm:$0xff] }
 0x33b   : > { %4468 = vst [vmem:[#allocation25_spill] sm:$0xff] %v3476_v42 }
 0x3b9   : > { %v985_v53 = vpop.xlane.xlu1 %984 }
 0x3ba   : > { %v3464_v37 = vmax.f32 %v3459_v61, %v985_v53  ;;  %v3495_v53 = vld [vmem:[#allocation2 + $0x60] sm:$0xff] }
 0x3bb   : > { %v988_v58 = vpop.xlane.xlu0 %987  ;;  %4472 = vst [vmem:[#allocation29_spill] sm:$0xff] %v3495_v53 }
 0x3bc   : > { %4465 = vst [vmem:[#allocation22_spill] sm:$0xff] %v3464_v37  ;;  %1357 = vst.msk [vmem:[#allocation2 + $0x40] sm:$0xff] %vm294_vm1, %v3464_v37  ;;  %v3473_v34 = vmax.f32 %v3461_v2, %v988_v58  ;;  %1041 = vperm.xlu0 %2887, %v3464_v37   ;;  %v3659_v37 = vld [vmem:[#allocation2 + $0x80] sm:$0xff] }
 0x3bd   : > { %v994_v14 = vpop.xlane.xlu1 %993  ;;  %4479 = vst [vmem:[#allocation36_spill] sm:$0xff] %v3659_v37 }
 0x3be   : > { %4467 = vst [vmem:[#allocation24_spill] sm:$0xff] %v3473_v34  ;;  %1358 = vst.msk [vmem:[#allocation2 + $0x48] sm:$0xff] %vm294_vm1, %v3473_v34  ;;  %v3483_v46 = vmax.f32 %v3466_v44, %v994_v14 }
 0x3bf   : > { %v991_v16 = vpop.xlane.xlu0 %990 }
 0x3c0   : > { %4469 = vst [vmem:[#allocation26_spill] sm:$0xff] %v3483_v46  ;;  %1360 = vst.msk [vmem:[#allocation2 + $0x58] sm:$0xff] %vm294_vm1, %v3483_v46  ;;  %v3490_v58 = vmax.f32 %v3476_v42, %v991_v16  ;;  %1056 = vperm.xlu0 %2887, %v3483_v46  }
 0x3c2   : > { %4470 = vst [vmem:[#allocation27_spill] sm:$0xff] %v3490_v58  ;;  %1359 = vst.msk [vmem:[#allocation2 + $0x50] sm:$0xff] %vm294_vm1, %v3490_v58  ;;  %1051 = vperm.xlu1 %2888, %v3490_v58  }
 0x3c3   : > { %v1000_v39 = vpop.xlane.xlu1 %999  ;;  %v997_v15 = vpop.xlane.xlu0 %996 }
 0x3c4   : > { %1133 = vrot.lane.b32.xlu0 %v3314_v57, %s3076_s23  ;;  %v3505_v16 = vmax.f32 %v3493_v22, %v1000_v39  ;;  %v3508_v21 = vmax.f32 %v3495_v53, %v997_v15 }
 0x3c6   : > { %4473 = vst [vmem:[#allocation30_spill] sm:$0xff] %v3505_v16  ;;  %4474 = vst [vmem:[#allocation31_spill] sm:$0xff] %v3508_v21  ;;  %1046 = vperm.xlu1 %2888, %v3473_v34  }
 0x3c7   : > { %1362 = vst.msk [vmem:[#allocation2 + $0x68] sm:$0xff] %vm294_vm1, %v3505_v16  ;;  %1361 = vst.msk [vmem:[#allocation2 + $0x60] sm:$0xff] %vm294_vm1, %v3508_v21  ;;  %v1006_v39 = vpop.xlane.xlu1 %1005  ;;  %v1003_v15 = vpop.xlane.xlu0 %1002 }
 0x3c8   : > { %1137 = vrot.lane.b32.xlu0 %v3348_v4, %s3076_s23  ;;  %v3526_v12 = vmax.f32 %v3510_v23, %v1006_v39  ;;  %v3529_v58 = vmax.f32 %v3512_v17, %v1003_v15 }
 0x3ca   : > { %4477 = vst [vmem:[#allocation34_spill] sm:$0xff] %v3526_v12  ;;  %4478 = vst [vmem:[#allocation35_spill] sm:$0xff] %v3529_v58  ;;  %1131 = vrot.lane.b32.xlu1 %v3298_v51, %s3076_s23 }
 0x3cb   : > { %1364 = vst.msk [vmem:[#allocation2 + $0x78] sm:$0xff] %vm294_vm1, %v3526_v12  ;;  %1363 = vst.msk [vmem:[#allocation2 + $0x70] sm:$0xff] %vm294_vm1, %v3529_v58 }
 0x3cc   : > { %1066 = vperm.xlu0 %2887, %v3505_v16  }
 0x3ce   : > { %1135 = vrot.lane.b32.xlu1 %v3336_v63, %s3076_s23 }
 0x3d0   : > { %1076 = vperm.xlu0 %2887, %v3526_v12  }
 0x3d2   : > { %1071 = vperm.xlu1 %2888, %v3529_v58  }
 0x3d4   : > { %1375 = vrot.lane.b32.xlu0 %v3133_v1, %s3077_s27 }
 0x3d6   : > { %1061 = vperm.xlu1 %2888, %v3508_v21  }
 0x3d8   : > { %1379 = vrot.lane.b32.xlu0 %v3159_v7, %s3077_s27 }
 0x3da   : > { %1373 = vrot.lane.b32.xlu1 %v3130_v0, %s3077_s27 }
 0x3dc   : > { %1367 = vrot.lane.b32.xlu0 %v3165_v9, %s3077_s27 }
 0x3de   : > { %1377 = vrot.lane.b32.xlu1 %v3152_v5, %s3077_s27 }
 0x3e0   : > { %1371 = vrot.lane.b32.xlu0 %v3173_v11, %s3077_s27 }
 0x3e2   : > { %1365 = vrot.lane.b32.xlu1 %v3145_v3, %s3077_s27 }
 0x3e6   : > { %1369 = vrot.lane.b32.xlu1 %v3167_v10, %s3077_s27 }
 0x43b   : > { %v1042_v39 = vpop.permute.xlu0 %1041 }
 0x43c   : > { %v1079_v0 = vsub.f32 %v3429_v25, %v1042_v39 }
 0x43e   : > { %v1087_v12 = vmul.f32 1.442695, %v1079_v0 }
 0x43f   : > { %v1057_v15 = vpop.permute.xlu0 %1056 }
 0x440   : > { %v1082_v14 = vsub.f32 %v3431_v26, %v1057_v15 }
 0x441   : > { %v1052_v8 = vpop.permute.xlu1 %1051 }
 0x442   : > { %v1093_v58 = vmul.f32 1.442695, %v1082_v14  ;;  %v1081_v17 = vsub.f32 %v3427_v19, %v1052_v8 }
 0x443   : > { %v1134_v21 = vpop.permute.xlu0 %1133 }
 0x444   : > { %v1091_v53 = vmul.f32 1.442695, %v1081_v17  ;;  %2917 = vpow2.f32 %v1093_v58 }
 0x445   : > { %v1047_v23 = vpop.permute.xlu1 %1046 }
 0x446   : > { %2919 = vpow2.f32 %v1091_v53  ;;  %v1080_v42 = vsub.f32 %v3435_v32, %v1047_v23 }
 0x447   : > { %v1138_v16 = vpop.permute.xlu0 %1137  ;;  %2921 = vpow2.f32 %v1087_v12 }
 0x448   : > { %v1089_v22 = vmul.f32 1.442695, %v1080_v42 }
 0x449   : > { %v1132_v34 = vpop.permute.xlu1 %1131 }
 0x44a   : > { %2923 = vpow2.f32 %v1089_v22  ;;  %2758 = vmatprep.subr.bf16.mxu0 %v1132_v34 }
 0x44b   : > { %v1067_v26 = vpop.permute.xlu0 %1066  ;;  %2759 = vmatpush3.bf16.msra.mxu0 %v1132_v34 }
 0x44c   : > { %2760 = vmatprep.subr.bf16.mxu0 %v1134_v21  ;;  %v1084_v12 = vsub.f32 %v3451_v27, %v1067_v26 }
 0x44d   : > { %v1136_v25 = vpop.permute.xlu1 %1135 }
 0x44e   : > { %v3567_v14 = vpop.eup %2917  ;;  %v1097_v58 = vmul.f32 1.442695, %v1084_v12 }
 0x44f   : > { %v1077_v8 = vpop.permute.xlu0 %1076  ;;  %2761 = vmatpush3.bf16.msra.mxu0 %v1134_v21 }
 0x450   : > { %v3569_v17 = vpop.eup %2919  ;;  %v1086_v19 = vsub.f32 %v3447_v52, %v1077_v8  ;;  %2762 = vmatprep.subr.bf16.mxu0 %v1136_v25 }
 0x451   : > { %v1128_v23 = vpack.c.bf16 %v3567_v14, %v3569_v17  ;;  %v1072_v22 = vpop.permute.xlu1 %1071  ;;  %v3576_v42 = vpop.eup %2921 }
 0x452   : > { %v1101_v32 = vmul.f32 1.442695, %v1086_v19  ;;  %v1085_v34 = vsub.f32 %v3443_v18, %v1072_v22 }
 0x453   : > { %2763 = vmatpush3.bf16.msra.mxu0 %v1136_v25  ;;  %v1376_v26 = vpop.permute.xlu0 %1375 }
 0x454   : > { %v3578_v53 = vpop.eup %2923  ;;  %v1099_v21 = vmul.f32 1.442695, %v1085_v34  ;;  %2764 = vmatprep.subr.bf16.mxu0 %v1138_v16  ;;  %2925 = vpow2.f32 %v1101_v32  ;;  %v1397_v22 = vsel %vm408_vm0, %v1376_v26, 0 }
 0x455   : > { %v1062_v52 = vpop.permute.xlu1 %1061  ;;  %v1127_v39 = vpack.c.bf16 %v3578_v53, %v3576_v42 }
 0x456   : > { %2927 = vpow2.f32 %v1099_v21  ;;  %v1083_v27 = vsub.f32 %v3445_v47, %v1062_v52 }
 0x457   : > { %2765 = vmatpush3.bf16.msra.mxu0 %v1138_v16  ;;  %2766 = vmatprep.mubr.msk.bf16.mxu0 %vm506_vm2, %v1127_v39  ;;  %2929 = vpow2.f32 %v1097_v58  ;;  %v1380_v21 = vpop.permute.xlu0 %1379 }
 0x458   : > { %v1095_v18 = vmul.f32 1.442695, %v1083_v27  ;;  %v1403_v58 = vsel %vm408_vm0, %v1380_v21, 0 }
 0x459   : > { %v1374_v15 = vpop.permute.xlu1 %1373 }
 0x45a   : > { %2931 = vpow2.f32 %v1095_v18  ;;  %2767 = vmatmul.mubr.msk.bf16.vlgmr.msra.gmra.mrb[8].mxu0 %vm506_vm2, %v1128_v23  ;;  %2846 = vmatprep.subr.msk.bf16.mxu0 %vm408_vm0, %v1374_v15  ;;  %v1394_v0 = vsel %vm408_vm0, %v1374_v15, 0 }
 0x45b   : > { %v1368_v52 = vpop.permute.xlu0 %1367 }
 0x45d   : > { %v1378_v16 = vpop.permute.xlu1 %1377 }
 0x45e   : > { %v3587_v25 = vpop.eup %2925  ;;  %v1400_v34 = vsel %vm408_vm0, %v1378_v16, 0 }
 0x45f   : > { %v1372_v27 = vpop.permute.xlu0 %1371 }
 0x460   : > { %v3589_v8 = vpop.eup %2927  ;;  %2775 = vmatpush3.bf16.xpose.msra.mxu0 %v1394_v0 }
 0x461   : > { %2847 = vmatprep.subr.msk.bf16.mxu0 %vm408_vm0, %v1376_v26  ;;  %v1130_v47 = vpack.c.bf16 %v3587_v25, %v3589_v8  ;;  %v3594_v19 = vpop.eup %2929  ;;  %v1366_v32 = vpop.permute.xlu1 %1365 }
 0x464   : > { %v3596_v12 = vpop.eup %2931 }
 0x465   : > { %v1129_v23 = vpack.c.bf16 %v3594_v19, %v3596_v12  ;;  %v1370_v39 = vpop.permute.xlu1 %1369 }
 0x467   : > { %2770 = vmatprep.mubr.msk.bf16.mxu0 %vm506_vm2, %v1129_v23 }
 0x468   : > { %2771 = vmatmul.mubr.msk.bf16.gmra.mrb[12].mxu0 %vm506_vm2, %v1130_v47 }
 0x469   : > { %2777 = vmatpush3.bf16.xpose.msra.mxu0 %v1397_v22  ;;  %2782 = vmatprep.mubr.msk.bf16.mxu0 %vm408_vm0, %v1366_v32 }
 0x46a   : > { %2848 = vmatprep.subr.msk.bf16.mxu0 %vm408_vm0, %v1378_v16 }
 0x471   : > { %2779 = vmatpush3.bf16.xpose.msra.mxu0 %v1400_v34 }
 0x472   : > { %2849 = vmatprep.subr.msk.bf16.mxu0 %vm408_vm0, %v1380_v21 }
 0x479   : > { %2781 = vmatpush3.bf16.xpose.msra.mxu0 %v1403_v58 }
 0x480   : > { %2783 = vmatmul.mubr.msk.bf16.vlgmr.msra.gmra.mrb[16].mxu0 %vm408_vm0, %v1368_v52 }
 0x481   : > { %2786 = vmatprep.mubr.msk.bf16.mxu0 %vm408_vm0, %v1370_v39 }
 0x488   : > { %2787 = vmatmul.mubr.msk.bf16.gmra.mrb[20].mxu0 %vm408_vm0, %v1372_v27 }
 0x52d   : > { %v3611_v18 = vpop.f32.mrb[8].mxu0 }
 0x52e   : > { %v3613_v15 = vpop.f32.mrb[9].mxu0 }
 0x52f   : > { %v3615_v0 = vpop.f32.mrb[10].mxu0 }
 0x530   : > { %v3617_v26 = vpop.f32.mrb[11].mxu0 }
 0x53b   : > { %v3619_v47 = vpop.f32.mrb[12].mxu0 }
 0x53c   : > { %v3621_v16 = vpop.f32.mrb[13].mxu0 }
 0x53d   : > { %v3623_v23 = vpop.f32.mrb[14].mxu0 }
 0x53e   : > { %v3625_v22 = vpop.f32.mrb[15].mxu0 }
 0x553   : > { %v3627_v32 = vpop.f32.mrb[16].mxu0 }
 0x554   : > { %v3629_v34 = vpop.f32.mrb[17].mxu0  ;;  %v1485_v2 = vsel %vm506_vm2, %v3627_v32, -inf }
 0x555   : > { %v3631_v21 = vpop.f32.mrb[18].mxu0  ;;  %v1479_v58 = vsel %vm506_vm2, %v3629_v34, -inf }
 0x556   : > { %1480 = vmax.xlane.f32.xlu1 %v1479_v58  ;;  %v3635_v52 = vpop.f32.mrb[19].mxu0  ;;  %v1488_v27 = vsel %vm506_vm2, %v3631_v21, -inf }
 0x557   : > { %v1482_v39 = vsel %vm506_vm2, %v3635_v52, -inf }
 0x558   : > { %1483 = vmax.xlane.f32.xlu0 %v1482_v39 }
 0x55a   : > { %1489 = vmax.xlane.f32.xlu1 %v1488_v27 }
 0x55b   : > { %v3643_v46 = vpop.f32.mrb[20].mxu0 }
 0x55c   : > { %1486 = vmax.xlane.f32.xlu0 %v1485_v2  ;;  %v3645_v44 = vpop.f32.mrb[21].mxu0  ;;  %v1497_v2 = vsel %vm506_vm2, %v3643_v46, -inf }
 0x55d   : > { %v3647_v59 = vpop.f32.mrb[22].mxu0  ;;  %v1491_v58 = vsel %vm506_vm2, %v3645_v44, -inf }
 0x55e   : > { %v3651_v50 = vpop.f32.mrb[23].mxu0  ;;  %v1500_v27 = vsel %vm506_vm2, %v3647_v59, -inf }
 0x55f   : > { %v1494_v39 = vsel %vm506_vm2, %v3651_v50, -inf }
 0x560   : > { %1495 = vmax.xlane.f32.xlu1 %v1494_v39  ;;  %1492 = vmax.xlane.f32.xlu0 %v1491_v58 }
 0x564   : > { %1501 = vmax.xlane.f32.xlu1 %v1500_v27  ;;  %1498 = vmax.xlane.f32.xlu0 %v1497_v2  ;;  %v3676_v2 = vld [vmem:[#allocation2 + $0x90] sm:$0xff] }
 0x5e3   : > { %v1481_v61 = vpop.xlane.xlu1 %1480 }
 0x5e4   : > { %v3664_v45 = vmax.f32 %v3659_v37, %v1481_v61  ;;  %v3695_v61 = vld [vmem:[#allocation2 + $0xa0] sm:$0xff] }
 0x5e5   : > { %v1484_v62 = vpop.xlane.xlu0 %1483  ;;  %4485 = vst [vmem:[#allocation42_spill] sm:$0xff] %v3695_v61 }
 0x5e6   : > { %4481 = vst [vmem:[#allocation38_spill] sm:$0xff] %v3664_v45  ;;  %1853 = vst.msk [vmem:[#allocation2 + $0x80] sm:$0xff] %vm294_vm1, %v3664_v45  ;;  %v3673_v39 = vmax.f32 %v3661_v49, %v1484_v62  ;;  %1537 = vperm.xlu0 %2887, %v3664_v45   ;;  %v3693_v45 = vld [vmem:[#allocation2 + $0xa8] sm:$0xff] }
 0x5e7   : > { %v1490_v27 = vpop.xlane.xlu1 %1489 }
 0x5e8   : > { %1854 = vst.msk [vmem:[#allocation2 + $0x88] sm:$0xff] %vm294_vm1, %v3673_v39  ;;  %v3683_v33 = vmax.f32 %v3666_v56, %v1490_v27  ;;  %v3710_v56 = vld [vmem:[#allocation2 + $0xb8] sm:$0xff] }
 0x5e9   : > { %v1487_v58 = vpop.xlane.xlu0 %1486 }
 0x5ea   : > { %4483 = vst [vmem:[#allocation40_spill] sm:$0xff] %v3683_v33  ;;  %1856 = vst.msk [vmem:[#allocation2 + $0x98] sm:$0xff] %vm294_vm1, %v3683_v33  ;;  %v3690_v62 = vmax.f32 %v3676_v2, %v1487_v58  ;;  %1552 = vperm.xlu0 %2887, %v3683_v33  }
 0x5ec   : > { %4484 = vst [vmem:[#allocation41_spill] sm:$0xff] %v3690_v62  ;;  %1855 = vst.msk [vmem:[#allocation2 + $0x90] sm:$0xff] %vm294_vm1, %v3690_v62  ;;  %1547 = vperm.xlu1 %2888, %v3690_v62  }
 0x5ed   : > { %v1496_v37 = vpop.xlane.xlu1 %1495  ;;  %v1493_v49 = vpop.xlane.xlu0 %1492 }
 0x5ee   : > { %1629 = vrot.lane.b32.xlu0 %v3314_v57, %s3077_s27  ;;  %v3705_v58 = vmax.f32 %v3693_v45, %v1496_v37  ;;  %v3708_v33 = vmax.f32 %v3695_v61, %v1493_v49 }
 0x5f0   : > { %1542 = vperm.xlu1 %2888, %v3673_v39   ;;  %1858 = vst.msk [vmem:[#allocation2 + $0xa8] sm:$0xff] %vm294_vm1, %v3705_v58  ;;  %1857 = vst.msk [vmem:[#allocation2 + $0xa0] sm:$0xff] %vm294_vm1, %v3708_v33 }
 0x5f1   : > { %v1502_v37 = vpop.xlane.xlu1 %1501  ;;  %v1499_v49 = vpop.xlane.xlu0 %1498 }
 0x5f2   : > { %1633 = vrot.lane.b32.xlu0 %v3348_v4, %s3077_s27  ;;  %v3726_v62 = vmax.f32 %v3710_v56, %v1502_v37  ;;  %v3729_v27 = vmax.f32 %v3712_v30, %v1499_v49 }
 0x5f4   : > { %4486 = vst [vmem:[#allocation43_spill] sm:$0xff] %v3729_v27  ;;  %1627 = vrot.lane.b32.xlu1 %v3298_v51, %s3077_s27  ;;  %1860 = vst.msk [vmem:[#allocation2 + $0xb8] sm:$0xff] %vm294_vm1, %v3726_v62  ;;  %v3045_v51 = vld [vmem:[%s3127_s19] sm:$0xff]  }
 0x5f5   : > { %1859 = vst.msk [vmem:[#allocation2 + $0xb0] sm:$0xff] %vm294_vm1, %v3729_v27 }
 0x5f6   : > { %1562 = vperm.xlu0 %2887, %v3705_v58  }
 0x5f8   : > { %1631 = vrot.lane.b32.xlu1 %v3336_v63, %s3077_s27 }
 0x5fa   : > { %1572 = vperm.xlu0 %2887, %v3726_v62  }
 0x5fc   : > { %1567 = vperm.xlu1 %2888, %v3729_v27  }
 0x5fe   : > { %1871 = vrot.lane.b32.xlu0 %v3133_v1, %s3078_s28 }
 0x600   : > { %1557 = vperm.xlu1 %2888, %v3708_v33  }
 0x602   : > { %1875 = vrot.lane.b32.xlu0 %v3159_v7, %s3078_s28 }
 0x604   : > { %1869 = vrot.lane.b32.xlu1 %v3045_v51, %s3078_s28 }
 0x606   : > { %1863 = vrot.lane.b32.xlu0 %v3165_v9, %s3078_s28 }
 0x608   : > { %1873 = vrot.lane.b32.xlu1 %v3152_v5, %s3078_s28 }
 0x60a   : > { %1867 = vrot.lane.b32.xlu0 %v3173_v11, %s3078_s28 }
 0x60c   : > { %1861 = vrot.lane.b32.xlu1 %v3145_v3, %s3078_s28 }
 0x610   : > { %1865 = vrot.lane.b32.xlu1 %v3167_v10, %s3078_s28 }
 0x665   : > { %v1538_v1 = vpop.permute.xlu0 %1537 }
 0x666   : > { %v1575_v4 = vsub.f32 %v3629_v34, %v1538_v1 }
 0x668   : > { %v1583_v61 = vmul.f32 1.442695, %v1575_v4 }
 0x669   : > { %v1553_v7 = vpop.permute.xlu0 %1552 }
 0x66a   : > { %v1578_v63 = vsub.f32 %v3631_v21, %v1553_v7 }
 0x66b   : > { %v1548_v37 = vpop.permute.xlu1 %1547 }
 0x66c   : > { %v1589_v9 = vmul.f32 1.442695, %v1578_v63  ;;  %v1577_v49 = vsub.f32 %v3627_v32, %v1548_v37 }
 0x66d   : > { %v1630_v5 = vpop.permute.xlu0 %1629 }
 0x66e   : > { %v1587_v51 = vmul.f32 1.442695, %v1577_v49  ;;  %2933 = vpow2.f32 %v1589_v9 }
 0x66f   : > { %v1543_v11 = vpop.permute.xlu1 %1542 }
 0x670   : > { %2935 = vpow2.f32 %v1587_v51  ;;  %v1576_v3 = vsub.f32 %v3635_v52, %v1543_v11 }
 0x671   : > { %v1634_v57 = vpop.permute.xlu0 %1633  ;;  %2937 = vpow2.f32 %v1583_v61 }
 0x672   : > { %v1585_v10 = vmul.f32 1.442695, %v1576_v3 }
 0x673   : > { %v1628_v27 = vpop.permute.xlu1 %1627 }
 0x674   : > { %2939 = vpow2.f32 %v1585_v10  ;;  %2790 = vmatprep.subr.bf16.mxu1 %v1628_v27 }
 0x675   : > { %v1563_v21 = vpop.permute.xlu0 %1562  ;;  %2791 = vmatpush3.bf16.msra.mxu1 %v1628_v27 }
 0x676   : > { %2792 = vmatprep.subr.bf16.mxu1 %v1630_v5  ;;  %v1580_v61 = vsub.f32 %v3651_v50, %v1563_v21 }
 0x677   : > { %v1632_v34 = vpop.permute.xlu1 %1631 }
 0x678   : > { %v3767_v1 = vpop.eup %2933  ;;  %v1593_v51 = vmul.f32 1.442695, %v1580_v61 }
 0x679   : > { %v1573_v32 = vpop.permute.xlu0 %1572  ;;  %2793 = vmatpush3.bf16.msra.mxu1 %v1630_v5 }
 0x67a   : > { %v3769_v7 = vpop.eup %2935  ;;  %v1582_v63 = vsub.f32 %v3647_v59, %v1573_v32  ;;  %2794 = vmatprep.subr.bf16.mxu1 %v1632_v34 }
 0x67b   : > { %v1624_v52 = vpack.c.bf16 %v3767_v1, %v3769_v7  ;;  %v1568_v4 = vpop.permute.xlu1 %1567  ;;  %v3776_v9 = vpop.eup %2937 }
 0x67c   : > { %v1597_v37 = vmul.f32 1.442695, %v1582_v63  ;;  %v1581_v27 = vsub.f32 %v3643_v46, %v1568_v4 }
 0x67d   : > { %2795 = vmatpush3.bf16.msra.mxu1 %v1632_v34  ;;  %v1872_v21 = vpop.permute.xlu0 %1871 }
 0x67e   : > { %v3778_v49 = vpop.eup %2939  ;;  %v1595_v5 = vmul.f32 1.442695, %v1581_v27  ;;  %2796 = vmatprep.subr.bf16.mxu1 %v1634_v57  ;;  %2941 = vpow2.f32 %v1597_v37  ;;  %v1893_v4 = vsel %vm408_vm0, %v1872_v21, 0 }
 0x67f   : > { %v1558_v59 = vpop.permute.xlu1 %1557  ;;  %v1623_v11 = vpack.c.bf16 %v3778_v49, %v3776_v9 }
 0x680   : > { %2943 = vpow2.f32 %v1595_v5  ;;  %v1579_v50 = vsub.f32 %v3645_v44, %v1558_v59 }
 0x681   : > { %2797 = vmatpush3.bf16.msra.mxu1 %v1634_v57  ;;  %2798 = vmatprep.mubr.msk.bf16.mxu1 %vm506_vm2, %v1623_v11  ;;  %2945 = vpow2.f32 %v1593_v51  ;;  %v1876_v5 = vpop.permute.xlu0 %1875 }
 0x682   : > { %v1591_v46 = vmul.f32 1.442695, %v1579_v50  ;;  %v1899_v51 = vsel %vm408_vm0, %v1876_v5, 0 }
 0x683   : > { %v1870_v3 = vpop.permute.xlu1 %1869 }
 0x684   : > { %2947 = vpow2.f32 %v1591_v46  ;;  %2799 = vmatmul.mubr.msk.bf16.vlgmr.msra.gmra.mrb[16].mxu1 %vm506_vm2, %v1624_v52  ;;  %2850 = vmatprep.subr.msk.bf16.mxu1 %vm408_vm0, %v1870_v3  ;;  %v1890_v10 = vsel %vm408_vm0, %v1870_v3, 0 }
 0x685   : > { %v1864_v59 = vpop.permute.xlu0 %1863 }
 0x687   : > { %v1874_v57 = vpop.permute.xlu1 %1873 }
 0x688   : > { %v3787_v34 = vpop.eup %2941  ;;  %v1896_v27 = vsel %vm408_vm0, %v1874_v57, 0 }
 0x689   : > { %v1868_v50 = vpop.permute.xlu0 %1867 }
 0x68a   : > { %v3789_v32 = vpop.eup %2943  ;;  %2807 = vmatpush3.bf16.xpose.msra.mxu1 %v1890_v10 }
 0x68b   : > { %2851 = vmatprep.subr.msk.bf16.mxu1 %vm408_vm0, %v1872_v21  ;;  %v1626_v44 = vpack.c.bf16 %v3787_v34, %v3789_v32  ;;  %v3794_v63 = vpop.eup %2945  ;;  %v1862_v37 = vpop.permute.xlu1 %1861 }
 0x68e   : > { %v3796_v61 = vpop.eup %2947 }
 0x68f   : > { %v1625_v52 = vpack.c.bf16 %v3794_v63, %v3796_v61  ;;  %v1866_v11 = vpop.permute.xlu1 %1865 }
 0x691   : > { %2802 = vmatprep.mubr.msk.bf16.mxu1 %vm506_vm2, %v1625_v52 }
 0x692   : > { %2803 = vmatmul.mubr.msk.bf16.gmra.mrb[20].mxu1 %vm506_vm2, %v1626_v44 }
 0x693   : > { %2809 = vmatpush3.bf16.xpose.msra.mxu1 %v1893_v4  ;;  %2814 = vmatprep.mubr.msk.bf16.mxu1 %vm408_vm0, %v1862_v37 }
 0x694   : > { %2852 = vmatprep.subr.msk.bf16.mxu1 %vm408_vm0, %v1874_v57 }
 0x69b   : > { %2811 = vmatpush3.bf16.xpose.msra.mxu1 %v1896_v27 }
 0x69c   : > { %2853 = vmatprep.subr.msk.bf16.mxu1 %vm408_vm0, %v1876_v5 }
 0x6a3   : > { %2813 = vmatpush3.bf16.xpose.msra.mxu1 %v1899_v51 }
 0x6aa   : > { %2815 = vmatmul.mubr.msk.bf16.vlgmr.msra.gmra.mrb[24].mxu1 %vm408_vm0, %v1864_v59 }
 0x6ab   : > { %2818 = vmatprep.mubr.msk.bf16.mxu1 %vm408_vm0, %v1866_v11 }
 0x6b2   : > { %2819 = vmatmul.mubr.msk.bf16.gmra.mrb[28].mxu1 %vm408_vm0, %v1868_v50 }
 0x757   : > { %v3811_v46 = vpop.f32.mrb[16].mxu1 }
 0x758   : > { %4487 = vst [vmem:[#allocation44_spill] sm:$0xff] %v3811_v46  ;;  %v3813_v3 = vpop.f32.mrb[17].mxu1 }
 0x759   : > { %4488 = vst [vmem:[#allocation45_spill] sm:$0xff] %v3813_v3  ;;  %v3815_v10 = vpop.f32.mrb[18].mxu1  ;;  %v627_v3 = vsel %vm506_vm2, %v3368_v40, 0.0  ;;  %v642_v40 = vsel %vm506_vm2, %v3397_v29, 0.0 }
 0x75a   : > { %4489 = vst [vmem:[#allocation46_spill] sm:$0xff] %v3815_v10  ;;  %v3817_v21 = vpop.f32.mrb[19].mxu1  ;;  %v633_v10 = vsel %vm506_vm2, %v3376_v55, 0.0  ;;  %v648_v55 = vsel %vm506_vm2, %v3390_v24, 0.0  ;;  %v3898_v24 = vld [vmem:[#allocation2 + $0xc0] sm:$0xff] }
 0x765   : > { %v3819_v44 = vpop.f32.mrb[20].mxu1 }
 0x766   : > { %4490 = vst [vmem:[#allocation47_spill] sm:$0xff] %v3819_v44  ;;  %v3821_v57 = vpop.f32.mrb[21].mxu1 }
 0x767   : > { %4491 = vst [vmem:[#allocation48_spill] sm:$0xff] %v3821_v57  ;;  %v3823_v52 = vpop.f32.mrb[22].mxu1 }
 0x768   : > { %4492 = vst [vmem:[#allocation49_spill] sm:$0xff] %v3823_v52  ;;  %v3825_v4 = vpop.f32.mrb[23].mxu1 }
 0x769   : > { %4493 = vst [vmem:[#allocation50_spill] sm:$0xff] %v3825_v4 }
 0x77d   : > { %v3827_v37 = vpop.f32.mrb[24].mxu1 }
 0x77e   : > { %v3829_v27 = vpop.f32.mrb[25].mxu1  ;;  %v1981_v5 = vsel %vm506_vm2, %v3827_v37, -inf }
 0x77f   : > { %1982 = vmax.xlane.f32.xlu0 %v1981_v5  ;;  %v3833_v51 = vpop.f32.mrb[26].mxu1  ;;  %v1975_v59 = vsel %vm506_vm2, %v3829_v27, -inf }
 0x780   : > { %1976 = vmax.xlane.f32.xlu1 %v1975_v59  ;;  %v3837_v11 = vpop.f32.mrb[27].mxu1  ;;  %v1984_v44 = vsel %vm506_vm2, %v3833_v51, -inf }
 0x781   : > { %v1978_v50 = vsel %vm506_vm2, %v3837_v11, -inf }
 0x783   : > { %1979 = vmax.xlane.f32.xlu0 %v1978_v50 }
 0x784   : > { %1985 = vmax.xlane.f32.xlu1 %v1984_v44 }
 0x785   : > { %v3843_v57 = vpop.f32.mrb[28].mxu1 }
 0x786   : > { %v3845_v52 = vpop.f32.mrb[29].mxu1  ;;  %v1993_v5 = vsel %vm506_vm2, %v3843_v57, -inf }
 0x787   : > { %1994 = vmax.xlane.f32.xlu0 %v1993_v5  ;;  %v3849_v46 = vpop.f32.mrb[30].mxu1  ;;  %v1987_v50 = vsel %vm506_vm2, %v3845_v52, -inf  ;;  %v630_v5 = vsel %vm506_vm2, %v3370_v13, 0.0  ;;  %v645_v13 = vsel %vm506_vm2, %v3388_v20, 0.0  ;;  %v3896_v20 = vld [vmem:[#allocation2 + $0xd0] sm:$0xff] }
 0x788   : > { %v3851_v59 = vpop.f32.mrb[31].mxu1  ;;  %v1996_v44 = vsel %vm506_vm2, %v3849_v46, -inf  ;;  %4495 = vst [vmem:[#allocation51_spill] sm:$0xff] %v3896_v20 }
 0x789   : > { %v1990_v4 = vsel %vm506_vm2, %v3851_v59, -inf }
 0x78a   : > { %1991 = vmax.xlane.f32.xlu1 %v1990_v4  ;;  %v636_v4 = vsel %vm506_vm2, %v3379_v60, 0.0  ;;  %v4494_v60 = vsub.f32 %v3243_v31, %v3249_v35  ;;  %v3046_v35 = vld [vmem:[%s3288_s26] sm:$0xff]  }
 0x78b   : > { %1988 = vmax.xlane.f32.xlu0 %v1987_v50  ;;  %v639_v50 = vsel %vm506_vm2, %v3395_v28, 0.0  ;;  %v3079_v28 = vmov 0.0  }
 0x78c   : > { %328 = vst.msk [vmem:[#allocation3] sm:$0xff] %vm327_vm3, %v3079_v28  ;;  %336 = vst.msk [vmem:[#allocation4] sm:$0xff] %vm327_vm3, %v3079_v28 }
 0x78d   : > { %329 = vst.msk [vmem:[#allocation3 + $0x8] sm:$0xff] %vm327_vm3, %v3079_v28  ;;  %330 = vst.msk [vmem:[#allocation3 + $0x10] sm:$0xff] %vm327_vm3, %v3079_v28 }
 0x78e   : > { %1997 = vmax.xlane.f32.xlu1 %v1996_v44  ;;  %331 = vst.msk [vmem:[#allocation3 + $0x18] sm:$0xff] %vm327_vm3, %v3079_v28  ;;  %332 = vst.msk [vmem:[#allocation3 + $0x20] sm:$0xff] %vm327_vm3, %v3079_v28 }
 0x78f   : > { %628 = vadd.xlane.f32.xlu0 %v627_v3  ;;  %v547_v3 = vmul.f32 1.442695, %v4494_v60  ;;  %333 = vst.msk [vmem:[#allocation3 + $0x28] sm:$0xff] %vm327_vm3, %v3079_v28  ;;  %334 = vst.msk [vmem:[#allocation3 + $0x30] sm:$0xff] %vm327_vm3, %v3079_v28 }
 0x790   : > { %335 = vst.msk [vmem:[#allocation3 + $0x38] sm:$0xff] %vm327_vm3, %v3079_v28  ;;  %337 = vst.msk [vmem:[#allocation4 + $0x8] sm:$0xff] %vm327_vm3, %v3079_v28 }
 0x791   : > { %2949 = vpow2.f32 %v547_v3  ;;  %338 = vst.msk [vmem:[#allocation4 + $0x10] sm:$0xff] %vm327_vm3, %v3079_v28  ;;  %339 = vst.msk [vmem:[#allocation4 + $0x18] sm:$0xff] %vm327_vm3, %v3079_v28 }
 0x792   : > { %631 = vadd.xlane.f32.xlu1 %v630_v5  ;;  %340 = vst.msk [vmem:[#allocation4 + $0x20] sm:$0xff] %vm327_vm3, %v3079_v28  ;;  %341 = vst.msk [vmem:[#allocation4 + $0x28] sm:$0xff] %vm327_vm3, %v3079_v28 }
 0x793   : > { %634 = vadd.xlane.f32.xlu0 %v633_v10  ;;  %342 = vst.msk [vmem:[#allocation4 + $0x30] sm:$0xff] %vm327_vm3, %v3079_v28  ;;  %343 = vst.msk [vmem:[#allocation4 + $0x38] sm:$0xff] %vm327_vm3, %v3079_v28 }
 0x796   : > { %637 = vadd.xlane.f32.xlu1 %v636_v4  ;;  %v3906_v4 = vld [vmem:[#allocation2 + $0xc8] sm:$0xff] }
 0x797   : > { %640 = vadd.xlane.f32.xlu0 %v639_v50  ;;  %4497 = vst [vmem:[#allocation53_spill] sm:$0xff] %v3906_v4  ;;  %v3942_v50 = vld [vmem:[#allocation2 + $0xe0] sm:$0xff] }
 0x798   : > { %4504 = vst [vmem:[#allocation60_spill] sm:$0xff] %v3942_v50 }
 0x79a   : > { %643 = vadd.xlane.f32.xlu1 %v642_v40  ;;  %v3913_v40 = vld [vmem:[#allocation2 + $0xd8] sm:$0xff] }
 0x79b   : > { %646 = vadd.xlane.f32.xlu0 %v645_v13  ;;  %v2950_v31 = vpop.eup %2949  ;;  %4498 = vst [vmem:[#allocation54_spill] sm:$0xff] %v3913_v40 }
 0x79e   : > { %649 = vadd.xlane.f32.xlu1 %v648_v55 }
 0x7b1   : > { %766 = vperm.xlu0 %2887, %v2950_v31   ;;  %v3926_v31 = vld [vmem:[#allocation2 + $0xf0] sm:$0xff] }
 0x7b2   : > { %4501 = vst [vmem:[#allocation57_spill] sm:$0xff] %v3926_v31 }
 0x7b5   : > { %2123 = vrot.lane.b32.xlu0 %v3046_v35, %s3078_s28 }
 0x80c   : > { %v1983_v29 = vpop.xlane.xlu0 %1982 }
 0x80d   : > { %v3901_v10 = vmax.f32 %v3896_v20, %v1983_v29  ;;  %v1977_v44 = vpop.xlane.xlu1 %1976 }
 0x80e   : > { %v3904_v5 = vmax.f32 %v3898_v24, %v1977_v44 }
 0x80f   : > { %4496 = vst [vmem:[#allocation52_spill] sm:$0xff] %v3901_v10  ;;  %2351 = vst.msk [vmem:[#allocation2 + $0xd0] sm:$0xff] %vm294_vm1, %v3901_v10  ;;  %2043 = vperm.xlu0 %2887, %v3901_v10   ;;  %v3956_v10 = vld [vmem:[#allocation2 + $0xf8] sm:$0xff] }
 0x810   : > { %2349 = vst.msk [vmem:[#allocation2 + $0xc0] sm:$0xff] %vm294_vm1, %v3904_v5  ;;  %v1980_v55 = vpop.xlane.xlu0 %1979  ;;  %2033 = vperm.xlu1 %2888, %v3904_v5   ;;  %4506 = vst [vmem:[#allocation62_spill] sm:$0xff] %v3956_v10 }
 0x811   : > { %v3921_v60 = vmax.f32 %v3906_v4, %v1980_v55  ;;  %v1986_v3 = vpop.xlane.xlu1 %1985 }
 0x812   : > { %v3924_v28 = vmax.f32 %v3913_v40, %v1986_v3  ;;  %v3940_v3 = vld [vmem:[#allocation2 + $0xe8] sm:$0xff] }
 0x813   : > { %4499 = vst [vmem:[#allocation55_spill] sm:$0xff] %v3921_v60  ;;  %2350 = vst.msk [vmem:[#allocation2 + $0xc8] sm:$0xff] %vm294_vm1, %v3921_v60 }
 0x814   : > { %4500 = vst [vmem:[#allocation56_spill] sm:$0xff] %v3924_v28  ;;  %2352 = vst.msk [vmem:[#allocation2 + $0xd8] sm:$0xff] %vm294_vm1, %v3924_v28  ;;  %v1995_v44 = vpop.xlane.xlu0 %1994  ;;  %2048 = vperm.xlu1 %2888, %v3924_v28  }
 0x815   : > { %v3938_v55 = vmax.f32 %v3926_v31, %v1995_v44  ;;  %4503 = vst [vmem:[#allocation59_spill] sm:$0xff] %v3940_v3 }
 0x817   : > { %4502 = vst [vmem:[#allocation58_spill] sm:$0xff] %v3938_v55  ;;  %2355 = vst.msk [vmem:[#allocation2 + $0xf0] sm:$0xff] %vm294_vm1, %v3938_v55  ;;  %2063 = vperm.xlu0 %2887, %v3938_v55   ;;  %v1992_v29 = vpop.xlane.xlu1 %1991 }
 0x818   : > { %v3950_v13 = vmax.f32 %v3940_v3, %v1992_v29  ;;  %v1989_v4 = vpop.xlane.xlu0 %1988  ;;  %2038 = vperm.xlu1 %2888, %v3921_v60   ;;  %v3047_v29 = vld [vmem:[%s3288_s26 + $0x10] sm:$0xff]   ;;  %v3049_v3 = vld [vmem:[%s3288_s26 + $0x18] sm:$0xff]   ;;  %v756_v60 = vld [vmem:[#allocation3] sm:$0xff] }
 0x819   : > { %v3954_v44 = vmax.f32 %v3942_v50, %v1989_v4 }
 0x81a   : > { %2354 = vst.msk [vmem:[#allocation2 + $0xe8] sm:$0xff] %vm294_vm1, %v3950_v13 }
 0x81b   : > { %4505 = vst [vmem:[#allocation61_spill] sm:$0xff] %v3954_v44  ;;  %2353 = vst.msk [vmem:[#allocation2 + $0xe0] sm:$0xff] %vm294_vm1, %v3954_v44  ;;  %2053 = vperm.xlu0 %2887, %v3954_v44   ;;  %v1998_v4 = vpop.xlane.xlu1 %1997 }
 0x81c   : > { %v3968_v55 = vmax.f32 %v3956_v10, %v1998_v4  ;;  %v629_v31 = vpop.xlane.xlu0 %628  ;;  %v3048_v4 = vld [vmem:[%s3288_s26 + $0x8] sm:$0xff]   ;;  %v828_v10 = vld [vmem:[#allocation4] sm:$0xff] }
 0x81e   : > { %4507 = vst [vmem:[#allocation63_spill] sm:$0xff] %v3968_v55  ;;  %2356 = vst.msk [vmem:[#allocation2 + $0xf8] sm:$0xff] %vm294_vm1, %v3968_v55  ;;  %2068 = vperm.xlu1 %2888, %v3968_v55  }
 0x81f   : > { %2127 = vrot.lane.b32.xlu0 %v3047_v29, %s3078_s28 }
 0x820   : > { %v3977_v50 = vpop.xlane.xlu0 %634 }
 0x821   : > { %4508 = vst [vmem:[#allocation64_spill] sm:$0xff] %v3977_v50 }
 0x822   : > { %2058 = vperm.xlu1 %2888, %v3950_v13  }
 0x824   : > { %v3980_v44 = vpop.xlane.xlu0 %640 }
 0x826   : > { %2125 = vrot.lane.b32.xlu1 %v3048_v4, %s3078_s28  ;;  %v1109_v4 = vsel %vm506_vm2, %v3569_v17, 0.0  ;;  %v1118_v17 = vsel %vm506_vm2, %v3594_v19, 0.0 }
 0x828   : > { %v3986_v35 = vpop.xlane.xlu0 %646 }
 0x82a   : > { %2129 = vrot.lane.b32.xlu1 %v3049_v3, %s3078_s28  ;;  %v1106_v3 = vsel %vm506_vm2, %v3578_v53, 0.0  ;;  %v1112_v53 = vsel %vm506_vm2, %v3567_v14, 0.0  ;;  %v4015_v14 = vpop.xlane.xlu1 %631 }
 0x830   : > { %v767_v55 = vpop.permute.xlu0 %766 }
 0x831   : > { %v804_v20 = vmul.f32 %v767_v55, %v756_v60  ;;  %v836_v28 = vmul.f32 %v828_v10, %v767_v55  ;;  %v1103_v10 = vsel %vm506_vm2, %v3576_v42, 0.0  ;;  %v4017_v42 = vpop.xlane.xlu1 %637  ;;  %v1617_v60 = vsel %vm506_vm2, %v3789_v32, 0.0 }
 0x832   : > { %v1599_v55 = vsel %vm506_vm2, %v3776_v9, 0.0  ;;  %v4510_v9 = vsub.f32 %v3251_v36, %v3266_v41 }
 0x833   : > { %v812_v29 = vadd.f32 %v804_v20, %v629_v31  ;;  %v844_v50 = vadd.f32 %v836_v28, %v3413_v6  ;;  %v1115_v20 = vsel %vm506_vm2, %v3596_v12, 0.0  ;;  %v1121_v6 = vsel %vm506_vm2, %v3589_v8, 0.0 }
 0x834   : > { %v2124_v40 = vpop.permute.xlu0 %2123  ;;  %v1124_v12 = vsel %vm506_vm2, %v3587_v25, 0.0  ;;  %v1602_v8 = vsel %vm506_vm2, %v3778_v49, 0.0 }
 0x835   : > { %820 = vst.msk [vmem:[#allocation3] sm:$0xff] %vm408_vm0, %v812_v29  ;;  %852 = vst.msk [vmem:[#allocation4] sm:$0xff] %vm408_vm0, %v844_v50  ;;  %2822 = vmatprep.subr.bf16.mxu0 %v2124_v40  ;;  %v4019_v25 = vpop.xlane.xlu1 %643 }
 0x836   : > { %2823 = vmatpush3.bf16.msra.mxu0 %v2124_v40 }
 0x839   : > { %v4023_v19 = vpop.xlane.xlu1 %649 }
 0x83e   : > { %1107 = vadd.xlane.f32.xlu0 %v1106_v3 }
 0x842   : > { %1110 = vadd.xlane.f32.xlu0 %v1109_v4 }
 0x846   : > { %1116 = vadd.xlane.f32.xlu0 %v1115_v20  ;;  %v553_v20 = vmul.f32 1.442695, %v4510_v9 }
 0x84a   : > { %1122 = vadd.xlane.f32.xlu0 %v1121_v6 }
 0x84e   : > { %1104 = vadd.xlane.f32.xlu1 %v1103_v10 }
 0x852   : > { %1113 = vadd.xlane.f32.xlu1 %v1112_v53 }
 0x856   : > { %1119 = vadd.xlane.f32.xlu1 %v1118_v17 }
 0x85a   : > { %1125 = vadd.xlane.f32.xlu1 %v1124_v12 }
 0x860   : > { %1319 = vrot.lane.b32.xlu0 %v3617_v26, %s3080_s29 }
 0x864   : > { %1323 = vrot.lane.b32.xlu0 %v3615_v0, %s3080_s29 }
 0x868   : > { %1327 = vrot.lane.b32.xlu0 %v3625_v22, %s3080_s29 }
 0x86b   : > { %1317 = vrot.lane.b32.xlu1 %v3613_v15, %s3080_s29 }
 0x86c   : > { %1331 = vrot.lane.b32.xlu0 %v3623_v23, %s3080_s29 }
 0x86f   : > { %1321 = vrot.lane.b32.xlu1 %v3611_v18, %s3080_s29  ;;  %v1605_v18 = vsel %vm506_vm2, %v3769_v7, 0.0 }
 0x873   : > { %1325 = vrot.lane.b32.xlu1 %v3621_v16, %s3080_s29 }
 0x877   : > { %1329 = vrot.lane.b32.xlu1 %v3619_v47, %s3080_s29  ;;  %v1611_v47 = vsel %vm506_vm2, %v3796_v61, 0.0 }
 0x88b   : > { %1603 = vadd.xlane.f32.xlu0 %v1602_v8 }
 0x88e   : > { %v2044_v15 = vpop.permute.xlu0 %2043 }
 0x88f   : > { %v2073_v0 = vsub.f32 %v3827_v37, %v2044_v15  ;;  %1606 = vadd.xlane.f32.xlu0 %v1605_v18  ;;  %v2034_v26 = vpop.permute.xlu1 %2033  ;;  %v4511_v15 = vsub.f32 %v3290_v48, %v3305_v54  ;;  %v4515_v54 = vld [vmem:[#allocation10_spill] sm:$0xff] }
 0x890   : > { %v2071_v23 = vsub.f32 %v3829_v27, %v2034_v26  ;;  %v4513_v26 = vld [vmem:[#allocation6_spill] sm:$0xff] }
 0x891   : > { %v2083_v16 = vmul.f32 1.442695, %v2073_v0  ;;  %v4512_v0 = vld [vmem:[#allocation5_spill] sm:$0xff] }
 0x892   : > { %v2079_v7 = vmul.f32 1.442695, %v2071_v23 }
 0x893   : > { %1612 = vadd.xlane.f32.xlu0 %v1611_v47  ;;  %v2049_v22 = vpop.permute.xlu1 %2048  ;;  %2951 = vpow2.f32 %v2083_v16  ;;  %v4514_v47 = vsub.f32 %v4512_v0, %v4513_v26 }
 0x894   : > { %v2074_v49 = vsub.f32 %v3833_v51, %v2049_v22  ;;  %v4509_v51 = vsub.f32 %v3258_v38, %v3269_v43  ;;  %v4516_v22 = vld [vmem:[#allocation12_spill] sm:$0xff] }
 0x895   : > { %v551_v16 = vmul.f32 1.442695, %v4514_v47 }
 0x896   : > { %v2085_v50 = vmul.f32 1.442695, %v2074_v49  ;;  %v2064_v40 = vpop.permute.xlu0 %2063  ;;  %v549_v32 = vmul.f32 1.442695, %v4509_v51  ;;  %v4517_v49 = vsub.f32 %v4515_v54, %v4516_v22  ;;  %v4539_v54 = vld [vmem:[#allocation32_spill] sm:$0xff]  ;;  %v4540_v22 = vld [vmem:[#allocation34_spill] sm:$0xff] }
 0x897   : > { %1618 = vadd.xlane.f32.xlu0 %v1617_v60  ;;  %v2039_v37 = vpop.permute.xlu1 %2038  ;;  %v2077_v61 = vsub.f32 %v3843_v57, %v2064_v40  ;;  %v1608_v57 = vsel %vm506_vm2, %v3767_v1, 0.0  ;;  %v1614_v1 = vsel %vm506_vm2, %v3794_v63, 0.0  ;;  %v1620_v63 = vsel %vm506_vm2, %v3787_v34, 0.0  ;;  %v4518_v60 = vld [vmem:[#allocation7_spill] sm:$0xff] }
 0x898   : > { %2953 = vpow2.f32 %v2085_v50  ;;  %v2072_v28 = vsub.f32 %v3837_v11, %v2039_v37  ;;  %v561_v50 = vmul.f32 1.442695, %v4517_v49  ;;  %v4541_v49 = vsub.f32 %v4539_v54, %v4540_v22 }
 0x899   : > { %2955 = vpow2.f32 %v2079_v7  ;;  %v2091_v29 = vmul.f32 1.442695, %v2077_v61  ;;  %v4519_v7 = vld [vmem:[#allocation8_spill] sm:$0xff] }
 0x89a   : > { %v2081_v31 = vmul.f32 1.442695, %v2072_v28  ;;  %v2054_v27 = vpop.permute.xlu0 %2053  ;;  %v4520_v37 = vsub.f32 %v4518_v60, %v4519_v7 }
 0x89b   : > { %1600 = vadd.xlane.f32.xlu1 %v1599_v55  ;;  %v2075_v3 = vsub.f32 %v3845_v52, %v2054_v27  ;;  %v4521_v27 = vld [vmem:[#allocation20_spill] sm:$0xff]  ;;  %v4522_v55 = vld [vmem:[#allocation22_spill] sm:$0xff] }
 0x89c   : > { %2957 = vpow2.f32 %v2081_v31  ;;  %v555_v28 = vmul.f32 1.442695, %v4520_v37  ;;  %v4523_v51 = vsub.f32 %v4521_v27, %v4522_v55  ;;  %v4542_v37 = vld [vmem:[#allocation29_spill] sm:$0xff]  ;;  %v4545_v55 = vld [vmem:[#allocation36_spill] sm:$0xff] }
 0x89d   : > { %v2069_v4 = vpop.permute.xlu1 %2068  ;;  %2959 = vpow2.f32 %v549_v32  ;;  %v4048_v10 = vpop.eup %2951  ;;  %v2087_v38 = vmul.f32 1.442695, %v2075_v3 }
 0x89e   : > { %v2078_v11 = vsub.f32 %v3849_v46, %v2069_v4  ;;  %2961 = vpow2.f32 %v2091_v29  ;;  %v2128_v12 = vpop.permute.xlu0 %2127  ;;  %v1023_v32 = vmul.f32 1.442695, %v4523_v51  ;;  %v4524_v4 = vld [vmem:[#allocation9_spill] sm:$0xff]  ;;  %v4546_v51 = vld [vmem:[#allocation38_spill] sm:$0xff] }
 0x89f   : > { %1609 = vadd.xlane.f32.xlu1 %v1608_v57 }
 0x8a0   : > { %v2093_v6 = vmul.f32 1.442695, %v2078_v11  ;;  %v4525_v11 = vld [vmem:[#allocation11_spill] sm:$0xff] }
 0x8a1   : > { %v2059_v43 = vpop.permute.xlu1 %2058  ;;  %v4526_v57 = vsub.f32 %v4524_v4, %v4525_v11 }
 0x8a2   : > { %v4050_v53 = vpop.eup %2953  ;;  %2963 = vpow2.f32 %v2093_v6  ;;  %v2076_v46 = vsub.f32 %v3851_v59, %v2059_v43  ;;  %v557_v59 = vmul.f32 1.442695, %v4511_v15  ;;  %v4527_v6 = vld [vmem:[#allocation23_spill] sm:$0xff] }
 0x8a3   : > { %v2120_v52 = vpack.c.bf16 %v4050_v53, %v4048_v10  ;;  %1615 = vadd.xlane.f32.xlu1 %v1614_v1  ;;  %2965 = vpow2.f32 %v553_v20  ;;  %v4057_v41 = vpop.eup %2955  ;;  %v559_v9 = vmul.f32 1.442695, %v4526_v57 }
 0x8a4   : > { %v2089_v36 = vmul.f32 1.442695, %v2076_v46  ;;  %2967 = vpow2.f32 %v2087_v38  ;;  %v4528_v38 = vld [vmem:[#allocation26_spill] sm:$0xff] }
 0x8a5   : > { %v2126_v17 = vpop.permute.xlu1 %2125  ;;  %v4529_v43 = vsub.f32 %v4527_v6, %v4528_v38  ;;  %v4551_v38 = vld [vmem:[#allocation39_spill] sm:$0xff] }
 0x8a6   : > { %v4059_v8 = vpop.eup %2957  ;;  %2969 = vpow2.f32 %v2089_v36  ;;  %2824 = vmatprep.subr.bf16.mxu0 %v2126_v17  ;;  %v4530_v36 = vld [vmem:[#allocation21_spill] sm:$0xff] }
 0x8a7   : > { %1621 = vadd.xlane.f32.xlu1 %v1620_v63  ;;  %2825 = vmatpush3.bf16.msra.mxu0 %v2126_v17  ;;  %v2119_v18 = vpack.c.bf16 %v4059_v8, %v4057_v41  ;;  %v2960_v48 = vpop.eup %2959  ;;  %2971 = vpow2.f32 %v557_v59  ;;  %v1029_v46 = vmul.f32 1.442695, %v4529_v43  ;;  %v4531_v17 = vld [vmem:[#allocation24_spill] sm:$0xff]  ;;  %v4534_v63 = vld [vmem:[#allocation30_spill] sm:$0xff] }
 0x8a8   : > { %2826 = vmatprep.subr.bf16.mxu0 %v2128_v12  ;;  %v4075_v34 = vpop.eup %2961  ;;  %2973 = vpow2.f32 %v551_v16  ;;  %v4533_v59 = vld [vmem:[#allocation28_spill] sm:$0xff]  ;;  %v4536_v16 = vld [vmem:[#allocation25_spill] sm:$0xff] }
 0x8a9   : > { %2830 = vmatprep.mubr.msk.bf16.mxu0 %vm506_vm2, %v2119_v18  ;;  %v2130_v23 = vpop.permute.xlu1 %2129  ;;  %2975 = vpow2.f32 %v561_v50  ;;  %v4535_v18 = vsub.f32 %v4533_v59, %v4534_v63  ;;  %v1037_v50 = vmul.f32 1.442695, %v4541_v49  ;;  %v4552_v43 = vld [vmem:[#allocation40_spill] sm:$0xff]  ;;  %v4556_v63 = vsub.f32 %v3693_v45, %v3705_v58  ;;  %v4560_v45 = vld [vmem:[#allocation42_spill] sm:$0xff] }
 0x8aa   : > { %2977 = vpow2.f32 %v555_v28  ;;  %v4543_v28 = vld [vmem:[#allocation31_spill] sm:$0xff]  ;;  %v4561_v58 = vsub.f32 %v4560_v45, %v3708_v33 }
 0x8ab   : > { %2827 = vmatpush3.bf16.msra.mxu0 %v2128_v12  ;;  %2979 = vpow2.f32 %v1023_v32  ;;  %v4532_v12 = vsub.f32 %v4530_v36, %v4531_v17  ;;  %v1033_v0 = vmul.f32 1.442695, %v4535_v18  ;;  %v4547_v32 = vsub.f32 %v4545_v55, %v4546_v51  ;;  %v4565_v55 = vld [vmem:[#allocation46_spill] sm:$0xff]  ;;  %v4588_v45 = vld [vmem:[#allocation47_spill] sm:$0xff] }
 0x8ac   : > { %v4077_v40 = vpop.eup %2963  ;;  %2828 = vmatprep.subr.bf16.mxu0 %v2130_v23  ;;  %2981 = vpow2.f32 %v559_v9  ;;  %v4548_v9 = vld [vmem:[#allocation33_spill] sm:$0xff]  ;;  %v1529_v18 = vmul.f32 1.442695, %v4556_v63  ;;  %v1527_v22 = vmul.f32 1.442695, %v4561_v58  ;;  %v4566_v51 = vld [vmem:[#allocation54_spill] sm:$0xff] }
 0x8ad   : > { %771 = vperm.xlu0 %2887, %v2960_v48   ;;  %v2122_v61 = vpack.c.bf16 %v4077_v40, %v4075_v34  ;;  %v2966_v31 = vpop.eup %2965  ;;  %v1025_v15 = vmul.f32 1.442695, %v4532_v12  ;;  %2983 = vpow2.f32 %v1029_v46  ;;  %v1519_v4 = vmul.f32 1.442695, %v4547_v32  ;;  %v4554_v12 = vld [vmem:[#allocation37_spill] sm:$0xff]  ;;  %v4567_v32 = vld [vmem:[#allocation56_spill] sm:$0xff] }
 0x8ae   : > { %v4087_v29 = vpop.eup %2967  ;;  %v4553_v46 = vsub.f32 %v4551_v38, %v4552_v43  ;;  %v4590_v58 = vld [vmem:[#allocation61_spill] sm:$0xff] }
 0x8af   : > { %2829 = vmatpush3.bf16.msra.mxu0 %v2130_v23  ;;  %2985 = vpow2.f32 %v1025_v15  ;;  %v4555_v15 = vsub.f32 %v4554_v12, %v3673_v39  ;;  %v4559_v39 = vsub.f32 %v3710_v56, %v3726_v62 }
 0x8b0   : > { %v4089_v3 = vpop.eup %2969  ;;  %2987 = vpow2.f32 %v1033_v0 }
 0x8b1   : > { %781 = vperm.xlu0 %2887, %v2966_v31   ;;  %v2121_v20 = vpack.c.bf16 %v4089_v3, %v4087_v29  ;;  %v2972_v1 = vpop.eup %2971  ;;  %v4544_v31 = vsub.f32 %v4542_v37, %v4543_v28  ;;  %v1521_v59 = vmul.f32 1.442695, %v4555_v15  ;;  %v4581_v15 = vld [vmem:[#allocation49_spill] sm:$0xff] }
 0x8b2   : > { %2831 = vmatmul.mubr.msk.bf16.vlgmr.msra.gmra.mrb[24].mxu0 %vm506_vm2, %v2120_v52  ;;  %v2974_v26 = vpop.eup %2973  ;;  %v4537_v52 = vld [vmem:[#allocation27_spill] sm:$0xff] }
 0x8b3   : > { %2834 = vmatprep.mubr.msk.bf16.mxu0 %vm506_vm2, %v2121_v20  ;;  %v2976_v47 = vpop.eup %2975  ;;  %v4538_v23 = vsub.f32 %v4536_v16, %v4537_v52  ;;  %v1031_v27 = vmul.f32 1.442695, %v4544_v31  ;;  %v4564_v31 = vsub.f32 %v3898_v24, %v3904_v5  ;;  %v4574_v24 = vld [vmem:[#allocation62_spill] sm:$0xff]  ;;  %v4575_v5 = vld [vmem:[#allocation63_spill] sm:$0xff] }
 0x8b4   : > { %v2978_v60 = vpop.eup %2977  ;;  %v4576_v38 = vsub.f32 %v4574_v24, %v4575_v5  ;;  %v2113_v24 = vsel %vm506_vm2, %v4075_v34, 0.0 }
 0x8b5   : > { %791 = vperm.xlu0 %2887, %v2972_v1   ;;  %v1027_v48 = vmul.f32 1.442695, %v4538_v23  ;;  %v2980_v7 = vpop.eup %2979  ;;  %v1525_v1 = vmul.f32 1.442695, %v4553_v46  ;;  %v1533_v23 = vmul.f32 1.442695, %v4559_v39 }
 0x8b6   : > { %v2982_v11 = vpop.eup %2981  ;;  %v2029_v43 = vmul.f32 1.442695, %v4576_v38  ;;  %v4577_v46 = vld [vmem:[#allocation44_spill] sm:$0xff]  ;;  %v2107_v38 = vsel %vm506_vm2, %v4087_v29, 0.0 }
 0x8b7   : > { %2989 = vpow2.f32 %v1027_v48  ;;  %v2984_v57 = vpop.eup %2983 }
 0x8b8   : > { %776 = vperm.xlu1 %2888, %v2974_v26   ;;  %2991 = vpow2.f32 %v1037_v50 }
 0x8b9   : > { %801 = vperm.xlu0 %2887, %v2976_v47   ;;  %2993 = vpow2.f32 %v1031_v27  ;;  %v2986_v36 = vpop.eup %2985  ;;  %v4557_v47 = vld [vmem:[#allocation41_spill] sm:$0xff] }
 0x8ba   : > { %2835 = vmatmul.mubr.msk.bf16.gmra.mrb[28].mxu0 %vm506_vm2, %v2122_v61  ;;  %v4549_v61 = vld [vmem:[#allocation35_spill] sm:$0xff]  ;;  %2995 = vpow2.f32 %v1519_v4  ;;  %v2988_v17 = vpop.eup %2987  ;;  %v4558_v16 = vsub.f32 %v3676_v2, %v4557_v47  ;;  %v4568_v4 = vsub.f32 %v4566_v51, %v4567_v32  ;;  %v4584_v47 = vld [vmem:[#allocation48_spill] sm:$0xff] }
 0x8bb   : > { %v4550_v20 = vsub.f32 %v4548_v9, %v4549_v61  ;;  %v4562_v2 = vld [vmem:[#allocation43_spill] sm:$0xff]  ;;  %v4571_v61 = vld [vmem:[#allocation52_spill] sm:$0xff] }
 0x8bc   : > { %786 = vperm.xlu1 %2888, %v2978_v60   ;;  %v1523_v52 = vmul.f32 1.442695, %v4558_v16  ;;  %v4563_v60 = vsub.f32 %v3712_v30, %v4562_v2  ;;  %v2015_v30 = vmul.f32 1.442695, %v4564_v31  ;;  %v4570_v9 = vld [vmem:[#allocation51_spill] sm:$0xff]  ;;  %v4585_v16 = vld [vmem:[#allocation57_spill] sm:$0xff] }
 0x8bd   : > { %1230 = vperm.xlu0 %2887, %v2980_v7   ;;  %v1035_v6 = vmul.f32 1.442695, %v4550_v20  ;;  %v4572_v20 = vsub.f32 %v4570_v9, %v4571_v61 }
 0x8be   : > { %v1531_v7 = vmul.f32 1.442695, %v4563_v60 }
 0x8bf   : > { %2997 = vpow2.f32 %v1035_v6  ;;  %v2019_v6 = vmul.f32 1.442695, %v4572_v20  ;;  %v2098_v20 = vsel %vm506_vm2, %v4059_v8, 0.0  ;;  %v2104_v8 = vsel %vm506_vm2, %v4050_v53, 0.0 }
 0x8c0   : > { %796 = vperm.xlu1 %2888, %v2982_v11   ;;  %2999 = vpow2.f32 %v1525_v1  ;;  %v2021_v11 = vmul.f32 1.442695, %v4568_v4  ;;  %v4578_v1 = vld [vmem:[#allocation53_spill] sm:$0xff] }
 0x8c1   : > { %1245 = vperm.xlu0 %2887, %v2984_v57   ;;  %v2990_v0 = vpop.eup %2989  ;;  %3001 = vpow2.f32 %v1521_v59  ;;  %v4569_v57 = vld [vmem:[#allocation45_spill] sm:$0xff]  ;;  %v4582_v59 = vld [vmem:[#allocation59_spill] sm:$0xff] }
 0x8c2   : > { %v2992_v26 = vpop.eup %2991  ;;  %3003 = vpow2.f32 %v1529_v18  ;;  %v4583_v63 = vsub.f32 %v4582_v59, %v3950_v13  ;;  %v4589_v13 = vld [vmem:[#allocation60_spill] sm:$0xff] }
 0x8c3   : > { %v2994_v48 = vpop.eup %2993  ;;  %3005 = vpow2.f32 %v1523_v52  ;;  %v4586_v52 = vld [vmem:[#allocation58_spill] sm:$0xff]  ;;  %v759_v59 = vld [vmem:[#allocation3 + $0x18] sm:$0xff] }
 0x8c4   : > { %1235 = vperm.xlu1 %2888, %v2986_v36   ;;  %v2996_v54 = vpop.eup %2995  ;;  %3007 = vpow2.f32 %v1533_v23  ;;  %v4579_v36 = vld [vmem:[#allocation55_spill] sm:$0xff]  ;;  %v2025_v18 = vmul.f32 1.442695, %v4583_v63  ;;  %v4587_v39 = vsub.f32 %v4585_v16, %v4586_v52  ;;  %v831_v63 = vld [vmem:[#allocation4 + $0x18] sm:$0xff] }
 0x8c5   : > { %1255 = vperm.xlu0 %2887, %v2988_v17   ;;  %3009 = vpow2.f32 %v1527_v22  ;;  %v4580_v17 = vsub.f32 %v4578_v1, %v4579_v36  ;;  %v4591_v22 = vsub.f32 %v4589_v13, %v4590_v58  ;;  %v757_v1 = vld [vmem:[#allocation3 + $0x8] sm:$0xff] }
 0x8c6   : > { %3011 = vpow2.f32 %v1531_v7  ;;  %v2027_v23 = vmul.f32 1.442695, %v4587_v39  ;;  %v829_v36 = vld [vmem:[#allocation4 + $0x8] sm:$0xff] }
 0x8c7   : > { %3013 = vpow2.f32 %v2015_v30  ;;  %v2017_v12 = vmul.f32 1.442695, %v4580_v17 }
 0x8c8   : > { %1240 = vperm.xlu1 %2888, %v2990_v0   ;;  %3015 = vpow2.f32 %v2021_v11 }
 0x8c9   : > { %1265 = vperm.xlu0 %2887, %v2992_v26   ;;  %v2998_v49 = vpop.eup %2997  ;;  %3017 = vpow2.f32 %v2019_v6 }
 0x8ca   : > { %v3000_v50 = vpop.eup %2999  ;;  %3019 = vpow2.f32 %v2029_v43 }
 0x8cb   : > { %v3002_v56 = vpop.eup %3001  ;;  %v4168_v0 = vpop.xlane.xlu0 %1107  ;;  %3021 = vpow2.f32 %v2017_v12 }
 0x8cc   : > { %1250 = vperm.xlu1 %2888, %v2994_v48   ;;  %v3004_v62 = vpop.eup %3003  ;;  %3023 = vpow2.f32 %v2025_v18  ;;  %v4592_v18 = vld [vmem:[#allocation15_spill] sm:$0xff] }
 0x8cd   : > { %1726 = vperm.xlu0 %2887, %v2996_v54   ;;  %v3006_v37 = vpop.eup %3005  ;;  %3025 = vpow2.f32 %v2027_v23  ;;  %v761_v23 = vld [vmem:[#allocation3 + $0x28] sm:$0xff] }
 0x8ce   : > { %v3008_v28 = vpop.eup %3007 }
 0x8cf   : > { %v3010_v33 = vpop.eup %3009  ;;  %v4174_v54 = vpop.xlane.xlu0 %1110 }
 0x8d0   : > { %1260 = vperm.xlu1 %2888, %v2998_v49   ;;  %v3012_v27 = vpop.eup %3011  ;;  %v2023_v49 = vmul.f32 1.442695, %v4591_v22 }
 0x8d1   : > { %1741 = vperm.xlu0 %2887, %v3000_v50   ;;  %v3014_v26 = vpop.eup %3013 }
 0x8d2   : > { %v3016_v48 = vpop.eup %3015  ;;  %3027 = vpow2.f32 %v2023_v49 }
 0x8d3   : > { %v3018_v50 = vpop.eup %3017  ;;  %v4180_v60 = vpop.xlane.xlu0 %1116 }
 0x8d4   : > { %1731 = vperm.xlu1 %2888, %v3002_v56   ;;  %v3020_v2 = vpop.eup %3019 }
 0x8d5   : > { %1751 = vperm.xlu0 %2887, %v3004_v62   ;;  %v3022_v7 = vpop.eup %3021 }
 0x8d6   : > { %v3024_v56 = vpop.eup %3023 }
 0x8d8   : > { %1736 = vperm.xlu1 %2888, %v3006_v37   ;;  %v3026_v37 = vpop.eup %3025 }
 0x8d9   : > { %1761 = vperm.xlu0 %2887, %v3008_v28   ;;  %v4184_v28 = vpop.xlane.xlu0 %1122 }
 0x8db   : > { %v4182_v62 = vpop.xlane.xlu1 %1104 }
 0x8dc   : > { %1746 = vperm.xlu1 %2888, %v3010_v33   ;;  %v3028_v33 = vpop.eup %3027 }
 0x8dd   : > { %1815 = vrot.lane.b32.xlu0 %v3817_v21, %s3081_s30  ;;  %v4573_v21 = vld [vmem:[#allocation50_spill] sm:$0xff]  ;;  %v4188_v30 = vpop.permute.xlu0 %1319 }
 0x8df   : > { %v4186_v31 = vpop.xlane.xlu1 %1113 }
 0x8e0   : > { %1756 = vperm.xlu1 %2888, %v3012_v27  }
 0x8e1   : > { %1819 = vrot.lane.b32.xlu0 %v4565_v55, %s3081_s30  ;;  %v4192_v55 = vpop.permute.xlu0 %1323 }
 0x8e3   : > { %v4190_v27 = vpop.xlane.xlu1 %1119 }
 0x8e4   : > { %1813 = vrot.lane.b32.xlu1 %v4569_v57, %s3081_s30  ;;  %v2101_v57 = vsel %vm506_vm2, %v4048_v10, 0.0  ;;  %v2095_v10 = vsel %vm506_vm2, %v4057_v41, 0.0  ;;  %v2116_v41 = vsel %vm506_vm2, %v4077_v40, 0.0 }
 0x8e5   : > { %1823 = vrot.lane.b32.xlu0 %v4573_v21, %s3081_s30  ;;  %v4196_v32 = vpop.permute.xlu0 %1327 }
 0x8e7   : > { %v4194_v51 = vpop.xlane.xlu1 %1125 }
 0x8e8   : > { %1817 = vrot.lane.b32.xlu1 %v4577_v46, %s3081_s30 }
 0x8e9   : > { %1827 = vrot.lane.b32.xlu0 %v4581_v15, %s3081_s30  ;;  %v4200_v11 = vpop.permute.xlu0 %1331 }
 0x8eb   : > { %v4198_v4 = vpop.permute.xlu1 %1317 }
 0x8ec   : > { %1821 = vrot.lane.b32.xlu1 %v4584_v47, %s3081_s30  ;;  %v2110_v47 = vsel %vm506_vm2, %v4089_v3, 0.0 }
 0x8ed   : > { %2222 = vperm.xlu0 %2887, %v3014_v26  }
 0x8ef   : > { %v4204_v9 = vpop.permute.xlu1 %1321 }
 0x8f0   : > { %1825 = vrot.lane.b32.xlu1 %v4588_v45, %s3081_s30 }
 0x8f1   : > { %2237 = vperm.xlu0 %2887, %v3016_v48   ;;  %v833_v48 = vld [vmem:[#allocation4 + $0x28] sm:$0xff] }
 0x8f3   : > { %v4212_v21 = vpop.permute.xlu1 %1325 }
 0x8f4   : > { %2232 = vperm.xlu1 %2888, %v3018_v50   ;;  %v763_v50 = vld [vmem:[#allocation3 + $0x38] sm:$0xff] }
 0x8f5   : > { %2257 = vperm.xlu0 %2887, %v3020_v2   ;;  %v835_v2 = vld [vmem:[#allocation4 + $0x38] sm:$0xff] }
 0x8f7   : > { %v4222_v43 = vpop.permute.xlu1 %1329 }
 0x8f8   : > { %2227 = vperm.xlu1 %2888, %v3022_v7   ;;  %v758_v7 = vld [vmem:[#allocation3 + $0x10] sm:$0xff] }
 0x8f9   : > { %2247 = vperm.xlu0 %2887, %v3024_v56   ;;  %v830_v56 = vld [vmem:[#allocation4 + $0x10] sm:$0xff] }
 0x8fc   : > { %2252 = vperm.xlu1 %2888, %v3026_v37  }
 0x900   : > { %2242 = vperm.xlu1 %2888, %v3028_v33   ;;  %v4594_v33 = vld [vmem:[#allocation19_spill] sm:$0xff] }
 0x918   : > { %v4206_v61 = vpop.xlane.xlu0 %1603  ;;  %2102 = vadd.xlane.f32.xlu0 %v2101_v57 }
 0x91c   : > { %v4210_v6 = vpop.xlane.xlu0 %1606  ;;  %2099 = vadd.xlane.f32.xlu0 %v2098_v20 }
 0x920   : > { %2114 = vadd.xlane.f32.xlu0 %v2113_v24  ;;  %v4216_v5 = vpop.xlane.xlu0 %1612 }
 0x924   : > { %2096 = vadd.xlane.f32.xlu1 %v2095_v10  ;;  %2108 = vadd.xlane.f32.xlu0 %v2107_v38  ;;  %v4226_v46 = vpop.xlane.xlu0 %1618 }
 0x928   : > { %2105 = vadd.xlane.f32.xlu1 %v2104_v8  ;;  %v4228_v34 = vpop.xlane.xlu1 %1600 }
 0x92c   : > { %v772_v17 = vpop.permute.xlu0 %771  ;;  %2117 = vadd.xlane.f32.xlu1 %v2116_v41  ;;  %v4232_v29 = vpop.xlane.xlu1 %1609 }
 0x92d   : > { %v805_v12 = vmul.f32 %v772_v17, %v757_v1  ;;  %v837_v15 = vmul.f32 %v829_v36, %v772_v17  ;;  %v760_v1 = vld [vmem:[#allocation3 + $0x20] sm:$0xff]  ;;  %v4595_v17 = vld [vmem:[#allocation18_spill] sm:$0xff] }
 0x92e   : > { %v832_v36 = vld [vmem:[#allocation4 + $0x20] sm:$0xff] }
 0x92f   : > { %v813_v53 = vadd.f32 %v805_v12, %v4015_v14  ;;  %v845_v26 = vadd.f32 %v837_v15, %v4592_v18  ;;  %v4593_v14 = vld [vmem:[#allocation14_spill] sm:$0xff]  ;;  %v4596_v15 = vld [vmem:[#allocation64_spill] sm:$0xff]  ;;  %v1293_v18 = vld [vmem:[#allocation4] sm:$0xff] }
 0x930   : > { %v782_v16 = vpop.permute.xlu0 %781  ;;  %2111 = vadd.xlane.f32.xlu1 %v2110_v47  ;;  %v4238_v52 = vpop.xlane.xlu1 %1615 }
 0x931   : > { %821 = vst.msk [vmem:[#allocation3 + $0x8] sm:$0xff] %vm408_vm0, %v813_v53  ;;  %853 = vst.msk [vmem:[#allocation4 + $0x8] sm:$0xff] %vm408_vm0, %v845_v26  ;;  %v807_v40 = vmul.f32 %v782_v16, %v759_v59  ;;  %v839_v39 = vmul.f32 %v831_v63, %v782_v16  ;;  %v4597_v59 = vld [vmem:[#allocation13_spill] sm:$0xff] }
 0x932   : > { %v1220_v53 = vld [vmem:[#allocation3] sm:$0xff] }
 0x933   : > { %v815_v45 = vadd.f32 %v807_v40, %v4017_v42  ;;  %v847_v13 = vadd.f32 %v4593_v14, %v839_v39 }
 0x934   : > { %v792_v58 = vpop.permute.xlu0 %791  ;;  %v4244_v22 = vpop.xlane.xlu1 %1621 }
 0x935   : > { %823 = vst.msk [vmem:[#allocation3 + $0x18] sm:$0xff] %vm408_vm0, %v815_v45  ;;  %855 = vst.msk [vmem:[#allocation4 + $0x18] sm:$0xff] %vm408_vm0, %v847_v13  ;;  %v809_v3 = vmul.f32 %v792_v58, %v761_v23  ;;  %v841_v49 = vmul.f32 %v833_v48, %v792_v58  ;;  %v762_v23 = vld [vmem:[#allocation3 + $0x30] sm:$0xff]  ;;  %v4598_v58 = vld [vmem:[#allocation17_spill] sm:$0xff] }
 0x936   : > { %v834_v48 = vld [vmem:[#allocation4 + $0x30] sm:$0xff] }
 0x937   : > { %v817_v37 = vadd.f32 %v809_v3, %v4019_v25  ;;  %v849_v57 = vadd.f32 %v841_v49, %v4594_v33 }
 0x938   : > { %v802_v42 = vpop.permute.xlu0 %801  ;;  %v777_v20 = vpop.permute.xlu1 %776 }
 0x939   : > { %825 = vst.msk [vmem:[#allocation3 + $0x28] sm:$0xff] %vm408_vm0, %v817_v37  ;;  %857 = vst.msk [vmem:[#allocation4 + $0x28] sm:$0xff] %vm408_vm0, %v849_v57  ;;  %v811_v24 = vmul.f32 %v802_v42, %v763_v50  ;;  %v843_v10 = vmul.f32 %v835_v2, %v802_v42  ;;  %v806_v38 = vmul.f32 %v777_v20, %v758_v7  ;;  %v4599_v42 = vld [vmem:[#allocation16_spill] sm:$0xff] }
 0x93a   : > { %v838_v8 = vmul.f32 %v830_v56, %v777_v20 }
 0x93b   : > { %v819_v41 = vadd.f32 %v811_v24, %v4023_v19  ;;  %v851_v12 = vadd.f32 %v4595_v17, %v843_v10  ;;  %v814_v25 = vadd.f32 %v806_v38, %v4596_v15  ;;  %v1221_v24 = vld [vmem:[#allocation3 + $0x8] sm:$0xff] }
 0x93c   : > { %v846_v63 = vadd.f32 %v4597_v59, %v838_v8  ;;  %v1231_v26 = vpop.permute.xlu0 %1230  ;;  %v787_v47 = vpop.permute.xlu1 %786  ;;  %v1296_v49 = vld [vmem:[#allocation4 + $0x18] sm:$0xff] }
 0x93d   : > { %827 = vst.msk [vmem:[#allocation3 + $0x38] sm:$0xff] %vm408_vm0, %v819_v41  ;;  %859 = vst.msk [vmem:[#allocation4 + $0x38] sm:$0xff] %vm408_vm0, %v851_v12  ;;  %v1268_v16 = vmul.f32 %v1231_v26, %v1220_v53  ;;  %v1301_v19 = vmul.f32 %v1293_v18, %v1231_v26  ;;  %v808_v40 = vmul.f32 %v787_v47, %v760_v1  ;;  %v1223_v2 = vld [vmem:[#allocation3 + $0x18] sm:$0xff]  ;;  %v1294_v1 = vld [vmem:[#allocation4 + $0x8] sm:$0xff] }
 0x93e   : > { %822 = vst.msk [vmem:[#allocation3 + $0x10] sm:$0xff] %vm408_vm0, %v814_v25  ;;  %854 = vst.msk [vmem:[#allocation4 + $0x10] sm:$0xff] %vm408_vm0, %v846_v63  ;;  %v840_v39 = vmul.f32 %v832_v36, %v787_v47 }
 0x93f   : > { %v1276_v45 = vadd.f32 %v1268_v16, %v4182_v62  ;;  %v1341_v14 = vadd.f32 %v4198_v4, %v1301_v19  ;;  %v816_v13 = vadd.f32 %v808_v40, %v3980_v44 }
 0x940   : > { %v848_v3 = vadd.f32 %v840_v39, %v4598_v58  ;;  %v1246_v50 = vpop.permute.xlu0 %1245  ;;  %v797_v7 = vpop.permute.xlu1 %796  ;;  %v1298_v10 = vld [vmem:[#allocation4 + $0x28] sm:$0xff] }
 0x941   : > { %1285 = vst.msk [vmem:[#allocation3] sm:$0xff] %vm1284_vm4, %v1276_v45  ;;  %1349 = vst.msk [vmem:[#allocation4] sm:$0xff] %vm1284_vm4, %v1341_v14  ;;  %v1271_v56 = vmul.f32 %v1246_v50, %v1223_v2  ;;  %v1304_v62 = vmul.f32 %v1296_v49, %v1246_v50  ;;  %v810_v37 = vmul.f32 %v797_v7, %v762_v23  ;;  %v1225_v8 = vld [vmem:[#allocation3 + $0x28] sm:$0xff] }
 0x942   : > { %824 = vst.msk [vmem:[#allocation3 + $0x20] sm:$0xff] %vm408_vm0, %v816_v13  ;;  %856 = vst.msk [vmem:[#allocation4 + $0x20] sm:$0xff] %vm408_vm0, %v848_v3  ;;  %v842_v4 = vmul.f32 %v834_v48, %v797_v7 }
 0x943   : > { %v1279_v44 = vadd.f32 %v1271_v56, %v4186_v31  ;;  %v1344_v33 = vadd.f32 %v4192_v55, %v1304_v62  ;;  %v818_v57 = vadd.f32 %v810_v37, %v3986_v35 }
 0x944   : > { %v850_v20 = vadd.f32 %v4599_v42, %v842_v4  ;;  %v1256_v38 = vpop.permute.xlu0 %1255  ;;  %v1236_v36 = vpop.permute.xlu1 %1235  ;;  %v1300_v59 = vld [vmem:[#allocation4 + $0x38] sm:$0xff] }
 0x945   : > { %1288 = vst.msk [vmem:[#allocation3 + $0x18] sm:$0xff] %vm1284_vm4, %v1279_v44  ;;  %1352 = vst.msk [vmem:[#allocation4 + $0x18] sm:$0xff] %vm1284_vm4, %v1344_v33  ;;  %v1273_v31 = vmul.f32 %v1256_v38, %v1225_v8  ;;  %v1306_v55 = vmul.f32 %v1298_v10, %v1256_v38  ;;  %v1269_v41 = vmul.f32 %v1236_v36, %v1221_v24  ;;  %v1227_v53 = vld [vmem:[#allocation3 + $0x38] sm:$0xff]  ;;  %v1222_v18 = vld [vmem:[#allocation3 + $0x10] sm:$0xff] }
 0x946   : > { %826 = vst.msk [vmem:[#allocation3 + $0x30] sm:$0xff] %vm408_vm0, %v818_v57  ;;  %858 = vst.msk [vmem:[#allocation4 + $0x30] sm:$0xff] %vm408_vm0, %v850_v20  ;;  %v1302_v35 = vmul.f32 %v1294_v1, %v1236_v36  ;;  %v1295_v26 = vld [vmem:[#allocation4 + $0x10] sm:$0xff] }
 0x947   : > { %v1281_v17 = vadd.f32 %v1273_v31, %v4190_v27  ;;  %v1346_v12 = vadd.f32 %v4196_v32, %v1306_v55  ;;  %v1277_v15 = vadd.f32 %v1269_v41, %v4168_v0 }
 0x948   : > { %v1342_v25 = vadd.f32 %v4188_v30, %v1302_v35  ;;  %v1266_v63 = vpop.permute.xlu0 %1265  ;;  %v1241_v47 = vpop.permute.xlu1 %1240  ;;  %v1716_v48 = vld [vmem:[#allocation3] sm:$0xff] }
 0x949   : > { %1290 = vst.msk [vmem:[#allocation3 + $0x28] sm:$0xff] %vm1284_vm4, %v1281_v17  ;;  %1354 = vst.msk [vmem:[#allocation4 + $0x28] sm:$0xff] %vm1284_vm4, %v1346_v12  ;;  %v1275_v27 = vmul.f32 %v1266_v63, %v1227_v53  ;;  %v1308_v32 = vmul.f32 %v1300_v59, %v1266_v63  ;;  %v1270_v16 = vmul.f32 %v1241_v47, %v1222_v18  ;;  %v1224_v45 = vld [vmem:[#allocation3 + $0x20] sm:$0xff] }
 0x94a   : > { %1286 = vst.msk [vmem:[#allocation3 + $0x8] sm:$0xff] %vm1284_vm4, %v1277_v15  ;;  %1350 = vst.msk [vmem:[#allocation4 + $0x8] sm:$0xff] %vm1284_vm4, %v1342_v25  ;;  %v1303_v0 = vmul.f32 %v1295_v26, %v1241_v47  ;;  %v1297_v14 = vld [vmem:[#allocation4 + $0x20] sm:$0xff] }
 0x94b   : > { %v1283_v30 = vadd.f32 %v1275_v27, %v4194_v51  ;;  %v1348_v19 = vadd.f32 %v4200_v11, %v1308_v32  ;;  %v1278_v40 = vadd.f32 %v1270_v16, %v4174_v54  ;;  %v1789_v47 = vld [vmem:[#allocation4] sm:$0xff] }
 0x94c   : > { %v1343_v39 = vadd.f32 %v4204_v9, %v1303_v0  ;;  %v4288_v23 = vpop.permute.xlu0 %1726  ;;  %v1251_v13 = vpop.permute.xlu1 %1250  ;;  %v1719_v50 = vld [vmem:[#allocation3 + $0x18] sm:$0xff] }
 0x94d   : > { %1292 = vst.msk [vmem:[#allocation3 + $0x38] sm:$0xff] %vm1284_vm4, %v1283_v30  ;;  %1356 = vst.msk [vmem:[#allocation4 + $0x38] sm:$0xff] %vm1284_vm4, %v1348_v19  ;;  %v1764_v51 = vmul.f32 %v4288_v23, %v1716_v48  ;;  %v1272_v11 = vmul.f32 %v1251_v13, %v1224_v45  ;;  %v1305_v54 = vmul.f32 %v1297_v14, %v1251_v13  ;;  %v1226_v2 = vld [vmem:[#allocation3 + $0x30] sm:$0xff]  ;;  %v1792_v25 = vld [vmem:[#allocation4 + $0x18] sm:$0xff] }
 0x94e   : > { %1287 = vst.msk [vmem:[#allocation3 + $0x10] sm:$0xff] %vm1284_vm4, %v1278_v40  ;;  %1351 = vst.msk [vmem:[#allocation4 + $0x10] sm:$0xff] %vm1284_vm4, %v1343_v39  ;;  %v1299_v7 = vld [vmem:[#allocation4 + $0x30] sm:$0xff]  ;;  %v1797_v32 = vmul.f32 %v1789_v47, %v4288_v23 }
 0x94f   : > { %v1772_v9 = vadd.f32 %v1764_v51, %v4228_v34  ;;  %v1280_v58 = vadd.f32 %v1272_v11, %v4180_v60  ;;  %v1345_v3 = vadd.f32 %v4212_v21, %v1305_v54 }
 0x950   : > { %v1742_v49 = vpop.permute.xlu0 %1741  ;;  %v1261_v56 = vpop.permute.xlu1 %1260  ;;  %v1721_v33 = vld [vmem:[#allocation3 + $0x28] sm:$0xff] }
 0x951   : > { %1781 = vst.msk [vmem:[#allocation3] sm:$0xff] %vm1780_vm5, %v1772_v9  ;;  %v1767_v62 = vmul.f32 %v1742_v49, %v1719_v50  ;;  %v1274_v37 = vmul.f32 %v1261_v56, %v1226_v2  ;;  %v1307_v4 = vmul.f32 %v1299_v7, %v1261_v56  ;;  %v1717_v57 = vld [vmem:[#allocation3 + $0x8] sm:$0xff]  ;;  %v1800_v59 = vmul.f32 %v1792_v25, %v1742_v49 }
 0x952   : > { %1289 = vst.msk [vmem:[#allocation3 + $0x20] sm:$0xff] %vm1284_vm4, %v1280_v58  ;;  %1353 = vst.msk [vmem:[#allocation4 + $0x20] sm:$0xff] %vm1284_vm4, %v1345_v3  ;;  %v1790_v31 = vld [vmem:[#allocation4 + $0x8] sm:$0xff] }
 0x953   : > { %v1775_v34 = vadd.f32 %v1767_v62, %v4232_v29  ;;  %v1282_v60 = vadd.f32 %v1274_v37, %v4184_v28  ;;  %v1347_v21 = vadd.f32 %v4222_v43, %v1307_v4  ;;  %v1794_v27 = vld [vmem:[#allocation4 + $0x28] sm:$0xff] }
 0x954   : > { %v1752_v44 = vpop.permute.xlu0 %1751  ;;  %v1732_v42 = vpop.permute.xlu1 %1731  ;;  %v1723_v28 = vld [vmem:[#allocation3 + $0x38] sm:$0xff] }
 0x955   : > { %1784 = vst.msk [vmem:[#allocation3 + $0x18] sm:$0xff] %vm1780_vm5, %v1775_v34  ;;  %v1769_v20 = vmul.f32 %v1752_v44, %v1721_v33  ;;  %v1765_v24 = vmul.f32 %v1732_v42, %v1717_v57  ;;  %v1718_v8 = vld [vmem:[#allocation3 + $0x10] sm:$0xff]  ;;  %v1798_v55 = vmul.f32 %v1790_v31, %v1732_v42  ;;  %v1802_v16 = vmul.f32 %v1794_v27, %v1752_v44  ;;  %v1796_v39 = vld [vmem:[#allocation4 + $0x38] sm:$0xff] }
 0x956   : > { %1291 = vst.msk [vmem:[#allocation3 + $0x30] sm:$0xff] %vm1284_vm4, %v1282_v60  ;;  %1355 = vst.msk [vmem:[#allocation4 + $0x30] sm:$0xff] %vm1284_vm4, %v1347_v21  ;;  %v1791_v48 = vld [vmem:[#allocation4 + $0x10] sm:$0xff] }
 0x957   : > { %v1777_v10 = vadd.f32 %v1769_v20, %v4238_v52  ;;  %v1773_v29 = vadd.f32 %v1765_v24, %v4206_v61 }
 0x958   : > { %v1762_v38 = vpop.permute.xlu0 %1761  ;;  %v1737_v43 = vpop.permute.xlu1 %1736 }
 0x959   : > { %1786 = vst.msk [vmem:[#allocation3 + $0x28] sm:$0xff] %vm1780_vm5, %v1777_v10  ;;  %1782 = vst.msk [vmem:[#allocation3 + $0x8] sm:$0xff] %vm1780_vm5, %v1773_v29  ;;  %v1771_v1 = vmul.f32 %v1762_v38, %v1723_v28  ;;  %v1766_v36 = vmul.f32 %v1737_v43, %v1718_v8  ;;  %v1720_v52 = vld [vmem:[#allocation3 + $0x20] sm:$0xff]  ;;  %v1804_v45 = vmul.f32 %v1796_v39, %v1762_v38 }
 0x95a   : > { %v1799_v14 = vmul.f32 %v1791_v48, %v1737_v43  ;;  %v1793_v54 = vld [vmem:[#allocation4 + $0x20] sm:$0xff] }
 0x95b   : > { %v1779_v41 = vadd.f32 %v1771_v1, %v4244_v22  ;;  %v1774_v35 = vadd.f32 %v1766_v36, %v4210_v6 }
 0x95c   : > { %v1816_v17 = vpop.permute.xlu0 %1815  ;;  %v1747_v12 = vpop.permute.xlu1 %1746 }
 0x95d   : > { %1788 = vst.msk [vmem:[#allocation3 + $0x38] sm:$0xff] %vm1780_vm5, %v1779_v41  ;;  %1783 = vst.msk [vmem:[#allocation3 + $0x10] sm:$0xff] %vm1780_vm5, %v1774_v35  ;;  %v1838_v61 = vadd.f32 %v1816_v17, %v1798_v55  ;;  %v1768_v15 = vmul.f32 %v1747_v12, %v1720_v52  ;;  %v1722_v18 = vld [vmem:[#allocation3 + $0x30] sm:$0xff] }
 0x95e   : > { %v1795_v3 = vld [vmem:[#allocation4 + $0x30] sm:$0xff] }
 0x95f   : > { %1846 = vst.msk [vmem:[#allocation4 + $0x8] sm:$0xff] %vm1780_vm5, %v1838_v61  ;;  %v1776_v63 = vadd.f32 %v1768_v15, %v4216_v5 }
 0x960   : > { %v1820_v53 = vpop.permute.xlu0 %1819  ;;  %v1757_v22 = vpop.permute.xlu1 %1756  ;;  %v2213_v8 = vld [vmem:[#allocation3 + $0x8] sm:$0xff] }
 0x961   : > { %1785 = vst.msk [vmem:[#allocation3 + $0x20] sm:$0xff] %vm1780_vm5, %v1776_v63  ;;  %v1840_v6 = vadd.f32 %v1820_v53, %v1800_v59  ;;  %v1770_v26 = vmul.f32 %v1757_v22, %v1722_v18  ;;  %v1803_v49 = vmul.f32 %v1795_v3, %v1757_v22  ;;  %v2215_v22 = vld [vmem:[#allocation3 + $0x18] sm:$0xff] }
 0x963   : > { %1848 = vst.msk [vmem:[#allocation4 + $0x18] sm:$0xff] %vm1780_vm5, %v1840_v6  ;;  %v1778_v0 = vadd.f32 %v1770_v26, %v4226_v46  ;;  %v1801_v46 = vmul.f32 %v1793_v54, %v1747_v12  ;;  %v2212_v12 = vld [vmem:[#allocation3] sm:$0xff] }
 0x964   : > { %v1824_v30 = vpop.permute.xlu0 %1823  ;;  %v1814_v19 = vpop.permute.xlu1 %1813  ;;  %v2214_v10 = vld [vmem:[#allocation3 + $0x10] sm:$0xff]  ;;  %v2219_v27 = vld [vmem:[#allocation3 + $0x38] sm:$0xff] }
 0x965   : > { %1787 = vst.msk [vmem:[#allocation3 + $0x30] sm:$0xff] %vm1780_vm5, %v1778_v0  ;;  %v1842_v5 = vadd.f32 %v1824_v30, %v1802_v16  ;;  %v1837_v40 = vadd.f32 %v1814_v19, %v1797_v32  ;;  %v2217_v30 = vld [vmem:[#allocation3 + $0x28] sm:$0xff] }
 0x967   : > { %1850 = vst.msk [vmem:[#allocation4 + $0x28] sm:$0xff] %vm1780_vm5, %v1842_v5  ;;  %1845 = vst.msk [vmem:[#allocation4] sm:$0xff] %vm1780_vm5, %v1837_v40 }
 0x968   : > { %v1828_v23 = vpop.permute.xlu0 %1827  ;;  %v1818_v13 = vpop.permute.xlu1 %1817  ;;  %v2216_v61 = vld [vmem:[#allocation3 + $0x20] sm:$0xff] }
 0x969   : > { %v1844_v51 = vadd.f32 %v1828_v23, %v1804_v45  ;;  %v1839_v11 = vadd.f32 %v1818_v13, %v1799_v14 }
 0x96b   : > { %1852 = vst.msk [vmem:[#allocation4 + $0x38] sm:$0xff] %vm1780_vm5, %v1844_v51  ;;  %1847 = vst.msk [vmem:[#allocation4 + $0x10] sm:$0xff] %vm1780_vm5, %v1839_v11 }
 0x96c   : > { %v1822_v9 = vpop.permute.xlu1 %1821  ;;  %v4328_v60 = vpop.permute.xlu0 %2222  ;;  %v2218_v55 = vld [vmem:[#allocation3 + $0x30] sm:$0xff] }
 0x96d   : > { %v1841_v58 = vadd.f32 %v1822_v9, %v1801_v46  ;;  %v2260_v15 = vmul.f32 %v4328_v60, %v2212_v12  ;;  %v2288_v46 = vld [vmem:[#allocation4 + $0x18] sm:$0xff] }
 0x96e   : > { %v2285_v54 = vld [vmem:[#allocation4] sm:$0xff] }
 0x96f   : > { %1849 = vst.msk [vmem:[#allocation4 + $0x20] sm:$0xff] %vm1780_vm5, %v1841_v58 }
 0x970   : > { %v1826_v50 = vpop.permute.xlu1 %1825  ;;  %v2238_v33 = vpop.permute.xlu0 %2237 }
 0x971   : > { %v1843_v2 = vadd.f32 %v1826_v50, %v1803_v49  ;;  %v2263_v6 = vmul.f32 %v2238_v33, %v2215_v22  ;;  %v2296_v3 = vmul.f32 %v2288_v46, %v2238_v33 }
 0x972   : > { %v2287_v23 = vld [vmem:[#allocation4 + $0x10] sm:$0xff] }
 0x973   : > { %1851 = vst.msk [vmem:[#allocation4 + $0x30] sm:$0xff] %vm1780_vm5, %v1843_v2 }
 0x974   : > { %v4330_v57 = vpop.permute.xlu0 %2257  ;;  %v2233_v42 = vpop.permute.xlu1 %2232 }
 0x975   : > { %v2262_v29 = vmul.f32 %v2233_v42, %v2214_v10  ;;  %v2267_v32 = vmul.f32 %v4330_v57, %v2219_v27  ;;  %v2295_v51 = vmul.f32 %v2287_v23, %v2233_v42 }
 0x978   : > { %v4332_v20 = vpop.permute.xlu0 %2247  ;;  %v4334_v24 = vpop.permute.xlu1 %2227 }
 0x979   : > { %v2261_v1 = vmul.f32 %v4334_v24, %v2213_v8  ;;  %v2265_v19 = vmul.f32 %v4332_v20, %v2217_v30 }
 0x97c   : > { %v4336_v43 = vpop.permute.xlu1 %2252 }
 0x97d   : > { %v2266_v41 = vmul.f32 %v4336_v43, %v2218_v55 }
 0x980   : > { %v4342_v35 = vpop.permute.xlu1 %2242 }
 0x981   : > { %v2264_v25 = vmul.f32 %v4342_v35, %v2216_v61 }
 0x985   : > { %v2832_v7 = vpop.f32.mrb[24].mxu0 }
 0x986   : > { %2313 = vrot.lane.b32.xlu1 %v2832_v7, %s3082_s4  ;;  %v2181_v56 = vpop.f32.mrb[25].mxu0 }
 0x987   : > { %v2833_v62 = vpop.f32.mrb[26].mxu0 }
 0x988   : > { %2315 = vrot.lane.b32.xlu0 %v2833_v62, %s3082_s4  ;;  %v2184_v37 = vpop.f32.mrb[27].mxu0 }
 0x98a   : > { %2309 = vrot.lane.b32.xlu1 %v2181_v56, %s3082_s4  ;;  %v2293_v56 = vmul.f32 %v2285_v54, %v4328_v60 }
 0x98c   : > { %2311 = vrot.lane.b32.xlu0 %v2184_v37, %s3082_s4  ;;  %v2286_v37 = vld [vmem:[#allocation4 + $0x8] sm:$0xff] }
 0x98d   : > { %v2836_v4 = vpop.f32.mrb[28].mxu0 }
 0x98e   : > { %v2197_v34 = vpop.f32.mrb[29].mxu0 }
 0x98f   : > { %2317 = vrot.lane.b32.xlu1 %v2197_v34, %s3082_s4  ;;  %v2837_v21 = vpop.f32.mrb[30].mxu0 }
 0x990   : > { %v2200_v44 = vpop.f32.mrb[31].mxu0 }
 0x991   : > { %2319 = vrot.lane.b32.xlu0 %v2200_v44, %s3082_s4 }
 0x993   : > { %2321 = vrot.lane.b32.xlu1 %v2836_v4, %s3082_s4 }
 0x995   : > { %2323 = vrot.lane.b32.xlu0 %v2837_v21, %s3082_s4  ;;  %v2294_v21 = vmul.f32 %v2286_v37, %v4334_v24 }
 0x9a5   : > { %v2103_v38 = vpop.xlane.xlu0 %2102 }
 0x9a6   : > { %v2270_v28 = vadd.f32 %v2262_v29, %v2103_v38  ;;  %v2289_v29 = vld [vmem:[#allocation4 + $0x20] sm:$0xff] }
 0x9a8   : > { %2279 = vst.msk [vmem:[#allocation3 + $0x10] sm:$0xff] %vm2276_vm6, %v2270_v28  ;;  %v2297_v28 = vmul.f32 %v2289_v29, %v4342_v35 }
 0x9a9   : > { %v2100_v36 = vpop.xlane.xlu0 %2099 }
 0x9aa   : > { %v2269_v31 = vadd.f32 %v2261_v1, %v2100_v36  ;;  %v2290_v1 = vld [vmem:[#allocation4 + $0x28] sm:$0xff] }
 0x9ab   : > { %v2298_v55 = vmul.f32 %v2290_v1, %v4332_v20 }
 0x9ac   : > { %2278 = vst.msk [vmem:[#allocation3 + $0x8] sm:$0xff] %vm2276_vm6, %v2269_v31 }
 0x9ad   : > { %v2115_v17 = vpop.xlane.xlu0 %2114 }
 0x9ae   : > { %v2274_v52 = vadd.f32 %v2266_v41, %v2115_v17 }
 0x9af   : > { %v2362_v39 = vld [vmem:[#allocation3 + $0x10] sm:$0xff] }
 0x9b0   : > { %2283 = vst.msk [vmem:[#allocation3 + $0x30] sm:$0xff] %vm2276_vm6, %v2274_v52  ;;  %v2370_v45 = vmax.f32 %v2362_v39, 1e-30  ;;  %v2291_v52 = vld [vmem:[#allocation4 + $0x30] sm:$0xff] }
 0x9b1   : > { %v2109_v59 = vpop.xlane.xlu0 %2108  ;;  %v2097_v63 = vpop.xlane.xlu1 %2096  ;;  %v2299_v35 = vmul.f32 %v2291_v52, %v4336_v43 }
 0x9b2   : > { %v2272_v53 = vadd.f32 %v2264_v25, %v2109_v59  ;;  %v2268_v18 = vadd.f32 %v2260_v15, %v2097_v63  ;;  %3029 = vrcp.f32 %v2370_v45  ;;  %v2292_v63 = vld [vmem:[#allocation4 + $0x38] sm:$0xff] }
 0x9b3   : > { %v2361_v11 = vld [vmem:[#allocation3 + $0x8] sm:$0xff] }
 0x9b4   : > { %2281 = vst.msk [vmem:[#allocation3 + $0x20] sm:$0xff] %vm2276_vm6, %v2272_v53  ;;  %2277 = vst.msk [vmem:[#allocation3] sm:$0xff] %vm2276_vm6, %v2268_v18  ;;  %v2369_v50 = vmax.f32 %v2361_v11, 1e-30 }
 0x9b5   : > { %v2106_v26 = vpop.xlane.xlu1 %2105 }
 0x9b6   : > { %v2271_v47 = vadd.f32 %v2263_v6, %v2106_v26  ;;  %v2300_v26 = vmul.f32 %v2292_v63, %v4330_v57 }
 0x9b7   : > { %v2366_v42 = vld [vmem:[#allocation3 + $0x30] sm:$0xff] }
 0x9b8   : > { %2280 = vst.msk [vmem:[#allocation3 + $0x18] sm:$0xff] %vm2276_vm6, %v2271_v47  ;;  %v2374_v36 = vmax.f32 %v2366_v42, 1e-30 }
 0x9b9   : > { %v2118_v16 = vpop.xlane.xlu1 %2117 }
 0x9ba   : > { %v2275_v0 = vadd.f32 %v2267_v32, %v2118_v16 }
 0x9bb   : > { %v2360_v14 = vld [vmem:[#allocation3] sm:$0xff] }
 0x9bc   : > { %2284 = vst.msk [vmem:[#allocation3 + $0x38] sm:$0xff] %vm2276_vm6, %v2275_v0  ;;  %v2368_v9 = vmax.f32 %v2360_v14, 1e-30  ;;  %v2364_v2 = vld [vmem:[#allocation3 + $0x20] sm:$0xff]  ;;  %v3030_v31 = vpop.eup %3029 }
 0x9bd   : > { %v2112_v5 = vpop.xlane.xlu1 %2111  ;;  %v2372_v44 = vmax.f32 %v2364_v2, 1e-30 }
 0x9be   : > { %v2273_v40 = vadd.f32 %v2265_v19, %v2112_v5 }
 0x9bf   : > { %v2363_v48 = vld [vmem:[#allocation3 + $0x18] sm:$0xff] }
 0x9c0   : > { %2282 = vst.msk [vmem:[#allocation3 + $0x28] sm:$0xff] %vm2276_vm6, %v2273_v40  ;;  %v2371_v13 = vmax.f32 %v2363_v48, 1e-30 }
 0x9c2   : > { %3031 = vrcp.f32 %v2371_v13 }
 0x9c3   : > { %3033 = vrcp.f32 %v2368_v9  ;;  %v2367_v8 = vld [vmem:[#allocation3 + $0x38] sm:$0xff] }
 0x9c4   : > { %3035 = vrcp.f32 %v2369_v50  ;;  %v2375_v12 = vmax.f32 %v2367_v8, 1e-30 }
 0x9c5   : > { %3037 = vrcp.f32 %v2372_v44 }
 0x9c7   : > { %v2365_v4 = vld [vmem:[#allocation3 + $0x28] sm:$0xff] }
 0x9c8   : > { %v2373_v38 = vmax.f32 %v2365_v4, 1e-30 }
 0x9ca   : > { %3039 = vrcp.f32 %v2373_v38 }
 0x9cb   : > { %3041 = vrcp.f32 %v2374_v36 }
 0x9cc   : > { %v3032_v25 = vpop.eup %3031  ;;  %3043 = vrcp.f32 %v2375_v12 }
 0x9cd   : > { %v3034_v6 = vpop.eup %3033 }
 0x9ce   : > { %v3036_v0 = vpop.eup %3035 }
 0x9cf   : > { %v3038_v40 = vpop.eup %3037 }
 0x9d4   : > { %v3040_v14 = vpop.eup %3039 }
 0x9d5   : > { %v3042_v11 = vpop.eup %3041 }
 0x9f8   : > { %v2314_v58 = vpop.permute.xlu1 %2313 }
 0x9f9   : > { %v2335_v49 = vadd.f32 %v2314_v58, %v2295_v51  ;;  %v3044_v58 = vpop.eup %3043 }
 0x9fa   : > { %v2316_v7 = vpop.permute.xlu0 %2315 }
 0x9fb   : > { %2343 = vst.msk [vmem:[#allocation4 + $0x10] sm:$0xff] %vm2276_vm6, %v2335_v49  ;;  %v2336_v62 = vadd.f32 %v2316_v7, %v2296_v3 }
 0x9fc   : > { %v2310_v34 = vpop.permute.xlu1 %2309 }
 0x9fd   : > { %2344 = vst.msk [vmem:[#allocation4 + $0x18] sm:$0xff] %vm2276_vm6, %v2336_v62  ;;  %v2333_v33 = vadd.f32 %v2310_v34, %v2293_v56 }
 0x9fe   : > { %v2312_v10 = vpop.permute.xlu0 %2311 }
 0x9ff   : > { %2341 = vst.msk [vmem:[#allocation4] sm:$0xff] %vm2276_vm6, %v2333_v33  ;;  %v2334_v60 = vadd.f32 %v2312_v10, %v2294_v21 }
 0xa01   : > { %2342 = vst.msk [vmem:[#allocation4 + $0x8] sm:$0xff] %vm2276_vm6, %v2334_v60  ;;  %v2318_v24 = vpop.permute.xlu1 %2317 }
 0xa02   : > { %v2386_v41 = vld [vmem:[#allocation4 + $0x10] sm:$0xff]  ;;  %v2337_v17 = vadd.f32 %v2318_v24, %v2297_v28 }
 0xa03   : > { %v2394_v61 = vmul.f32 %v3030_v31, %v2386_v41  ;;  %v2320_v15 = vpop.permute.xlu0 %2319 }
 0xa04   : > { %v2387_v59 = vld [vmem:[#allocation4 + $0x18] sm:$0xff]  ;;  %2345 = vst.msk [vmem:[#allocation4 + $0x20] sm:$0xff] %vm2276_vm6, %v2337_v17  ;;  %v2338_v20 = vadd.f32 %v2320_v15, %v2298_v55 }
 0xa05   : > { %v2640_v53 = vpack.c.bf16 %v2394_v61, %v2394_v61  ;;  %v2395_v18 = vmul.f32 %v3032_v25, %v2387_v59  ;;  %v2322_v22 = vpop.permute.xlu1 %2321 }
 0xa06   : > { %v2384_v47 = vld [vmem:[#allocation4] sm:$0xff]  ;;  %2346 = vst.msk [vmem:[#allocation4 + $0x28] sm:$0xff] %vm2276_vm6, %v2338_v20  ;;  %v2339_v43 = vadd.f32 %v2322_v22, %v2299_v35 }
 0xa07   : > { %2435 = vst.msk [vmem:[%s4366_s7 + $0x8] sm:$0xf] %vm2432_vm7, %v2640_v53  ;;  %v2641_v27 = vpack.c.bf16 %v2395_v18, %v2395_v18  ;;  %v2392_v32 = vmul.f32 %v3034_v6, %v2384_v47  ;;  %v2324_v16 = vpop.permute.xlu0 %2323 }
 0xa08   : > { %v2385_v30 = vld [vmem:[#allocation4 + $0x8] sm:$0xff]  ;;  %2347 = vst.msk [vmem:[#allocation4 + $0x30] sm:$0xff] %vm2276_vm6, %v2339_v43  ;;  %v2340_v19 = vadd.f32 %v2324_v16, %v2300_v26 }
 0xa09   : > { %2436 = vst.msk [vmem:[%s4366_s7 + $0xc] sm:$0xf] %vm2432_vm7, %v2641_v27  ;;  %v2638_v57 = vpack.c.bf16 %v2392_v32, %v2392_v32  ;;  %v2393_v5 = vmul.f32 %v3036_v0, %v2385_v30 }
 0xa0a   : > { %2348 = vst.msk [vmem:[#allocation4 + $0x38] sm:$0xff] %vm2276_vm6, %v2340_v19 }
 0xa0b   : > { %2433 = vst.msk [vmem:[%s4366_s7] sm:$0xf] %vm2432_vm7, %v2638_v57  ;;  %v2639_v39 = vpack.c.bf16 %v2393_v5, %v2393_v5  ;;  %v2388_v48 = vld [vmem:[#allocation4 + $0x20] sm:$0xff] }
 0xa0c   : > { %v2396_v45 = vmul.f32 %v3038_v40, %v2388_v48 }
 0xa0d   : > { %2434 = vst.msk [vmem:[%s4366_s7 + $0x4] sm:$0xf] %vm2432_vm7, %v2639_v39  ;;  %v2389_v23 = vld [vmem:[#allocation4 + $0x28] sm:$0xff] }
 0xa0e   : > { %v2642_v13 = vpack.c.bf16 %v2396_v45, %v2396_v45  ;;  %v2397_v51 = vmul.f32 %v3040_v14, %v2389_v23 }
 0xa0f   : > { %v2390_v54 = vld [vmem:[#allocation4 + $0x30] sm:$0xff] }
 0xa10   : > { %2437 = vst.msk [vmem:[%s4366_s7 + $0x10] sm:$0xf] %vm2432_vm7, %v2642_v13  ;;  %v2643_v46 = vpack.c.bf16 %v2397_v51, %v2397_v51  ;;  %v2398_v9 = vmul.f32 %v3042_v11, %v2390_v54 }
 0xa11   : > { %v2391_v3 = vld [vmem:[#allocation4 + $0x38] sm:$0xff] }
 0xa12   : > { %2438 = vst.msk [vmem:[%s4366_s7 + $0x14] sm:$0xf] %vm2432_vm7, %v2643_v46  ;;  %v2644_v49 = vpack.c.bf16 %v2398_v9, %v2398_v9  ;;  %v2399_v50 = vmul.f32 %v3044_v58, %v2391_v3 }
 0xa14   : > { %2439 = vst.msk [vmem:[%s4366_s7 + $0x18] sm:$0xf] %vm2432_vm7, %v2644_v49  ;;  %v2645_v2 = vpack.c.bf16 %v2399_v50, %v2399_v50 }
 0xa16   : > { %2440 = vst.msk [vmem:[%s4366_s7 + $0x1c] sm:$0xf] %vm2432_vm7, %v2645_v2 }
 0xa17 PF: > { %s13_s14 = sadd.s32 1, %s3072_s14   ;;  %s4600_s12 = smov %s3068_s13 }
 0xa18   : > { %p10_p5 = scmp.ge.s32.totalorder %s13_s14, 4   ;;  %s4601_s13 = smov %s4603_s15 }
 0xa1a   :  { %12 = sbr.rel (!%p10_p5) target bundleno = 2 (0x2), region = 79 }

</bundles_post_ra>
